<compile_context>
chip_gen: v5e
topology: v5e:2x2
jax: 0.10.0
libtpu: 0.0.40
codegen_flags: <defaults>
</compile_context>

<pallas_src>
import functools

import jax
import jax.numpy as jnp
import numpy as np
from jax.experimental import pallas as pl
from jax.experimental.pallas import tpu as pltpu

EPS = 1e-5


# ---------------------------------------------------------------------------
# Fused kernel.  Activations live as (Nb*H, W*C) f32 values; each 3x3 conv is
# a single (Nb*H, 3*W*C) @ (3*W*C, W*C) bf16 MXU dot.
# ---------------------------------------------------------------------------
def _unet_block_kernel(x_ref, gb_ref, rmat_ref, bmat_ref, wt1_ref, wt2_ref,
                       o_ref, *, Nb, H, W, C, G):
    WC = W * C
    NbH = Nb * H
    cg = C // G
    inv_cnt = 1.0 / float(H * W * cg)

    # Per-image row masks for the conv zero-halo (top/bottom row of every image
    # fused into this block).  Built from a per-image iota -> no integer mod.
    row_in_img = jax.lax.broadcasted_iota(jnp.int32, (Nb, H, 1), 1).reshape(NbH, 1)
    not_first = row_in_img != 0          # row y has a valid y-1 neighbour
    not_last = row_in_img != (H - 1)     # row y has a valid y+1 neighbour

    gamma1, beta1 = gb_ref[0:1, :], gb_ref[1:2, :]
    gamma2, beta2 = gb_ref[2:3, :], gb_ref[3:4, :]
    cbias1, cbias2 = gb_ref[4:5, :], gb_ref[5:6, :]

    rmat = rmat_ref[...]          # (WC, G) 0/1: lane -> its group   (reduce)
    bmat = bmat_ref[...]          # (G, WC) 0/1: group -> its lanes  (broadcast)

    def gn_silu(v2d, gamma, beta):
        # Per-image GroupNorm + SiLU, lane-dense.  v2d: (Nb*H, WC) f32.
        v3 = v2d.reshape(Nb, H, WC)
        # Per-image sums of x and x^2 over H (sublane reduce), then ONE small
        # MXU dot reduces over the lanes of each group (one-pass variance).
        s2 = jnp.concatenate(
            [jnp.sum(v3, axis=1), jnp.sum(v3 * v3, axis=1)], axis=0)       # (2Nb, WC)
        g2 = jnp.dot(s2, rmat, preferred_element_type=jnp.float32) * inv_cnt  # (2Nb, G)
        mean_g = g2[:Nb]                                      # E[x]   per (img, group)
        var_g = jnp.maximum(g2[Nb:] - mean_g * mean_g, 0.0)   # E[x^2] - E[x]^2
        inv_g = jax.lax.rsqrt(var_g + EPS)
        # Broadcast per-group scale/shift back to lanes with one tiny dot.
        sg = jnp.concatenate([inv_g, -mean_g * inv_g], axis=0)             # (2Nb, G)
        sb = jnp.dot(sg, bmat, preferred_element_type=jnp.float32)         # (2Nb, WC)
        scale = (sb[:Nb] * gamma)[:, None, :]                 # (Nb, 1, WC)
        shift = (sb[Nb:] * gamma + beta)[:, None, :]
        y = v3 * scale + shift
        y = y * jax.nn.sigmoid(y)                             # SiLU (EUP)
        return y.reshape(NbH, WC)

    def conv3x3(h2d, wt_ref, cbias):
        # Row-shifted copies built in registers (no VMEM halo scratch, no
        # sublane-misaligned memory loads); zero halo via the per-image masks.
        zrow = jnp.zeros((1, WC), jnp.float32)
        dn = jnp.concatenate([zrow, h2d[:NbH - 1, :]], axis=0)   # holds h[y-1]
        up = jnp.concatenate([h2d[1:, :], zrow], axis=0)         # holds h[y+1]
        dn = jnp.where(not_first, dn, 0.0)
        up = jnp.where(not_last, up, 0.0)
        # Single concatenated-K dot per conv: (Nb*H, 3*WC) @ (3*WC, WC).
        lhs = jnp.concatenate([dn.astype(jnp.bfloat16),
                               h2d.astype(jnp.bfloat16),
                               up.astype(jnp.bfloat16)], axis=1)
        out = jnp.dot(lhs, wt_ref[...], preferred_element_type=jnp.float32)
        return out + cbias

    x = x_ref[...].astype(jnp.float32).reshape(NbH, WC)
    h = gn_silu(x, gamma1, beta1)
    h = conv3x3(h, wt1_ref, cbias1)
    h = gn_silu(h, gamma2, beta2)
    h = conv3x3(h, wt2_ref, cbias2)
    # Residual add (re-read x_ref so x need not stay live in vregs).
    o_ref[...] = (x_ref[...].astype(jnp.float32)
                  + h.reshape(Nb, H, WC)).astype(o_ref.dtype)


# ---------------------------------------------------------------------------
# Wrapper-side parameter preprocessing (plain-JAX glue, done once)
# ---------------------------------------------------------------------------
def _pytorch_groupnorm_groups(C, num_groups=8):
    g = min(num_groups, C)
    while g > 1 and C % g != 0:
        g -= 1
    return g


def _pick_batch_block(N, H, target_rows=256):
    """Largest Nb with Nb*H <= target_rows, keeping >=2 grid steps (v7x)."""
    best = 1
    for nb in range(1, N + 1):
        if N % nb != 0 or nb * H > target_rows:
            continue
        if N >= 2 and N // nb < 2:
            continue
        best = nb
    return best


def _toeplitz_weights(w_hwio, W):
    """(kH,kW,Cin,Cout) conv weights -> (kH*W*Cin, W*Cout) banded matrix.

    wt[dy, xin*Cin+ci, xout*Cout+co] = w[dy, dx, ci, co] with xin = xout+dx-1,
    zero outside the band (zero padding along W folded into the matrix).
    """
    kH, kW, Cin, Cout = w_hwio.shape
    xin = np.arange(W)[:, None]
    xout = np.arange(W)[None, :]
    wt = jnp.zeros((kH, W, Cin, W, Cout), jnp.float32)
    for dx in range(kW):
        band = jnp.asarray(xin == xout + dx - (kW // 2), jnp.float32)  # (W, W)
        wt = wt + (band[None, :, None, :, None]
                   * w_hwio[:, dx].astype(jnp.float32)[:, None, :, None, :])
    return wt.reshape(kH * W * Cin, W * Cout)


def unet_block_forward(x_nchw, params, num_groups=8, batch_block=None):
    """UNetBlock(in_ch=C, out_ch=C, up=False, down=False, attention=False)."""
    N, C, H, W = x_nchw.shape
    WC = W * C
    G = _pytorch_groupnorm_groups(C, num_groups)
    cg = C // G

    Nb = _pick_batch_block(N, H) if batch_block is None else batch_block
    assert N % Nb == 0

    # NCHW -> NHWC -> lane-dense (N, H, W*C)
    x2d = jnp.transpose(x_nchw, (0, 2, 3, 1)).reshape(N, H, WC)

    # Per-channel params tiled across W so they broadcast over the lane axis.
    def tile_w(p):
        return jnp.tile(p.astype(jnp.float32), W)

    gb = jnp.stack([tile_w(params["gn1_w"]), tile_w(params["gn1_b"]),
                    tile_w(params["gn2_w"]), tile_w(params["gn2_b"]),
                    tile_w(params["conv1_b"]), tile_w(params["conv2_b"])],
                   axis=0)                                     # (6, WC)

    # 0/1 group-membership matrices: reduce (WC, G) and broadcast (G, WC).
    gid = (np.arange(WC) % C) // cg
    member = gid[:, None] == np.arange(G)[None, :]
    rmat = jnp.asarray(member, jnp.float32)                    # (WC, G)
    bmat = jnp.asarray(member.T, jnp.float32)                  # (G, WC)

    # Block-Toeplitz conv weights (3*WC, WC), stored bf16 for the MXU.
    wt1 = _toeplitz_weights(params["conv1_w"], W).astype(jnp.bfloat16)
    wt2 = _toeplitz_weights(params["conv2_w"], W).astype(jnp.bfloat16)

    kernel = functools.partial(_unet_block_kernel, Nb=Nb, H=H, W=W, C=C, G=G)

    def const(shape):
        return pl.BlockSpec(shape, lambda n: (0,) * len(shape))

    out2d = pl.pallas_call(
        kernel,
        out_shape=jax.ShapeDtypeStruct((N, H, WC), x_nchw.dtype),
        grid=(N // Nb,),
        in_specs=[
            pl.BlockSpec((Nb, H, WC), lambda n: (n, 0, 0)),    # x (batch block)
            const((6, WC)),                                    # gamma/beta/conv bias
            const((WC, G)),                                    # GN reduce matrix
            const((G, WC)),                                    # GN broadcast matrix
            const((3 * WC, WC)),                               # conv1 Toeplitz weights
            const((3 * WC, WC)),                               # conv2 Toeplitz weights
        ],
        out_specs=pl.BlockSpec((Nb, H, WC), lambda n: (n, 0, 0)),
        compiler_params=pltpu.CompilerParams(
            dimension_semantics=("parallel",)),
    )(x2d, gb, rmat, bmat, wt1, wt2)

    out = out2d.reshape(N, H, W, C)
    return jnp.transpose(out, (0, 3, 1, 2))                    # NHWC -> NCHW


# ---------------------------------------------------------------------------
# Pure-JAX reference (mirrors the PyTorch forward) for validation
# ---------------------------------------------------------------------------
def reference_forward(x_nchw, params, num_groups=8):
    def gn(x, w, b):
        N, C, H, W = x.shape
        g = _pytorch_groupnorm_groups(C, num_groups)
        xr = x.reshape(N, g, C // g, H, W)
        mean = xr.mean(axis=(2, 3, 4), keepdims=True)
        var = xr.var(axis=(2, 3, 4), keepdims=True)
        xn = ((xr - mean) / jnp.sqrt(var + EPS)).reshape(N, C, H, W)
        return xn * w.reshape(1, C, 1, 1) + b.reshape(1, C, 1, 1)

    def silu(v):
        return v * jax.nn.sigmoid(v)

    def conv(x, w_hwio, b):
        y = jax.lax.conv_general_dilated(
            x, w_hwio, window_strides=(1, 1), padding=((1, 1), (1, 1)),
            dimension_numbers=("NCHW", "HWIO", "NCHW"))
        return y + b.reshape(1, -1, 1, 1)

    h = silu(gn(x_nchw, params["gn1_w"], params["gn1_b"]))
    h = conv(h, params["conv1_w"], params["conv1_b"])
    h = silu(gn(h, params["gn2_w"], params["gn2_b"]))
    h = conv(h, params["conv2_w"], params["conv2_b"])
    return x_nchw + h


if __name__ == "__main__":
    N, C, H, W = 8, 16, 16, 16   # in_ch == out_ch (required by the residual add)
    key = jax.random.PRNGKey(0)
    k1, k2, k3, k4, k5 = jax.random.split(key, 5)

    x = jax.random.normal(k1, (N, C, H, W), jnp.float32)   # NCHW, like PyTorch

    params = {
        # GroupNorm defaults: weight=1, bias=0
        "gn1_w": jnp.ones((C,), jnp.float32),
        "gn1_b": jnp.zeros((C,), jnp.float32),
        "gn2_w": jnp.ones((C,), jnp.float32),
        "gn2_b": jnp.zeros((C,), jnp.float32),
        # Conv weights in HWIO layout (PyTorch OIHW transposed)
        "conv1_w": 0.05 * jax.random.normal(k2, (3, 3, C, C), jnp.float32),
        "conv1_b": 0.05 * jax.random.normal(k3, (C,), jnp.float32),
        "conv2_w": 0.05 * jax.random.normal(k4, (3, 3, C, C), jnp.float32),
        "conv2_b": 0.05 * jax.random.normal(k5, (C,), jnp.float32),
    }

    fwd = jax.jit(unet_block_forward)
    out = jax.block_until_ready(fwd(x, params))
    ref = jax.block_until_ready(reference_forward(x, params))
    np.testing.assert_allclose(np.asarray(out), np.asarray(ref),
                               rtol=2e-2, atol=2e-2)
    print("KERNEL_OK")
</pallas_src>

<mosaic_0001>
module attributes {stable_mosaic.version = 11 : i64} {
  func.func @_unet_block_kernel(%arg0: i32, %arg1: memref<4x16x256xf32, #tpu.memory_space<vmem>>, %arg2: memref<6x256xf32, #tpu.memory_space<vmem>>, %arg3: memref<256x8xf32, #tpu.memory_space<vmem>>, %arg4: memref<8x256xf32, #tpu.memory_space<vmem>>, %arg5: memref<768x256xbf16, #tpu.memory_space<vmem>>, %arg6: memref<768x256xbf16, #tpu.memory_space<vmem>>, %arg7: memref<4x16x256xf32, #tpu.memory_space<vmem>>) attributes {dimension_semantics = [#tpu.dimension_semantics<parallel>], iteration_bounds = array<i64: 2>, scalar_prefetch = 0 : i64, scratch_operands = 0 : i64, tpu.core_type = #tpu.core_type<tc>, window_params = [{transform_indices = @transform_0, window_bounds = array<i64: 4, 16, 256>}, {pipeline_mode = #tpu.pipeline_mode<synchronous>, transform_indices = @transform_1, window_bounds = array<i64: 6, 256>}, {pipeline_mode = #tpu.pipeline_mode<synchronous>, transform_indices = @transform_2, window_bounds = array<i64: 256, 8>}, {pipeline_mode = #tpu.pipeline_mode<synchronous>, transform_indices = @transform_3, window_bounds = array<i64: 8, 256>}, {pipeline_mode = #tpu.pipeline_mode<synchronous>, transform_indices = @transform_4, window_bounds = array<i64: 768, 256>}, {pipeline_mode = #tpu.pipeline_mode<synchronous>, transform_indices = @transform_5, window_bounds = array<i64: 768, 256>}, {transform_indices = @transform_6, window_bounds = array<i64: 4, 16, 256>}]} {
    %0 = tpu.iota {dimensions = array<i32: 1>} : vector<4x16x1xi32>
    %1 = vector.shape_cast %0 : vector<4x16x1xi32> to vector<64x1xi32>
    %c0_i32 = arith.constant 0 : i32
    %2 = vector.broadcast %c0_i32 : i32 to vector<64x1xi32>
    %3 = arith.cmpi ne, %1, %2 : vector<64x1xi32>
    %c15_i32 = arith.constant 15 : i32
    %4 = vector.broadcast %c15_i32 : i32 to vector<64x1xi32>
    %5 = arith.cmpi ne, %1, %4 : vector<64x1xi32>
    %c0 = arith.constant 0 : index
    %c0_0 = arith.constant 0 : index
    %6 = vector.load %arg2[%c0, %c0_0] : memref<6x256xf32, #tpu.memory_space<vmem>>, vector<1x256xf32>
    %c1 = arith.constant 1 : index
    %c0_1 = arith.constant 0 : index
    %7 = vector.load %arg2[%c1, %c0_1] : memref<6x256xf32, #tpu.memory_space<vmem>>, vector<1x256xf32>
    %c2 = arith.constant 2 : index
    %c0_2 = arith.constant 0 : index
    %8 = vector.load %arg2[%c2, %c0_2] : memref<6x256xf32, #tpu.memory_space<vmem>>, vector<1x256xf32>
    %c3 = arith.constant 3 : index
    %c0_3 = arith.constant 0 : index
    %9 = vector.load %arg2[%c3, %c0_3] : memref<6x256xf32, #tpu.memory_space<vmem>>, vector<1x256xf32>
    %c4 = arith.constant 4 : index
    %c0_4 = arith.constant 0 : index
    %10 = vector.load %arg2[%c4, %c0_4] : memref<6x256xf32, #tpu.memory_space<vmem>>, vector<1x256xf32>
    %c5 = arith.constant 5 : index
    %c0_5 = arith.constant 0 : index
    %11 = vector.load %arg2[%c5, %c0_5] : memref<6x256xf32, #tpu.memory_space<vmem>>, vector<1x256xf32>
    %c0_6 = arith.constant 0 : index
    %c0_7 = arith.constant 0 : index
    %12 = vector.load %arg3[%c0_6, %c0_7] : memref<256x8xf32, #tpu.memory_space<vmem>>, vector<256x8xf32>
    %c0_8 = arith.constant 0 : index
    %c0_9 = arith.constant 0 : index
    %13 = vector.load %arg4[%c0_8, %c0_9] : memref<8x256xf32, #tpu.memory_space<vmem>>, vector<8x256xf32>
    %c0_10 = arith.constant 0 : index
    %c0_11 = arith.constant 0 : index
    %c0_12 = arith.constant 0 : index
    %14 = vector.load %arg1[%c0_10, %c0_11, %c0_12] : memref<4x16x256xf32, #tpu.memory_space<vmem>>, vector<4x16x256xf32>
    %15 = vector.shape_cast %14 : vector<4x16x256xf32> to vector<64x256xf32>
    %16 = vector.shape_cast %15 : vector<64x256xf32> to vector<4x16x256xf32>
    %cst = arith.constant dense<0.000000e+00> : vector<4x256xf32>
    %17 = vector.multi_reduction <add>, %16, %cst [1] : vector<4x16x256xf32> to vector<4x256xf32>
    %18 = arith.mulf %16, %16 : vector<4x16x256xf32>
    %cst_13 = arith.constant dense<0.000000e+00> : vector<4x256xf32>
    %19 = vector.multi_reduction <add>, %18, %cst_13 [1] : vector<4x16x256xf32> to vector<4x256xf32>
    %20 = tpu.concatenate %17, %19 in 0 : vector<4x256xf32>, vector<4x256xf32> -> vector<8x256xf32>
    %cst_14 = arith.constant dense<0.000000e+00> : vector<8x8xf32>
    %21 = tpu.matmul %20, %12, %cst_14 {dimension_numbers = #tpu.dot_dimension_numbers<[1], [0], [0], [1], [0, 0, 1, 1], [], []>} : vector<8x256xf32>, vector<256x8xf32>, vector<8x8xf32> -> vector<8x8xf32>
    %cst_15 = arith.constant 0.001953125 : f32
    %22 = vector.broadcast %cst_15 : f32 to vector<8x8xf32>
    %23 = arith.mulf %21, %22 : vector<8x8xf32>
    %24 = vector.extract_strided_slice %23 {offsets = [0, 0], sizes = [4, 8], strides = [1, 1]} : vector<8x8xf32> to vector<4x8xf32>
    %25 = vector.extract_strided_slice %23 {offsets = [4, 0], sizes = [4, 8], strides = [1, 1]} : vector<8x8xf32> to vector<4x8xf32>
    %26 = arith.mulf %24, %24 : vector<4x8xf32>
    %27 = arith.subf %25, %26 : vector<4x8xf32>
    %cst_16 = arith.constant 0.000000e+00 : f32
    %28 = vector.broadcast %cst_16 : f32 to vector<4x8xf32>
    %29 = arith.maximumf %27, %28 : vector<4x8xf32>
    %cst_17 = arith.constant 9.99999974E-6 : f32
    %30 = vector.broadcast %cst_17 : f32 to vector<4x8xf32>
    %31 = arith.addf %29, %30 : vector<4x8xf32>
    %32 = math.rsqrt %31 : vector<4x8xf32>
    %cst_18 = arith.constant 0.000000e+00 : f32
    %33 = vector.broadcast %cst_18 : f32 to vector<4x8xf32>
    %34 = arith.subf %33, %24 : vector<4x8xf32>
    %35 = arith.mulf %34, %32 : vector<4x8xf32>
    %36 = tpu.concatenate %32, %35 in 0 : vector<4x8xf32>, vector<4x8xf32> -> vector<8x8xf32>
    %cst_19 = arith.constant dense<0.000000e+00> : vector<8x256xf32>
    %37 = tpu.matmul %36, %13, %cst_19 {dimension_numbers = #tpu.dot_dimension_numbers<[1], [0], [0], [1], [0, 0, 1, 1], [], []>} : vector<8x8xf32>, vector<8x256xf32>, vector<8x256xf32> -> vector<8x256xf32>
    %38 = vector.extract_strided_slice %37 {offsets = [0, 0], sizes = [4, 256], strides = [1, 1]} : vector<8x256xf32> to vector<4x256xf32>
    %39 = vector.broadcast %6 : vector<1x256xf32> to vector<4x256xf32>
    %40 = arith.mulf %38, %39 : vector<4x256xf32>
    %41 = vector.shape_cast %40 : vector<4x256xf32> to vector<4x1x256xf32>
    %42 = vector.extract_strided_slice %37 {offsets = [4, 0], sizes = [4, 256], strides = [1, 1]} : vector<8x256xf32> to vector<4x256xf32>
    %43 = vector.broadcast %6 : vector<1x256xf32> to vector<4x256xf32>
    %44 = arith.mulf %42, %43 : vector<4x256xf32>
    %45 = vector.broadcast %7 : vector<1x256xf32> to vector<4x256xf32>
    %46 = arith.addf %44, %45 : vector<4x256xf32>
    %47 = vector.shape_cast %46 : vector<4x256xf32> to vector<4x1x256xf32>
    %48 = vector.broadcast %41 : vector<4x1x256xf32> to vector<4x16x256xf32>
    %49 = arith.mulf %16, %48 : vector<4x16x256xf32>
    %50 = vector.broadcast %47 : vector<4x1x256xf32> to vector<4x16x256xf32>
    %51 = arith.addf %49, %50 : vector<4x16x256xf32>
    %52 = arith.negf %51 : vector<4x16x256xf32>
    %53 = math.exp %52 : vector<4x16x256xf32>
    %cst_20 = arith.constant 1.000000e+00 : f32
    %54 = vector.broadcast %cst_20 : f32 to vector<4x16x256xf32>
    %55 = arith.addf %54, %53 : vector<4x16x256xf32>
    %56 = arith.divf %54, %55 : vector<4x16x256xf32>
    %57 = arith.mulf %51, %56 : vector<4x16x256xf32>
    %58 = vector.shape_cast %57 : vector<4x16x256xf32> to vector<64x256xf32>
    %cst_21 = arith.constant 0.000000e+00 : f32
    %59 = vector.broadcast %cst_21 : f32 to vector<1x256xf32>
    %60 = vector.extract_strided_slice %58 {offsets = [0, 0], sizes = [63, 256], strides = [1, 1]} : vector<64x256xf32> to vector<63x256xf32>
    %61 = tpu.concatenate %59, %60 in 0 : vector<1x256xf32>, vector<63x256xf32> -> vector<64x256xf32>
    %62 = vector.extract_strided_slice %58 {offsets = [1, 0], sizes = [63, 256], strides = [1, 1]} : vector<64x256xf32> to vector<63x256xf32>
    %63 = tpu.concatenate %62, %59 in 0 : vector<63x256xf32>, vector<1x256xf32> -> vector<64x256xf32>
    %cst_22 = arith.constant 0.000000e+00 : f32
    %64 = vector.shape_cast %3 : vector<64x1xi1> to vector<64x1xi1>
    %65 = vector.broadcast %64 : vector<64x1xi1> to vector<64x256xi1>
    %66 = vector.broadcast %cst_22 : f32 to vector<64x256xf32>
    %67 = arith.select %65, %61, %66 : vector<64x256xi1>, vector<64x256xf32>
    %cst_23 = arith.constant 0.000000e+00 : f32
    %68 = vector.shape_cast %5 : vector<64x1xi1> to vector<64x1xi1>
    %69 = vector.broadcast %68 : vector<64x1xi1> to vector<64x256xi1>
    %70 = vector.broadcast %cst_23 : f32 to vector<64x256xf32>
    %71 = arith.select %69, %63, %70 : vector<64x256xi1>, vector<64x256xf32>
    %72 = arith.truncf %67 : vector<64x256xf32> to vector<64x256xbf16>
    %73 = arith.truncf %58 : vector<64x256xf32> to vector<64x256xbf16>
    %74 = arith.truncf %71 : vector<64x256xf32> to vector<64x256xbf16>
    %75 = tpu.concatenate %72, %73, %74 in 1 : vector<64x256xbf16>, vector<64x256xbf16>, vector<64x256xbf16> -> vector<64x768xbf16>
    %c0_24 = arith.constant 0 : index
    %c0_25 = arith.constant 0 : index
    %76 = vector.load %arg5[%c0_24, %c0_25] : memref<768x256xbf16, #tpu.memory_space<vmem>>, vector<768x256xbf16>
    %cst_26 = arith.constant dense<0.000000e+00> : vector<64x256xf32>
    %77 = tpu.matmul %75, %76, %cst_26 {dimension_numbers = #tpu.dot_dimension_numbers<[1], [0], [0], [1], [0, 0, 1, 1], [], []>} : vector<64x768xbf16>, vector<768x256xbf16>, vector<64x256xf32> -> vector<64x256xf32>
    %78 = vector.broadcast %10 : vector<1x256xf32> to vector<64x256xf32>
    %79 = arith.addf %77, %78 : vector<64x256xf32>
    %80 = vector.shape_cast %79 : vector<64x256xf32> to vector<4x16x256xf32>
    %cst_27 = arith.constant dense<0.000000e+00> : vector<4x256xf32>
    %81 = vector.multi_reduction <add>, %80, %cst_27 [1] : vector<4x16x256xf32> to vector<4x256xf32>
    %82 = arith.mulf %80, %80 : vector<4x16x256xf32>
    %cst_28 = arith.constant dense<0.000000e+00> : vector<4x256xf32>
    %83 = vector.multi_reduction <add>, %82, %cst_28 [1] : vector<4x16x256xf32> to vector<4x256xf32>
    %84 = tpu.concatenate %81, %83 in 0 : vector<4x256xf32>, vector<4x256xf32> -> vector<8x256xf32>
    %cst_29 = arith.constant dense<0.000000e+00> : vector<8x8xf32>
    %85 = tpu.matmul %84, %12, %cst_29 {dimension_numbers = #tpu.dot_dimension_numbers<[1], [0], [0], [1], [0, 0, 1, 1], [], []>} : vector<8x256xf32>, vector<256x8xf32>, vector<8x8xf32> -> vector<8x8xf32>
    %cst_30 = arith.constant 0.001953125 : f32
    %86 = vector.broadcast %cst_30 : f32 to vector<8x8xf32>
    %87 = arith.mulf %85, %86 : vector<8x8xf32>
    %88 = vector.extract_strided_slice %87 {offsets = [0, 0], sizes = [4, 8], strides = [1, 1]} : vector<8x8xf32> to vector<4x8xf32>
    %89 = vector.extract_strided_slice %87 {offsets = [4, 0], sizes = [4, 8], strides = [1, 1]} : vector<8x8xf32> to vector<4x8xf32>
    %90 = arith.mulf %88, %88 : vector<4x8xf32>
    %91 = arith.subf %89, %90 : vector<4x8xf32>
    %cst_31 = arith.constant 0.000000e+00 : f32
    %92 = vector.broadcast %cst_31 : f32 to vector<4x8xf32>
    %93 = arith.maximumf %91, %92 : vector<4x8xf32>
    %cst_32 = arith.constant 9.99999974E-6 : f32
    %94 = vector.broadcast %cst_32 : f32 to vector<4x8xf32>
    %95 = arith.addf %93, %94 : vector<4x8xf32>
    %96 = math.rsqrt %95 : vector<4x8xf32>
    %cst_33 = arith.constant 0.000000e+00 : f32
    %97 = vector.broadcast %cst_33 : f32 to vector<4x8xf32>
    %98 = arith.subf %97, %88 : vector<4x8xf32>
    %99 = arith.mulf %98, %96 : vector<4x8xf32>
    %100 = tpu.concatenate %96, %99 in 0 : vector<4x8xf32>, vector<4x8xf32> -> vector<8x8xf32>
    %cst_34 = arith.constant dense<0.000000e+00> : vector<8x256xf32>
    %101 = tpu.matmul %100, %13, %cst_34 {dimension_numbers = #tpu.dot_dimension_numbers<[1], [0], [0], [1], [0, 0, 1, 1], [], []>} : vector<8x8xf32>, vector<8x256xf32>, vector<8x256xf32> -> vector<8x256xf32>
    %102 = vector.extract_strided_slice %101 {offsets = [0, 0], sizes = [4, 256], strides = [1, 1]} : vector<8x256xf32> to vector<4x256xf32>
    %103 = vector.broadcast %8 : vector<1x256xf32> to vector<4x256xf32>
    %104 = arith.mulf %102, %103 : vector<4x256xf32>
    %105 = vector.shape_cast %104 : vector<4x256xf32> to vector<4x1x256xf32>
    %106 = vector.extract_strided_slice %101 {offsets = [4, 0], sizes = [4, 256], strides = [1, 1]} : vector<8x256xf32> to vector<4x256xf32>
    %107 = vector.broadcast %8 : vector<1x256xf32> to vector<4x256xf32>
    %108 = arith.mulf %106, %107 : vector<4x256xf32>
    %109 = vector.broadcast %9 : vector<1x256xf32> to vector<4x256xf32>
    %110 = arith.addf %108, %109 : vector<4x256xf32>
    %111 = vector.shape_cast %110 : vector<4x256xf32> to vector<4x1x256xf32>
    %112 = vector.broadcast %105 : vector<4x1x256xf32> to vector<4x16x256xf32>
    %113 = arith.mulf %80, %112 : vector<4x16x256xf32>
    %114 = vector.broadcast %111 : vector<4x1x256xf32> to vector<4x16x256xf32>
    %115 = arith.addf %113, %114 : vector<4x16x256xf32>
    %116 = arith.negf %115 : vector<4x16x256xf32>
    %117 = math.exp %116 : vector<4x16x256xf32>
    %cst_35 = arith.constant 1.000000e+00 : f32
    %118 = vector.broadcast %cst_35 : f32 to vector<4x16x256xf32>
    %119 = arith.addf %118, %117 : vector<4x16x256xf32>
    %120 = arith.divf %118, %119 : vector<4x16x256xf32>
    %121 = arith.mulf %115, %120 : vector<4x16x256xf32>
    %122 = vector.shape_cast %121 : vector<4x16x256xf32> to vector<64x256xf32>
    %cst_36 = arith.constant 0.000000e+00 : f32
    %123 = vector.broadcast %cst_36 : f32 to vector<1x256xf32>
    %124 = vector.extract_strided_slice %122 {offsets = [0, 0], sizes = [63, 256], strides = [1, 1]} : vector<64x256xf32> to vector<63x256xf32>
    %125 = tpu.concatenate %123, %124 in 0 : vector<1x256xf32>, vector<63x256xf32> -> vector<64x256xf32>
    %126 = vector.extract_strided_slice %122 {offsets = [1, 0], sizes = [63, 256], strides = [1, 1]} : vector<64x256xf32> to vector<63x256xf32>
    %127 = tpu.concatenate %126, %123 in 0 : vector<63x256xf32>, vector<1x256xf32> -> vector<64x256xf32>
    %cst_37 = arith.constant 0.000000e+00 : f32
    %128 = vector.shape_cast %3 : vector<64x1xi1> to vector<64x1xi1>
    %129 = vector.broadcast %128 : vector<64x1xi1> to vector<64x256xi1>
    %130 = vector.broadcast %cst_37 : f32 to vector<64x256xf32>
    %131 = arith.select %129, %125, %130 : vector<64x256xi1>, vector<64x256xf32>
    %cst_38 = arith.constant 0.000000e+00 : f32
    %132 = vector.shape_cast %5 : vector<64x1xi1> to vector<64x1xi1>
    %133 = vector.broadcast %132 : vector<64x1xi1> to vector<64x256xi1>
    %134 = vector.broadcast %cst_38 : f32 to vector<64x256xf32>
    %135 = arith.select %133, %127, %134 : vector<64x256xi1>, vector<64x256xf32>
    %136 = arith.truncf %131 : vector<64x256xf32> to vector<64x256xbf16>
    %137 = arith.truncf %122 : vector<64x256xf32> to vector<64x256xbf16>
    %138 = arith.truncf %135 : vector<64x256xf32> to vector<64x256xbf16>
    %139 = tpu.concatenate %136, %137, %138 in 1 : vector<64x256xbf16>, vector<64x256xbf16>, vector<64x256xbf16> -> vector<64x768xbf16>
    %c0_39 = arith.constant 0 : index
    %c0_40 = arith.constant 0 : index
    %140 = vector.load %arg6[%c0_39, %c0_40] : memref<768x256xbf16, #tpu.memory_space<vmem>>, vector<768x256xbf16>
    %cst_41 = arith.constant dense<0.000000e+00> : vector<64x256xf32>
    %141 = tpu.matmul %139, %140, %cst_41 {dimension_numbers = #tpu.dot_dimension_numbers<[1], [0], [0], [1], [0, 0, 1, 1], [], []>} : vector<64x768xbf16>, vector<768x256xbf16>, vector<64x256xf32> -> vector<64x256xf32>
    %142 = vector.broadcast %11 : vector<1x256xf32> to vector<64x256xf32>
    %143 = arith.addf %141, %142 : vector<64x256xf32>
    %c0_42 = arith.constant 0 : index
    %c0_43 = arith.constant 0 : index
    %c0_44 = arith.constant 0 : index
    %144 = vector.load %arg1[%c0_42, %c0_43, %c0_44] : memref<4x16x256xf32, #tpu.memory_space<vmem>>, vector<4x16x256xf32>
    %145 = vector.shape_cast %143 : vector<64x256xf32> to vector<4x16x256xf32>
    %146 = arith.addf %144, %145 : vector<4x16x256xf32>
    %c0_45 = arith.constant 0 : index
    %c0_46 = arith.constant 0 : index
    %c0_47 = arith.constant 0 : index
    %147 = vector.load %arg7[%c0_45, %c0_46, %c0_47] : memref<4x16x256xf32, #tpu.memory_space<vmem>>, vector<4x16x256xf32>
    tpu.vector_store %arg7[%c0_45, %c0_46, %c0_47], %146 {strides = array<i32>} : memref<4x16x256xf32, #tpu.memory_space<vmem>>, vector<4x16x256xf32>,
    return
  }
  func.func @transform_0(%arg0: i32) -> (i32, i32, i32) {
    %c0_i32 = arith.constant 0 : i32
    %c0_i32_0 = arith.constant 0 : i32
    %c0_i32_1 = arith.constant 0 : i32
    return %arg0, %c0_i32, %c0_i32_0 : i32, i32, i32
  }
  func.func @transform_1(%arg0: i32) -> (i32, i32) {
    %c0_i32 = arith.constant 0 : i32
    %c0_i32_0 = arith.constant 0 : i32
    %c0_i32_1 = arith.constant 0 : i32
    return %c0_i32, %c0_i32_0 : i32, i32
  }
  func.func @transform_2(%arg0: i32) -> (i32, i32) {
    %c0_i32 = arith.constant 0 : i32
    %c0_i32_0 = arith.constant 0 : i32
    %c0_i32_1 = arith.constant 0 : i32
    return %c0_i32, %c0_i32_0 : i32, i32
  }
  func.func @transform_3(%arg0: i32) -> (i32, i32) {
    %c0_i32 = arith.constant 0 : i32
    %c0_i32_0 = arith.constant 0 : i32
    %c0_i32_1 = arith.constant 0 : i32
    return %c0_i32, %c0_i32_0 : i32, i32
  }
  func.func @transform_4(%arg0: i32) -> (i32, i32) {
    %c0_i32 = arith.constant 0 : i32
    %c0_i32_0 = arith.constant 0 : i32
    %c0_i32_1 = arith.constant 0 : i32
    return %c0_i32, %c0_i32_0 : i32, i32
  }
  func.func @transform_5(%arg0: i32) -> (i32, i32) {
    %c0_i32 = arith.constant 0 : i32
    %c0_i32_0 = arith.constant 0 : i32
    %c0_i32_1 = arith.constant 0 : i32
    return %c0_i32, %c0_i32_0 : i32, i32
  }
  func.func @transform_6(%arg0: i32) -> (i32, i32, i32) {
    %c0_i32 = arith.constant 0 : i32
    %c0_i32_0 = arith.constant 0 : i32
    %c0_i32_1 = arith.constant 0 : i32
    return %arg0, %c0_i32, %c0_i32_0 : i32, i32, i32
  }
}

</mosaic_0001>

<bundles_post_ra>
// kernel: tile.33
= control target key start
LH: loop header
LB: loop body
LE: loop exit
PB: predicated region body
PF: predicated region fallthrough
CT: control target
= control target key end

     0   :  { %s28_s0 = inlined_call_operand.vmem [shape: f32[16], index: 0, kind: input, shape index: {}]   ;;  %s29_s1 = inlined_call_operand.vmem [shape: f32[16,16], index: 1, kind: output, shape index: {}]  }
   0x1   :  { %v4_v0 = vld [vmem:[%s28_s0] ss:$0 sm:$0xff] }
   0x2   :  { %5 = vst [vmem:[%s29_s1] sm:$0xff] %v4_v0 }
   0x3   :  { %8 = vst [vmem:[%s29_s1 + $0x8] sm:$0xff] %v4_v0 }

// kernel: tile.54
= control target key start
LH: loop header
LB: loop body
LE: loop exit
PB: predicated region body
PF: predicated region fallthrough
CT: control target
= control target key end

     0   :  { %s7_s6 = smov 3  ;;  %s21_s9 = smov 3  ;;  %vm4_vm0 = vcmask 130048   ;;  %vm11_vm1 = vcmask 1048448   ;;  %vm18_vm2 = vcmask 917248   ;;  %vm25_vm3 = vcmask 786048   ;;  %s129_s0 = inlined_call_operand.vmem [shape: f32[16,16], index: 0, kind: input, shape index: {}]   ;;  %s130_s1 = inlined_call_operand.vmem [shape: f32[1,256], index: 1, kind: output, shape index: {}]  }
   0x1   :  { %v67_v0 = vld [vmem:[%s129_s0 + $0x7] ss:$8 sm:%s7_s6]   ;;  %s82_s10 = smov 112   ;;  %v69_v1 = vld [vmem:[%s129_s0 + $0x5] ss:$8 sm:%s21_s9]   ;;  %s83_s13 = smov 80  }
   0x2   :  { %9 = vrot.lane.b32.xlu0 %v67_v0, %s82_s10  ;;  %23 = vrot.lane.b32.xlu1 %v69_v1, %s83_s13  ;;  %s14_s14 = smov 3  ;;  %s28_s15 = smov 3  ;;  %vm32_vm4 = vcmask 654848   ;;  %vm39_vm5 = vcmask 523648   ;;  %vm46_vm6 = vcmask 392448   ;;  %vm53_vm7 = vcmask 261248  }
   0x3   :  { %s35_s16 = smov 3  ;;  %v68_v3 = vld [vmem:[%s129_s0 + $0x6] ss:$8 sm:%s14_s14]   ;;  %s84_s21 = smov 48   ;;  %v70_v4 = vld [vmem:[%s129_s0 + $0x4] ss:$8 sm:%s28_s15]  }
   0x4   :  { %v71_v2 = vld [vmem:[%s129_s0 + $0x3] ss:$8 sm:%s35_s16]   ;;  %s42_s24 = smov 3  ;;  %s85_s25 = smov 96  }
   0x5   :  { %37 = vrot.lane.b32.xlu2 %v71_v2, %s84_s21  ;;  %s86_s26 = smov 64   ;;  %s49_s27 = smov 3  ;;  %v72_v5 = vld [vmem:[%s129_s0 + $0x2] ss:$8 sm:%s42_s24]  }
   0x6   :  { %v73_v6 = vld [vmem:[%s129_s0 + $0x1] ss:$8 sm:%s49_s27]   ;;  %s87_s3 = smov 32   ;;  %s88_s4 = smov 16  }
   0x7   :  { %s2_s5 = smov 3 }
   0x8   :  { %v3_v7 = vld [vmem:[%s129_s0] ss:$8 sm:%s2_s5]  }
   0x9   :  { %5 = vst.msk [vmem:[#allocation0] ss:$8 sm:$0x3] %vm4_vm0, %v3_v7  }
   0xa   :  { %16 = vrot.lane.b32.xlu0 %v68_v3, %s85_s25  ;;  %30 = vrot.lane.b32.xlu1 %v70_v4, %s86_s26 }
   0xd   :  { %44 = vrot.lane.b32.xlu2 %v72_v5, %s87_s3 }
  0x12   :  { %51 = vrot.lane.b32.xlu0 %v73_v6, %s88_s4 }
  0x5f   :  { %v38_v8 = vpop.permute.xlu2 %37  }
  0x67   :  { %v45_v9 = vpop.permute.xlu2 %44  }
  0x74   :  { %v10_v10 = vpop.permute.xlu0 %9   ;;  %v24_v11 = vpop.permute.xlu1 %23  }
  0x75   :  { %12 = vst.msk [vmem:[#allocation0] ss:$8 sm:$0x3] %vm11_vm1, %v10_v10  }
  0x7c   :  { %v17_v12 = vpop.permute.xlu0 %16   ;;  %v31_v13 = vpop.permute.xlu1 %30  }
  0x7d   :  { %19 = vst.msk [vmem:[#allocation0] ss:$8 sm:$0x3] %vm18_vm2, %v17_v12  }
  0x7e   :  { %26 = vst.msk [vmem:[#allocation0] ss:$8 sm:$0x3] %vm25_vm3, %v24_v11  }
  0x7f   :  { %33 = vst.msk [vmem:[#allocation0] ss:$8 sm:$0x3] %vm32_vm4, %v31_v13  }
  0x80   :  { %40 = vst.msk [vmem:[#allocation0] ss:$8 sm:$0x3] %vm39_vm5, %v38_v8  }
  0x81   :  { %47 = vst.msk [vmem:[#allocation0] ss:$8 sm:$0x3] %vm46_vm6, %v45_v9  }
  0x84   :  { %v52_v14 = vpop.permute.xlu0 %51  }
  0x85   :  { %54 = vst.msk [vmem:[#allocation0] ss:$8 sm:$0x3] %vm53_vm7, %v52_v14  }
  0x8c   :  { %v57_v15 = vld [vmem:[#allocation0] sm:$0x1]  ;;  %v62_v16 = vld [vmem:[#allocation0 + $0x8] sm:$0x1] }
  0x8d   :  { %60 = vst [vmem:[%s130_s1] sm:$0x1] %v57_v15 }
  0x8e   :  { %74 = vst [vmem:[%s130_s1 + $0x1] sm:$0x1] %v62_v16 }

// kernel: unet_block_forward.1
= control target key start
LH: loop header
LB: loop body
LE: loop exit
PB: predicated region body
PF: predicated region fallthrough
CT: control target
= control target key end

     0   :  { %s5507_s21 = smov 0   ;;  %s9058_s0 = inlined_call_operand.vmem [shape: f32[8,16,256], index: 0, kind: input, shape index: {}]   ;;  %s9059_s1 = inlined_call_operand.vmem [shape: f32[6,256], index: 1, kind: input, shape index: {}]   ;;  %s9060_s2 = inlined_call_operand.vmem [shape: f32[256,8], index: 2, kind: input, shape index: {}]   ;;  %s9061_s3 = inlined_call_operand.vmem [shape: f32[8,256], index: 3, kind: input, shape index: {}]   ;;  %s9062_s4 = inlined_call_operand.vmem [shape: bf16[768,256], index: 4, kind: input, shape index: {}]   ;;  %s9063_s5 = inlined_call_operand.vmem [shape: bf16[768,256], index: 5, kind: input, shape index: {}]   ;;  %s9064_s6 = inlined_call_operand.vmem [shape: f32[8,16,256], index: 6, kind: output, shape index: {}]  }
   0x1 LB: > { %s4254_s22 = sadd.s32 4294967295, %s5470_s21   ;;  %p4258_p0 = scmp.ge.s32.totalorder %s5470_s21, 1  ;;  %s5470_s21 = sphi %s5507_s21, %s16_s21  }
   0x2   : > { %p214_p1 = scmp.lt.s32.totalorder %s5470_s21, 3 }
   0x4   : > { %p215_p2 = pnand %p4258_p0, %p214_p1 }
   0x6   : > { %218 = sbr.rel (%p215_p2) target bundleno = 1514 (0x5ea), region = 44 }
   0xb   : > { %v293_v0 = vld [vmem:[%s9060_s2 + $0x78] sm:$0xff]  ;;  %v292_v2 = vld [vmem:[%s9060_s2 + $0x70] sm:$0xff]  ;;  %s4259_s29 = sshll.u32 %s4254_s22, 2  ;;  %v291_v4 = vld [vmem:[%s9060_s2 + $0x68] sm:$0xff]  ;;  %vm9072_vm0 = vcmask 1041409   ;;  %vm9070_vm1 = vcmask 1042434  }
   0xc   : > { %v309_v1 = vld [vmem:[%s9060_s2 + $0xf8] sm:$0xff]  ;;  %497 = vmatpush.msra.mxu0 %v293_v0  ;;  %v308_v3 = vld [vmem:[%s9060_s2 + $0xf0] sm:$0xff]  ;;  %p247_p3 = scmp.lt.s32.totalorder %s4259_s29, 7  ;;  %v307_v5 = vld [vmem:[%s9060_s2 + $0xe8] sm:$0xff]  ;;  %vm9068_vm2 = vcmask 1043459   ;;  %vm9071_vm3 = vcmask 1045509  }
   0xd   : > { %517 = vmatpush.msra.mxu1 %v309_v1  ;;  %v290_v6 = vld [vmem:[%s9060_s2 + $0x60] sm:$0xff]  ;;  %v289_v8 = vld [vmem:[%s9060_s2 + $0x58] sm:$0xff]  ;;  %v288_v10 = vld [vmem:[%s9060_s2 + $0x50] sm:$0xff]  ;;  %vm9069_vm4 = vcmask 1046534   ;;  %vm9067_vm5 = vcmask 1047559   ;;  %vm9066_vm6 = vcmask 1043456  }
   0xe   : > { %498 = vmatpush.msra.mxu0 %v292_v2  ;;  %s9218_s29 = smov (!%p247_p3, %s4259_s29), 7  ;;  %v306_v7 = vld [vmem:[%s9060_s2 + $0xe0] sm:$0xff]  ;;  %v305_v9 = vld [vmem:[%s9060_s2 + $0xd8] sm:$0xff]  ;;  %v304_v11 = vld [vmem:[%s9060_s2 + $0xd0] sm:$0xff]  ;;  %vm9065_vm10 = vcmask 64512   ;;  %vm618_vm11 = vcmask 1040384  }
   0xf   : > { %518 = vmatpush.msra.mxu1 %v308_v3  ;;  %s5076_s16 = sshll.u32 %s9218_s29, 5  ;;  %v287_v12 = vld [vmem:[%s9060_s2 + $0x48] sm:$0xff]  ;;  %v286_v14 = vld [vmem:[%s9060_s2 + $0x40] sm:$0xff]  ;;  %v285_v32 = vld [vmem:[%s9060_s2 + $0x38] sm:$0xff] }
  0x10   : > { %499 = vmatpush.msra.mxu0 %v291_v4  ;;  %s5553_s24 = scalar_lea.vmem %s9058_s0, %s5076_s16  ;;  %v303_v13 = vld [vmem:[%s9060_s2 + $0xc8] sm:$0xff]  ;;  %v302_v15 = vld [vmem:[%s9060_s2 + $0xc0] sm:$0xff]  ;;  %v301_v33 = vld [vmem:[%s9060_s2 + $0xb8] sm:$0xff]  ;;  %s8942_s22 = scalar_lea.vmem %s9064_s6, %s5076_s16 }
  0x11   : > { %519 = vmatpush.msra.mxu1 %v307_v5  ;;  %v5574_v16 = vld [vmem:[%s5553_s24] sm:$0xff]  ;;  %v5577_v17 = vld [vmem:[%s5553_s24 + $0x10] sm:$0xff]  ;;  %v283_v52 = vld [vmem:[%s9060_s2 + $0x28] sm:$0xff] }
  0x12   : > { %500 = vmatpush.msra.mxu0 %v290_v6  ;;  %v5580_v18 = vld [vmem:[%s5553_s24 + $0x20] sm:$0xff]  ;;  %v5583_v19 = vld [vmem:[%s5553_s24 + $0x30] sm:$0xff]  ;;  %v384_v20 = vmul.f32 %v5574_v16, %v5574_v16  ;;  %v328_v24 = vadd.f32 %v5577_v17, %v5574_v16  ;;  %v386_v26 = vmul.f32 %v5577_v17, %v5577_v17  ;;  %v299_v53 = vld [vmem:[%s9060_s2 + $0xa8] sm:$0xff] }
  0x13   : > { %520 = vmatpush.msra.mxu1 %v306_v7  ;;  %v5588_v21 = vld [vmem:[%s5553_s24 + $0x40] sm:$0xff]  ;;  %v5591_v22 = vld [vmem:[%s5553_s24 + $0x50] sm:$0xff]  ;;  %v342_v25 = vadd.f32 %v5583_v19, %v5580_v18  ;;  %v388_v27 = vmul.f32 %v5580_v18, %v5580_v18  ;;  %v390_v30 = vmul.f32 %v5583_v19, %v5583_v19 }
  0x14   : > { %501 = vmatpush.msra.mxu0 %v289_v8  ;;  %v324_v23 = vld [vmem:[%s5553_s24 + $0x60] sm:$0xff]  ;;  %v326_v28 = vld [vmem:[%s5553_s24 + $0x70] sm:$0xff]  ;;  %v356_v29 = vadd.f32 %v5591_v22, %v5588_v21  ;;  %v392_v31 = vmul.f32 %v5588_v21, %v5588_v21  ;;  %v329_v34 = vrot.slane %v328_v24, 4  ;;  %v394_v37 = vmul.f32 %v5591_v22, %v5591_v22  ;;  %v281_v8 = vld [vmem:[%s9060_s2 + $0x18] sm:$0xff] }
  0x15   : > { %521 = vmatpush.msra.mxu1 %v305_v9  ;;  %v343_v35 = vrot.slane %v342_v25, 4  ;;  %v370_v36 = vadd.f32 %v326_v28, %v324_v23  ;;  %v396_v39 = vmul.f32 %v324_v23, %v324_v23  ;;  %v398_v40 = vmul.f32 %v326_v28, %v326_v28  ;;  %v284_v42 = vld [vmem:[%s9060_s2 + $0x30] sm:$0xff]  ;;  %v282_v62 = vld [vmem:[%s9060_s2 + $0x20] sm:$0xff]  ;;  %v297_v9 = vld [vmem:[%s9060_s2 + $0x98] sm:$0xff] }
  0x16   : > { %502 = vmatpush.msra.mxu0 %v288_v10  ;;  %v357_v38 = vrot.slane %v356_v29, 4  ;;  %v400_v41 = vadd.f32 %v386_v26, %v384_v20  ;;  %v300_v43 = vld [vmem:[%s9060_s2 + $0xb0] sm:$0xff]  ;;  %v330_v44 = vadd.f32 %v329_v34, %v328_v24  ;;  %v414_v47 = vadd.f32 %v390_v30, %v388_v27  ;;  %v298_v63 = vld [vmem:[%s9060_s2 + $0xa0] sm:$0xff]  ;;  %v5648_v34 = vld [vmem:[%s5553_s24 + $0x8] sm:$0xff] }
  0x17   : > { %522 = vmatpush.msra.mxu1 %v304_v11  ;;  %v344_v45 = vadd.f32 %v343_v35, %v342_v25  ;;  %v371_v46 = vrot.slane %v370_v36, 4  ;;  %v428_v50 = vadd.f32 %v394_v37, %v392_v31  ;;  %v442_v51 = vadd.f32 %v398_v40, %v396_v39  ;;  %v280_v24 = vld [vmem:[%s9060_s2 + $0x10] sm:$0xff]  ;;  %v5651_v35 = vld [vmem:[%s5553_s24 + $0x18] sm:$0xff]  ;;  %v295_v37 = vld [vmem:[%s9060_s2 + $0x88] sm:$0xff] }
  0x18   : > { %503 = vmatpush.msra.mxu0 %v287_v12  ;;  %v358_v48 = vadd.f32 %v357_v38, %v356_v29  ;;  %v401_v49 = vrot.slane %v400_v41, 4  ;;  %v331_v54 = vrot.slane %v330_v44, 2  ;;  %v415_v57 = vrot.slane %v414_v47, 4  ;;  %v296_v25 = vld [vmem:[%s9060_s2 + $0x90] sm:$0xff] }
  0x19   : > { %523 = vmatpush.msra.mxu1 %v303_v13  ;;  %v345_v55 = vrot.slane %v344_v45, 2  ;;  %v372_v56 = vadd.f32 %v371_v46, %v370_v36  ;;  %v429_v60 = vrot.slane %v428_v50, 4  ;;  %v443_v61 = vrot.slane %v442_v51, 4  ;;  %v279_v36 = vld [vmem:[%s9060_s2 + $0x8] sm:$0xff] }
  0x1a   : > { %504 = vmatpush.msra.mxu0 %v286_v14  ;;  %v359_v58 = vrot.slane %v358_v48, 2  ;;  %v402_v59 = vadd.f32 %v401_v49, %v400_v41  ;;  %v332_v0 = vadd.f32 %v331_v54, %v330_v44  ;;  %v416_v3 = vadd.f32 %v415_v57, %v414_v47  ;;  %v5667_v47 = vld [vmem:[%s5553_s24 + $0x28] sm:$0xff]  ;;  %v294_v49 = vld [vmem:[%s9060_s2 + $0x80] sm:$0xff] }
  0x1b   : > { %524 = vmatpush.msra.mxu1 %v302_v15  ;;  %v346_v1 = vadd.f32 %v345_v55, %v344_v45  ;;  %v373_v2 = vrot.slane %v372_v56, 2  ;;  %v430_v6 = vadd.f32 %v429_v60, %v428_v50  ;;  %v444_v7 = vadd.f32 %v443_v61, %v442_v51 }
  0x1c   : > { %505 = vmatpush.msra.mxu0 %v285_v32  ;;  %v360_v4 = vadd.f32 %v359_v58, %v358_v48  ;;  %v403_v5 = vrot.slane %v402_v59, 2  ;;  %v333_v10 = vrot.slane %v332_v0, 1  ;;  %v417_v13 = vrot.slane %v416_v3, 2  ;;  %v5670_v48 = vld [vmem:[%s5553_s24 + $0x38] sm:$0xff]  ;;  %v325_v58 = vld [vmem:[%s5553_s24 + $0x68] sm:$0xff] }
  0x1d   : > { %525 = vmatpush.msra.mxu1 %v301_v33  ;;  %v347_v11 = vrot.slane %v346_v1, 1  ;;  %v374_v12 = vadd.f32 %v373_v2, %v372_v56  ;;  %v431_v20 = vrot.slane %v430_v6, 2  ;;  %v445_v23 = vrot.slane %v444_v7, 2 }
  0x1e   : > { %506 = vmatpush.msra.mxu0 %v284_v42  ;;  %v361_v14 = vrot.slane %v360_v4, 1  ;;  %v404_v15 = vadd.f32 %v403_v5, %v402_v59  ;;  %v334_v26 = vadd.f32 %v333_v10, %v332_v0  ;;  %v418_v29 = vadd.f32 %v417_v13, %v416_v3  ;;  %v278_v42 = vld [vmem:[%s9060_s2] sm:$0xff]  ;;  %v327_v59 = vld [vmem:[%s5553_s24 + $0x78] sm:$0xff] }
  0x1f   : > { %526 = vmatpush.msra.mxu1 %v300_v43  ;;  %v348_v27 = vadd.f32 %v347_v11, %v346_v1  ;;  %v375_v28 = vrot.slane %v374_v12, 1  ;;  %v432_v32 = vadd.f32 %v431_v20, %v430_v6  ;;  %v446_v33 = vadd.f32 %v445_v23, %v444_v7 }
  0x20   : > { %507 = vmatpush.msra.mxu0 %v283_v52  ;;  %v362_v30 = vadd.f32 %v361_v14, %v360_v4  ;;  %v405_v31 = vrot.slane %v404_v15, 1  ;;  %v419_v39 = vrot.slane %v418_v29, 1  ;;  %v335_v41 = vadd.f32 %v5651_v35, %v5648_v34  ;;  %v5677_v52 = vld [vmem:[%s5553_s24 + $0x48] sm:$0xff] }
  0x21   : > { %527 = vmatpush.msra.mxu1 %v299_v53  ;;  %v376_v38 = vadd.f32 %v375_v28, %v374_v12  ;;  %v465_v40 = vsel %vm9072_vm0, %v348_v27, %v334_v26  ;;  %v433_v44 = vrot.slane %v432_v32, 1  ;;  %v447_v45 = vrot.slane %v446_v33, 1  ;;  %v5680_v53 = vld [vmem:[%s5553_s24 + $0x58] sm:$0xff] }
  0x22   : > { %508 = vmatpush.msra.mxu0 %v282_v62  ;;  %v406_v43 = vadd.f32 %v405_v31, %v404_v15  ;;  %v467_v46 = vsel %vm9070_vm1, %v362_v30, %v465_v40  ;;  %v420_v50 = vadd.f32 %v419_v39, %v418_v29  ;;  %v336_v54 = vrot.slane %v335_v41, 4 }
  0x23   : > { %528 = vmatpush.msra.mxu1 %v298_v63  ;;  %v469_v51 = vsel %vm9068_vm2, %v376_v38, %v467_v46  ;;  %v349_v55 = vadd.f32 %v5670_v48, %v5667_v47  ;;  %v434_v56 = vadd.f32 %v433_v44, %v432_v32  ;;  %v448_v57 = vadd.f32 %v447_v45, %v446_v33 }
  0x24   : > { %509 = vmatpush.msra.mxu0 %v281_v8  ;;  %v363_v60 = vadd.f32 %v5680_v53, %v5677_v52  ;;  %v484_v61 = vsel %vm9071_vm3, %v420_v50, %v406_v43  ;;  %v337_v62 = vadd.f32 %v336_v54, %v335_v41  ;;  %v377_v0 = vadd.f32 %v327_v59, %v325_v58 }
  0x25   : > { %529 = vmatpush.msra.mxu1 %v297_v9  ;;  %v350_v63 = vrot.slane %v349_v55, 4  ;;  %v486_v1 = vsel %vm9069_vm4, %v434_v56, %v484_v61  ;;  %v385_v3 = vmul.f32 %v5648_v34, %v5648_v34  ;;  %v387_v4 = vmul.f32 %v5651_v35, %v5651_v35 }
  0x26   : > { %510 = vmatpush.msra.mxu0 %v280_v24  ;;  %v364_v2 = vrot.slane %v363_v60, 4  ;;  %v488_v5 = vsel %vm9067_vm5, %v448_v57, %v486_v1  ;;  %v338_v6 = vrot.slane %v337_v62, 2  ;;  %v378_v8 = vrot.slane %v377_v0, 4 }
  0x27   : > { %530 = vmatpush.msra.mxu1 %v296_v25  ;;  %v351_v7 = vadd.f32 %v350_v63, %v349_v55  ;;  %v495_v9 = vsel %vm9066_vm6, %v469_v51, %v488_v5  ;;  %v389_v11 = vmul.f32 %v5667_v47, %v5667_v47  ;;  %v391_v12 = vmul.f32 %v5670_v48, %v5670_v48 }
  0x28   : > { %511 = vmatpush.msra.mxu0 %v279_v36  ;;  %v365_v10 = vadd.f32 %v364_v2, %v363_v60  ;;  %v339_v13 = vadd.f32 %v338_v6, %v337_v62  ;;  %v379_v15 = vadd.f32 %v378_v8, %v377_v0  ;;  %v393_v20 = vmul.f32 %v5677_v52, %v5677_v52 }
  0x29   : > { %531 = vmatpush.msra.mxu1 %v295_v37  ;;  %v352_v14 = vrot.slane %v351_v7, 2  ;;  %v395_v24 = vmul.f32 %v5680_v53, %v5680_v53  ;;  %v397_v25 = vmul.f32 %v325_v58, %v325_v58  ;;  %v399_v26 = vmul.f32 %v327_v59, %v327_v59 }
  0x2a   : > { %512 = vmatpush.msra.mxu0 %v278_v42  ;;  %v366_v23 = vrot.slane %v365_v10, 2  ;;  %v340_v27 = vrot.slane %v339_v13, 1  ;;  %v380_v29 = vrot.slane %v379_v15, 2  ;;  %v407_v30 = vadd.f32 %v387_v4, %v385_v3 }
  0x2b   : > { %532 = vmatpush.msra.mxu1 %v294_v49  ;;  %513 = vmatmul.f32.vlgmr.msra.gmra.mxu0 %v495_v9  ;;  %v353_v28 = vadd.f32 %v352_v14, %v351_v7  ;;  %v421_v32 = vadd.f32 %v391_v12, %v389_v11  ;;  %v435_v33 = vadd.f32 %v395_v24, %v393_v20 }
  0x2c   : > { %v367_v31 = vadd.f32 %v366_v23, %v365_v10  ;;  %v449_v36 = vadd.f32 %v399_v26, %v397_v25  ;;  %v408_v38 = vrot.slane %v407_v30, 4  ;;  %v381_v39 = vadd.f32 %v380_v29, %v379_v15  ;;  %v310_v26 = vld [vmem:[%s9061_s3] sm:$0xff] }
  0x2d   : > { %v354_v37 = vrot.slane %v353_v28, 1  ;;  %v422_v40 = vrot.slane %v421_v32, 4  ;;  %v436_v41 = vrot.slane %v435_v33, 4  ;;  %v341_v43 = vadd.f32 %v340_v27, %v339_v13  ;;  %v311_v27 = vld [vmem:[%s9061_s3 + $0x8] sm:$0xff]  ;;  %583 = vmatpush.msrb.mxu0 %v310_v26 }
  0x2e   : > { %v450_v42 = vrot.slane %v449_v36, 4  ;;  %v368_v44 = vrot.slane %v367_v31, 1  ;;  %v409_v45 = vadd.f32 %v408_v38, %v407_v30  ;;  %v382_v55 = vrot.slane %v381_v39, 1  ;;  %603 = vmatpush.msrb.mxu1 %v311_v27 }
  0x2f   : > { %v355_v46 = vadd.f32 %v354_v37, %v353_v28  ;;  %v423_v49 = vadd.f32 %v422_v40, %v421_v32  ;;  %v437_v50 = vadd.f32 %v436_v41, %v435_v33 }
  0x30   : > { %v451_v51 = vadd.f32 %v450_v42, %v449_v36  ;;  %v410_v54 = vrot.slane %v409_v45, 2  ;;  %v369_v59 = vadd.f32 %v368_v44, %v367_v31  ;;  %v383_v2 = vadd.f32 %v382_v55, %v381_v39  ;;  %v5141_v55 = vld [vmem:[%s9062_s4 + $0x1f4] sm:$0xf0] }
  0x31   : > { %v424_v56 = vrot.slane %v423_v49, 2  ;;  %v438_v57 = vrot.slane %v437_v50, 2  ;;  %v470_v0 = vsel %vm9072_vm0, %v355_v46, %v341_v43 }
  0x32   : > { %v452_v58 = vrot.slane %v451_v51, 2  ;;  %v411_v60 = vadd.f32 %v410_v54, %v409_v45  ;;  %v471_v7 = vsel %vm9070_vm1, %v369_v59, %v470_v0  ;;  %v4346_v59 = vld [vmem:[%s9062_s4 + $0x70] sm:$0xf]  ;;  %v4466_v0 = vld [vmem:[%s9062_s4 + $0x160] sm:$0xf] }
  0x33   : > { %v425_v61 = vadd.f32 %v424_v56, %v423_v49  ;;  %v439_v62 = vadd.f32 %v438_v57, %v437_v50  ;;  %v472_v11 = vsel %vm9068_vm2, %v383_v2, %v471_v7  ;;  %v4474_v49 = vld [vmem:[%s9062_s4 + $0x170] sm:$0xf]  ;;  %v5125_v50 = vld [vmem:[%s9062_s4 + $0x174] sm:$0xf0]  ;;  %v5139_v7 = vld [vmem:[%s9062_s4 + $0x1e4] sm:$0xf0] }
  0x34   : > { %v453_v63 = vadd.f32 %v452_v58, %v451_v51  ;;  %v412_v1 = vrot.slane %v411_v60, 1  ;;  %v4538_v51 = vld [vmem:[%s9062_s4 + $0x1f0] sm:$0xf]  ;;  %v4475_v54 = vor.u32 %v5125_v50, %v4474_v49  ;;  %v267_v57 = vld [vmem:[%s9059_s1] ss:$8 sm:$0x3] }
  0x35   : > { %v426_v3 = vrot.slane %v425_v61, 1  ;;  %v440_v4 = vrot.slane %v439_v62, 1  ;;  %v4539_v56 = vor.u32 %v5141_v55, %v4538_v51  ;;  %v4265_v58 = vld [vmem:[%s9059_s1 + $0x1] ss:$8 sm:$0x3]  ;;  %v609_v2 = vperm.slane %v267_v57, 0 }
  0x36   : > { %v454_v5 = vrot.slane %v453_v63, 1  ;;  %v413_v6 = vadd.f32 %v412_v1, %v411_v60  ;;  %1965 = vmatpush.bf16.msra.mxu0 %v4475_v54  ;;  %v5093_v60 = vld [vmem:[%s9062_s4 + $0x74] sm:$0xf0]  ;;  %v5123_v1 = vld [vmem:[%s9062_s4 + $0x164] sm:$0xf0] }
  0x37   : > { %v427_v8 = vadd.f32 %v426_v3, %v425_v61  ;;  %v441_v9 = vadd.f32 %v440_v4, %v439_v62  ;;  %v4410_v61 = vld [vmem:[%s9062_s4 + $0xf0] sm:$0xf]  ;;  %v4347_v62 = vor.u32 %v5093_v60, %v4346_v59  ;;  %v610_v3 = vperm.slane %v267_v57, 1  ;;  %v4514_v49 = vld [vmem:[%s9062_s4 + $0x1c0] sm:$0xf] }
  0x38   : > { %v455_v10 = vadd.f32 %v454_v5, %v453_v63  ;;  %v5109_v63 = vld [vmem:[%s9062_s4 + $0xf4] sm:$0xf0]  ;;  %v4467_v5 = vor.u32 %v5123_v1, %v4466_v0  ;;  %v5135_v50 = vld [vmem:[%s9062_s4 + $0x1c4] sm:$0xf0]  ;;  %v4322_v51 = vld [vmem:[%s9062_s4 + $0x40] sm:$0xf] }
  0x39   : > { %v489_v12 = vsel %vm9071_vm3, %v427_v8, %v413_v6  ;;  %v4411_v4 = vor.u32 %v5109_v63, %v4410_v61  ;;  %v4530_v6 = vld [vmem:[%s9062_s4 + $0x1e0] sm:$0xf]  ;;  %v627_v8 = vperm.slane %v4265_v58, 0  ;;  %1907 = vmatpush.bf16.msra.mxu2 %v4347_v62  ;;  %v4515_v60 = vor.u32 %v5135_v50, %v4514_v49  ;;  %v5103_v63 = vld [vmem:[%s9062_s4 + $0xc4] sm:$0xf0] }
  0x3a   : > { %v490_v13 = vsel %vm9069_vm4, %v441_v9, %v489_v12  ;;  %v628_v9 = vperm.slane %v4265_v58, 1  ;;  %1966 = vmatpush.bf16.msra.mxu0 %v4467_v5  ;;  %v5091_v12 = vld [vmem:[%s9062_s4 + $0x64] sm:$0xf0]  ;;  %v4386_v62 = vld [vmem:[%s9062_s4 + $0xc0] sm:$0xf] }
  0x3b   : > { %v491_v14 = vsel %vm9067_vm5, %v455_v10, %v490_v13  ;;  %v4531_v10 = vor.u32 %v5139_v7, %v4530_v6  ;;  %1936 = vmatpush.bf16.msra.mxu3 %v4411_v4  ;;  %v4402_v13 = vld [vmem:[%s9062_s4 + $0xe0] sm:$0xf]  ;;  %v5087_v58 = vld [vmem:[%s9062_s4 + $0x44] sm:$0xf0]  ;;  %v4442_v0 = vld [vmem:[%s9062_s4 + $0x130] sm:$0xf] }
  0x3c   : > { %v496_v15 = vsel %vm9066_vm6, %v472_v11, %v491_v14  ;;  %v4338_v11 = vld [vmem:[%s9062_s4 + $0x60] sm:$0xf]  ;;  %v4323_v61 = vor.u32 %v5087_v58, %v4322_v51  ;;  %v5117_v4 = vld [vmem:[%s9062_s4 + $0x134] sm:$0xf0]  ;;  %v4506_v7 = vld [vmem:[%s9062_s4 + $0x1b0] sm:$0xf] }
  0x3d   : > { %533 = vmatmul.f32.vlgmr.msra.gmra.mxu1 %v496_v15  ;;  %v4298_v51 = vld [vmem:[%s9062_s4 + $0x10] sm:$0xf] }
  0x3e   : > { %1994 = vmatpush.bf16.msra.mxu1 %v4539_v56 }
  0x42   : > { %1995 = vmatpush.bf16.msra.mxu1 %v4531_v10  ;;  %v4443_v10 = vor.u32 %v5117_v4, %v4442_v0 }
  0xa8   : > { %v514_v20 = vpop.f32.mrf.mxu0 }
  0xba   : > { %v534_v23 = vpop.f32.mrf.mxu1 }
  0xbb   : > { %v535_v24 = vadd.f32 %v534_v23, %v514_v20  ;;  %v4339_v20 = vor.u32 %v5091_v12, %v4338_v11  ;;  %v5107_v23 = vld [vmem:[%s9062_s4 + $0xe4] sm:$0xf0]  ;;  %v4314_v11 = vld [vmem:[%s9062_s4 + $0x30] sm:$0xf]  ;;  %v5085_v12 = vld [vmem:[%s9062_s4 + $0x34] sm:$0xf0] }
  0xbd   : > { %v537_v25 = vmul.f32 0.001953125, %v535_v24  ;;  %v4458_v24 = vld [vmem:[%s9062_s4 + $0x150] sm:$0xf]  ;;  %1908 = vmatpush.bf16.msra.mxu2 %v4339_v20  ;;  %v5101_v20 = vld [vmem:[%s9062_s4 + $0xb4] sm:$0xf0] }
  0xbf   : > { %v538_v28 = vmul.f32 %v537_v25, %v537_v25  ;;  %v555_v42 = vsub.f32 0.0, %v537_v25 }
  0xc1   : > { %v540_v29 = vrot.slane %v538_v28, 4  ;;  %v4403_v28 = vor.u32 %v5107_v23, %v4402_v13  ;;  %v4378_v13 = vld [vmem:[%s9062_s4 + $0xb0] sm:$0xf]  ;;  %v4434_v23 = vld [vmem:[%s9062_s4 + $0x120] sm:$0xf] }
  0xc3   : > { %v542_v30 = vsub.f32 %v537_v25, %v540_v29  ;;  %v5121_v25 = vld [vmem:[%s9062_s4 + $0x154] sm:$0xf0]  ;;  %1937 = vmatpush.bf16.msra.mxu3 %v4403_v28  ;;  %v5131_v28 = vld [vmem:[%s9062_s4 + $0x1a4] sm:$0xf0] }
  0xc4   : > { %v4459_v29 = vor.u32 %v5121_v25, %v4458_v24  ;;  %v5115_v24 = vld [vmem:[%s9062_s4 + $0x124] sm:$0xf0] }
  0xc5   : > { %v543_v31 = vmax.f32 %v542_v30, 0.0  ;;  %v4522_v30 = vld [vmem:[%s9062_s4 + $0x1d0] sm:$0xf] }
  0xc6   : > { %1967 = vmatpush.bf16.msra.mxu0 %v4459_v29  ;;  %v4306_v29 = vld [vmem:[%s9062_s4 + $0x20] sm:$0xf] }
  0xc7   : > { %v544_v32 = vadd.f32 1e-05, %v543_v31  ;;  %v5137_v31 = vld [vmem:[%s9062_s4 + $0x1d4] sm:$0xf0] }
  0xc9   : > { %5278 = vrsqrt.f32 %v544_v32  ;;  %vm551_vm8 = vweird.f32 %v544_v32 }
  0xcf   : > { %v5279_v33 = vpop.eup %5278 }
  0xd0   : > { %v546_v36 = vmul.f32 %v5279_v33, %v544_v32  ;;  %vm552_vm7 = vweird.f32 %v5279_v33  ;;  %v4330_v32 = vld [vmem:[%s9062_s4 + $0x50] sm:$0xf] }
  0xd1   : > { %vm553_vm9 = vmor %vm551_vm8, %vm552_vm7 }
  0xd2   : > { %v547_v37 = vmul.f32 %v5279_v33, %v546_v36  ;;  %v5089_v36 = vld [vmem:[%s9062_s4 + $0x54] sm:$0xf0] }
  0xd4   : > { %v548_v38 = vmul.f32 0.5, %v547_v37  ;;  %v4394_v37 = vld [vmem:[%s9062_s4 + $0xd0] sm:$0xf] }
  0xd6   : > { %v549_v39 = vsub.f32 1.5, %v548_v38  ;;  %v5105_v38 = vld [vmem:[%s9062_s4 + $0xd4] sm:$0xf0] }
  0xd8   : > { %v550_v40 = vmul.f32 %v5279_v33, %v549_v39 }
  0xda   : > { %v554_v41 = vsel %vm553_vm9, %v5279_v33, %v550_v40  ;;  %v4523_v33 = vor.u32 %v5137_v31, %v4522_v30 }
  0xdb   : > { %v557_v43 = vrot.slane %v554_v41, 4 }
  0xdc   : > { %1996 = vmatpush.bf16.msra.mxu1 %v4523_v33 }
  0xdd   : > { %v559_v44 = vmul.f32 %v557_v43, %v555_v42  ;;  %v4331_v42 = vor.u32 %v5089_v36, %v4330_v32  ;;  %v4435_v32 = vor.u32 %v5115_v24, %v4434_v23  ;;  %v5083_v36 = vld [vmem:[%s9062_s4 + $0x24] sm:$0xf0] }
  0xdf   : > { %v561_v45 = vrot.slane %v559_v44, 4  ;;  %v5119_v44 = vld [vmem:[%s9062_s4 + $0x144] sm:$0xf0]  ;;  %1909 = vmatpush.bf16.msra.mxu2 %v4331_v42 }
  0xe0   : > { %1997 = vmatpush.bf16.msra.mxu1 %v4515_v60  ;;  %v5097_v60 = vld [vmem:[%s9062_s4 + $0x94] sm:$0xf0] }
  0xe1   : > { %v563_v46 = vsel %vm9066_vm6, %v557_v43, %v561_v45  ;;  %v4450_v43 = vld [vmem:[%s9062_s4 + $0x140] sm:$0xf]  ;;  %v4395_v45 = vor.u32 %v5105_v38, %v4394_v37 }
  0xe2   : > { %4270 = vmatmul.msk.f32.vlgmr.msrb.gmra.mxu0 %vm9065_vm10, %v563_v46  ;;  %4271 = vmatmul.msk.f32.vlgmr.msrb.gmra.mxu1 %vm9065_vm10, %v563_v46  ;;  %v4451_v46 = vor.u32 %v5119_v44, %v4450_v43  ;;  %v4370_v37 = vld [vmem:[%s9062_s4 + $0xa0] sm:$0xf]  ;;  %v5113_v43 = vld [vmem:[%s9062_s4 + $0x114] sm:$0xf0] }
  0xe3   : > { %1938 = vmatpush.bf16.msra.mxu3 %v4395_v45  ;;  %1910 = vmatpush.bf16.msra.mxu2 %v4323_v61  ;;  %v5129_v44 = vld [vmem:[%s9062_s4 + $0x194] sm:$0xf0]  ;;  %v4418_v61 = vld [vmem:[%s9062_s4 + $0x100] sm:$0xf] }
  0xe4   : > { %1968 = vmatpush.bf16.msra.mxu0 %v4451_v46 }
  0xe8   : > { %1969 = vmatpush.bf16.msra.mxu0 %v4443_v10 }
  0xec   : > { %1970 = vmatpush.bf16.msra.mxu0 %v4435_v32  ;;  %v5095_v32 = vld [vmem:[%s9062_s4 + $0x84] sm:$0xf0] }
 0x15f   : > { %v585_v14 = vpop.f32.mrf.mxu0  ;;  %v605_v15 = vpop.f32.mrf.mxu1 }
 0x160   : > { %v613_v26 = vmul.f32 %v609_v2, %v585_v14  ;;  %v614_v27 = vmul.f32 %v610_v3, %v605_v15  ;;  %v4315_v15 = vor.u32 %v5085_v12, %v4314_v11 }
 0x162   : > { %v617_v39 = vrot.slane %v614_v27, 7  ;;  %v631_v40 = vadd.f32 %v627_v8, %v613_v26  ;;  %v632_v41 = vadd.f32 %v628_v9, %v614_v27  ;;  %v5133_v8 = vld [vmem:[%s9062_s4 + $0x1b4] sm:$0xf0]  ;;  %v4387_v9 = vor.u32 %v5103_v63, %v4386_v62  ;;  %v4498_v27 = vld [vmem:[%s9062_s4 + $0x1a0] sm:$0xf]  ;;  %1911 = vmatpush.bf16.msra.mxu2 %v4315_v15 }
 0x163   : > { %v4507_v14 = vor.u32 %v5133_v8, %v4506_v7  ;;  %v4499_v33 = vor.u32 %v5131_v28, %v4498_v27  ;;  %v5111_v62 = vld [vmem:[%s9062_s4 + $0x104] sm:$0xf0]  ;;  %v4482_v7 = vld [vmem:[%s9062_s4 + $0x180] sm:$0xf] }
 0x164   : > { %v619_v54 = vsel %vm618_vm11, %v613_v26, %v617_v39  ;;  %v620_v55 = vsel %vm9072_vm0, %v613_v26, %v617_v39  ;;  %v5816_v56 = vsel %vm9070_vm1, %v613_v26, %v617_v39  ;;  %v5819_v57 = vsel %vm9068_vm2, %v613_v26, %v617_v39  ;;  %635 = vst [vmem:[#allocation1] sm:$0xff] %v631_v40  ;;  %v5127_v8 = vld [vmem:[%s9062_s4 + $0x184] sm:$0xf0] }
 0x165   : > { %v621_v59 = vrot.slane %v620_v55, 1  ;;  %636 = vst [vmem:[#allocation1 + $0x9] sm:$0xff] %v632_v41  ;;  %v623_v1 = vrot.slane %v5816_v56, 2  ;;  %v645_v2 = vperm.slane %v619_v54, 0  ;;  %v646_v3 = vperm.slane %v619_v54, 1  ;;  %1939 = vmatpush.bf16.msra.mxu3 %v4387_v9  ;;  %1998 = vmatpush.bf16.msra.mxu1 %v4507_v14 }
 0x166   : > { %v4379_v26 = vor.u32 %v5101_v20, %v4378_v13  ;;  %v4307_v41 = vor.u32 %v5083_v36, %v4306_v29  ;;  %v5081_v54 = vld [vmem:[%s9062_s4 + $0x14] sm:$0xf0]  ;;  %v4362_v55 = vld [vmem:[%s9062_s4 + $0x90] sm:$0xf]  ;;  %v4419_v10 = vor.u32 %v5111_v62, %v4418_v61  ;;  %v4483_v13 = vor.u32 %v5127_v8, %v4482_v7 }
 0x167   : > { %v5837_v5 = vperm.slane %v621_v59, 0  ;;  %v5839_v6 = vperm.slane %v621_v59, 1  ;;  %v661_v25 = vmul.f32 %v645_v2, %v5574_v16  ;;  %v662_v31 = vmul.f32 %v646_v3, %v5648_v34  ;;  %v4426_v34 = vld [vmem:[%s9062_s4 + $0x110] sm:$0xf]  ;;  %v5173_v61 = vld [vmem:[%s9062_s4 + $0x2f4] sm:$0xf0] }
 0x168   : > { %v663_v16 = vmul.f32 %v645_v2, %v5577_v17  ;;  %v664_v38 = vmul.f32 %v646_v3, %v5651_v35  ;;  %v5099_v17 = vld [vmem:[%s9062_s4 + $0xa4] sm:$0xf0]  ;;  %v4490_v35 = vld [vmem:[%s9062_s4 + $0x190] sm:$0xf]  ;;  %v4427_v58 = vor.u32 %v5113_v43, %v4426_v34  ;;  %1912 = vmatpush.bf16.msra.mxu2 %v4307_v41  ;;  %v4299_v3 = vor.u32 %v5081_v54, %v4298_v51 }
 0x169   : > { %v4371_v42 = vor.u32 %v5099_v17, %v4370_v37  ;;  %1940 = vmatpush.bf16.msra.mxu3 %v4379_v26  ;;  %1999 = vmatpush.bf16.msra.mxu1 %v4499_v33  ;;  %v4491_v59 = vor.u32 %v5129_v44, %v4490_v35  ;;  %v4363_v9 = vor.u32 %v5097_v60, %v4362_v55  ;;  %v625_v20 = vrot.slane %v5819_v57, 3  ;;  %v4602_v43 = vld [vmem:[%s9062_s4 + $0x270] sm:$0xf]  ;;  %v5157_v55 = vld [vmem:[%s9062_s4 + $0x274] sm:$0xf0] }
 0x16a   : > { %v665_v12 = vmul.f32 %v5837_v5, %v5580_v18  ;;  %1971 = vmatpush.bf16.msra.mxu0 %v4427_v58  ;;  %v666_v23 = vmul.f32 %v5839_v6, %v5667_v47  ;;  %v667_v24 = vmul.f32 %v5837_v5, %v5583_v19  ;;  %v668_v18 = vmul.f32 %v5839_v6, %v5670_v48  ;;  %v4290_v19 = vld [vmem:[%s9062_s4] sm:$0xf]  ;;  %v5079_v47 = vld [vmem:[%s9062_s4 + $0x4] sm:$0xf0]  ;;  %v4666_v60 = vld [vmem:[%s9062_s4 + $0x2f0] sm:$0xf] }
 0x16b   : > { %v649_v26 = vperm.slane %v623_v1, 0  ;;  %v4354_v48 = vld [vmem:[%s9062_s4 + $0x80] sm:$0xf]  ;;  %v5108_v57 = vld [vmem:[%s9062_s4 + $0xf4] sm:$0xf] }
 0x16c   : > { %v638_v30 = vld [vmem:[#allocation1 + $0x4] ss:$9 sm:$0xff]  ;;  %1913 = vmatpush.bf16.msra.mxu2 %v4299_v3  ;;  %v5952_v29 = vld [vmem:[#allocation1 + $0x6] ss:$9 sm:$0xff] }
 0x16d   : > { %v677_v39 = vperm.slane %v638_v30, 0  ;;  %v678_v40 = vperm.slane %v638_v30, 1  ;;  %1941 = vmatpush.bf16.msra.mxu3 %v4371_v42  ;;  %v640_v11 = vld [vmem:[#allocation1 + $0x5] ss:$9 sm:$0xff]  ;;  %2000 = vmatpush.bf16.msra.mxu1 %v4491_v59  ;;  %v5967_v30 = vperm.slane %v623_v1, 1  ;;  %v681_v56 = vperm.slane %v5952_v29, 0 }
 0x16e   : > { %v679_v14 = vperm.slane %v640_v11, 0  ;;  %v680_v15 = vperm.slane %v640_v11, 1  ;;  %1972 = vmatpush.bf16.msra.mxu0 %v4419_v10  ;;  %v682_v44 = vperm.slane %v5952_v29, 1  ;;  %v669_v58 = vmul.f32 %v649_v26, %v5588_v21  ;;  %v4594_v3 = vld [vmem:[%s9062_s4 + $0x260] sm:$0xf] }
 0x16f   : > { %v5899_v45 = vadd.f32 %v677_v39, %v661_v25  ;;  %v5901_v46 = vadd.f32 %v678_v40, %v662_v31  ;;  %v5903_v49 = vadd.f32 %v677_v39, %v663_v16  ;;  %v5905_v50 = vadd.f32 %v678_v40, %v664_v38 }
 0x170   : > { %v5944_v25 = vadd.f32 %v679_v14, %v665_v12  ;;  %v5948_v27 = vadd.f32 %v680_v15, %v666_v23  ;;  %v5950_v28 = vadd.f32 %v679_v14, %v667_v24  ;;  %v5963_v5 = vadd.f32 %v680_v15, %v668_v18  ;;  %v5171_v12 = vld [vmem:[%s9062_s4 + $0x2e4] sm:$0xf0] }
 0x171   : > { %v4272_v63 = vmul.f32 -1.442695, %v5899_v45  ;;  %v4273_v0 = vmul.f32 -1.442695, %v5901_v46  ;;  %v4274_v2 = vmul.f32 -1.442695, %v5903_v49  ;;  %1942 = vmatpush.bf16.msra.mxu3 %v4363_v9  ;;  %2001 = vmatpush.bf16.msra.mxu1 %v4483_v13  ;;  %v4291_v16 = vor.u32 %v5079_v47, %v4290_v19 }
 0x172   : > { %v4275_v4 = vmul.f32 -1.442695, %v5905_v50  ;;  %v5971_v31 = vperm.slane %v625_v20, 0  ;;  %v4276_v33 = vmul.f32 -1.442695, %v5944_v25  ;;  %v4355_v38 = vor.u32 %v5095_v32, %v4354_v48 }
 0x173   : > { %5280 = vpow2.f32 %v4272_v63  ;;  %v260_v39 = vlaneseq  ;;  %1914 = vmatpush.bf16.msra.mxu2 %v4291_v16  ;;  %v4277_v41 = vmul.f32 -1.442695, %v5948_v27  ;;  %v5984_v17 = vmul.f32 -1.442695, %v5950_v28  ;;  %v5092_v13 = vld [vmem:[%s9062_s4 + $0x74] sm:$0xf] }
 0x174   : > { %5282 = vpow2.f32 %v4273_v0  ;;  %v5993_v35 = vmul.f32 -1.442695, %v5963_v5  ;;  %v670_v62 = vmul.f32 %v5967_v30, %v5677_v52  ;;  %v671_v63 = vmul.f32 %v649_v26, %v5591_v22  ;;  %v5155_v52 = vld [vmem:[%s9062_s4 + $0x264] sm:$0xf0]  ;;  %v4658_v22 = vld [vmem:[%s9062_s4 + $0x2e0] sm:$0xf] }
 0x175   : > { %5284 = vpow2.f32 %v4274_v2  ;;  %1943 = vmatpush.bf16.msra.mxu3 %v4355_v38  ;;  %v6018_v2 = vshrl.u32 %v260_v39, 7  ;;  %v6030_v7 = vadd.f32 %v681_v56, %v669_v58  ;;  %v4603_v11 = vor.u32 %v5157_v55, %v4602_v43  ;;  %v4348_v26 = vld [vmem:[%s9062_s4 + $0x78] sm:$0xf0] }
 0x176   : > { %5286 = vpow2.f32 %v4275_v4  ;;  %v6034_v8 = vadd.f32 %v682_v44, %v670_v62  ;;  %v6044_v14 = vadd.f32 %v681_v56, %v671_v63  ;;  %v4667_v18 = vor.u32 %v5173_v61, %v4666_v60 }
 0x177   : > { %5288 = vpow2.f32 %v4276_v33  ;;  %2023 = vmatpush.bf16.msrb.mxu2 %v4603_v11  ;;  %v4595_v32 = vor.u32 %v5155_v52, %v4594_v3  ;;  %v4659_v39 = vor.u32 %v5171_v12, %v4658_v22  ;;  %v4351_v56 = vor.u32 %v5092_v13, %v4348_v26 }
 0x178   : > { %vm9078_vm2 = vcmp.ne.s32.totalorder %v6018_v2, 0  ;;  %v6090_v11 = vmul.f32 -1.442695, %v6034_v8  ;;  %v6093_v12 = vmul.f32 -1.442695, %v6044_v14 }
 0x179   : > { %v5281_v6 = vpop.eup %5280  ;;  %2052 = vmatpush.bf16.msrb.mxu3 %v4667_v18  ;;  %2081 = vmatpush.bf16.msrb.mxu0 %v4351_v56 }
 0x17a   : > { %v5283_v36 = vpop.eup %5282  ;;  %v5977_v37 = vadd.f32 1.0, %v5281_v6 }
 0x17b   : > { %v5285_v1 = vpop.eup %5284  ;;  %v5980_v40 = vadd.f32 1.0, %v5283_v36  ;;  %2024 = vmatpush.bf16.msrb.mxu2 %v4595_v32 }
 0x17c   : > { %v5287_v34 = vpop.eup %5286  ;;  %v5986_v42 = vadd.f32 1.0, %v5285_v1  ;;  %5290 = vrcp.f32 %v5977_v37  ;;  %v782_v54 = vand.u32 2147483647, %v5977_v37  ;;  %v784_v59 = vand.u32 2147483648, %v5977_v37 }
 0x17d   : > { %v5996_v51 = vadd.f32 1.0, %v5287_v34  ;;  %5292 = vrcp.f32 %v5980_v40  ;;  %v797_v21 = vand.u32 2147483647, %v5980_v40  ;;  %v799_v0 = vand.u32 2147483648, %v5980_v40  ;;  %v5289_v9 = vpop.eup %5288  ;;  %2053 = vmatpush.bf16.msrb.mxu3 %v4659_v39 }
 0x17e   : > { %5294 = vrcp.f32 %v5986_v42  ;;  %v812_v4 = vand.u32 2147483647, %v5986_v42  ;;  %vm778_vm12 = vweird.f32 %v5977_v37  ;;  %v814_v10 = vand.u32 2147483648, %v5986_v42 }
 0x17f   : > { %5296 = vrcp.f32 %v5996_v51  ;;  %v785_v23 = vor.u32 1.1754944e-38, %v784_v59  ;;  %vm793_vm13 = vweird.f32 %v5980_v40  ;;  %v827_v24 = vand.u32 2147483647, %v5996_v51 }
 0x180   : > { %vm6052_vm14 = vcmp.eq.f32.partialorder %v782_v54, 8.507059e+37  ;;  %v800_v6 = vor.u32 1.1754944e-38, %v799_v0  ;;  %vm808_vm15 = vweird.f32 %v5986_v42  ;;  %v829_v16 = vand.u32 2147483648, %v5996_v51 }
 0x181   : > { %vm6059_vm7 = vcmp.eq.f32.partialorder %v797_v21, 8.507059e+37  ;;  %vm823_vm8 = vweird.f32 %v5996_v51  ;;  %5298 = vpow2.f32 %v4277_v41  ;;  %vm6065_vm10 = vcmp.eq.f32.partialorder %v812_v4, 8.507059e+37 }
 0x182   : > { %v5291_v15 = vpop.eup %5290  ;;  %v815_v55 = vor.u32 1.1754944e-38, %v814_v10  ;;  %vm6070_vm6 = vcmp.eq.f32.partialorder %v827_v24, 8.507059e+37  ;;  %5300 = vpow2.f32 %v5984_v17  ;;  %v830_v62 = vor.u32 1.1754944e-38, %v829_v16 }
 0x183   : > { %v5293_v19 = vpop.eup %5292  ;;  %v774_v47 = vmul.f32 %v5291_v15, %v5977_v37  ;;  %vm779_vm9 = vweird.f32 %v5291_v15  ;;  %v6075_v63 = vadd.f32 1.0, %v5289_v9  ;;  %5302 = vpow2.f32 %v5993_v35 }
 0x184   : > { %v5295_v33 = vpop.eup %5294  ;;  %v789_v36 = vmul.f32 %v5293_v19, %v5980_v40  ;;  %vm794_vm5 = vweird.f32 %v5293_v19  ;;  %vm780_vm1 = vmor %vm778_vm12, %vm779_vm9  ;;  %v6084_v9 = vmul.f32 -1.442695, %v6030_v7 }
 0x185   : > { %v5297_v1 = vpop.eup %5296  ;;  %v775_v34 = vsub.f32 1.0, %v774_v47  ;;  %v804_v43 = vmul.f32 %v5295_v33, %v5986_v42  ;;  %vm809_vm4 = vweird.f32 %v5295_v33  ;;  %5304 = vrcp.f32 %v6075_v63  ;;  %vm795_vm0 = vmor %vm793_vm13, %vm794_vm5 }
 0x186   : > { %v790_v58 = vsub.f32 1.0, %v789_v36  ;;  %v819_v59 = vmul.f32 %v5297_v1, %v5996_v51  ;;  %vm824_vm3 = vweird.f32 %v5297_v1  ;;  %v842_v40 = vand.u32 2147483647, %v6075_v63 }
 0x187   : > { %v776_v41 = vmul.f32 %v5291_v15, %v775_v34  ;;  %v805_v61 = vsub.f32 1.0, %v804_v43  ;;  %v5299_v17 = vpop.eup %5298  ;;  %vm825_vm5 = vmor %vm823_vm8, %vm824_vm3 }
 0x188   : > { %v791_v21 = vmul.f32 %v5293_v19, %v790_v58  ;;  %v820_v0 = vsub.f32 1.0, %v819_v59  ;;  %v5301_v37 = vpop.eup %5300 }
 0x189   : > { %v777_v3 = vadd.f32 %v5291_v15, %v776_v41  ;;  %v806_v4 = vmul.f32 %v5295_v33, %v805_v61  ;;  %v6125_v36 = vadd.f32 1.0, %v5301_v37 }
 0x18a   : > { %v792_v52 = vadd.f32 %v5293_v19, %v791_v21  ;;  %v821_v22 = vmul.f32 %v5297_v1, %v820_v0 }
 0x18b   : > { %v781_v10 = vsel %vm780_vm1, %v5291_v15, %v777_v3  ;;  %v807_v35 = vadd.f32 %v5295_v33, %v806_v4  ;;  %vm810_vm1 = vmor %vm808_vm15, %vm809_vm4  ;;  %v874_v29 = vand.u32 2147483648, %v6125_v36 }
 0x18c   : > { %v786_v13 = vsel %vm6052_vm14, %v785_v23, %v781_v10  ;;  %v796_v24 = vsel %vm795_vm0, %v5293_v19, %v792_v52  ;;  %v822_v15 = vadd.f32 %v5297_v1, %v821_v22  ;;  %v6109_v23 = vadd.f32 1.0, %v5299_v17  ;;  %v5303_v19 = vpop.eup %5302 }
 0x18d   : > { %v801_v18 = vsel %vm6059_vm7, %v800_v6, %v796_v24  ;;  %v811_v26 = vsel %vm810_vm1, %v5295_v33, %v807_v35  ;;  %v6107_v47 = vmul.f32 %v786_v13, %v5899_v45  ;;  %v844_v6 = vand.u32 2147483648, %v6075_v63  ;;  %v6117_v32 = vpop.eup %5304 }
 0x18e   : > { %v816_v42 = vsel %vm6065_vm10, %v815_v55, %v811_v26  ;;  %v826_v48 = vsel %vm825_vm5, %v5297_v1, %v822_v15  ;;  %v6114_v16 = vmul.f32 %v801_v18, %v5901_v46  ;;  %vm838_vm0 = vweird.f32 %v6075_v63 }
 0x18f   : > { %v831_v51 = vsel %vm6070_vm6, %v830_v62, %v826_v48  ;;  %v6122_v45 = vmul.f32 %v816_v42, %v5903_v49  ;;  %v1045_v33 = vrot.slane %v6107_v47, 7  ;;  %v834_v56 = vmul.f32 %v6117_v32, %v6075_v63 }
 0x190   : > { %v6129_v38 = vmul.f32 %v831_v51, %v5905_v50  ;;  %v1190_v46 = vpack.c.bf16 %v6114_v16, %v6107_v47  ;;  %v1046_v39 = vrot.slane %v6114_v16, 7  ;;  %v6138_v34 = vadd.f32 1.0, %v5303_v19 }
 0x191   : > { %v1047_v49 = vrot.slane %v6122_v45, 7  ;;  %v1091_v1 = vsel %vm618_vm11, 0.0, %v1045_v33  ;;  %5306 = vrcp.f32 %v6109_v23  ;;  %v835_v41 = vsub.f32 1.0, %v834_v56  ;;  %v4650_v56 = vld [vmem:[%s9062_s4 + $0x2d0] sm:$0xf] }
 0x192   : > { %v1191_v50 = vpack.c.bf16 %v6129_v38, %v6122_v45  ;;  %v1254_v43 = vunpack.c.l.b16 %v1190_v46  ;;  %v1255_v54 = vunpack.c.h.b16 %v1190_v46  ;;  %v1049_v55 = vrot.slane %v6129_v38, 7 }
 0x193   : > { %v1048_v58 = vsel %vm618_vm11, %v1045_v33, %v1047_v49  ;;  %v1092_v59 = vsel %vm618_vm11, 0.0, %v1046_v39  ;;  %v1146_v60 = vsel %vm9078_vm2, %v1091_v1, 0.0  ;;  %v836_v17 = vmul.f32 %v6117_v32, %v835_v41  ;;  %v5151_v41 = vld [vmem:[%s9062_s4 + $0x244] sm:$0xf0] }
 0x194   : > { %v1256_v61 = vunpack.c.l.b16 %v1191_v50  ;;  %v1257_v62 = vunpack.c.h.b16 %v1191_v50  ;;  %v1050_v21 = vsel %vm618_vm11, %v1046_v39, %v1049_v55  ;;  %v1147_v0 = vsel %vm9078_vm2, %v1092_v59, 0.0  ;;  %v5153_v39 = vld [vmem:[%s9062_s4 + $0x254] sm:$0xf0]  ;;  %v4404_v59 = vld [vmem:[%s9062_s4 + $0xe8] sm:$0xf0] }
 0x195   : > { %v1182_v3 = vpack.c.bf16 %v1147_v0, %v1146_v60  ;;  %v1183_v4 = vpack.c.bf16 %v1050_v21, %v1048_v58  ;;  %vm839_vm3 = vweird.f32 %v6117_v32  ;;  %v857_v10 = vand.u32 2147483647, %v6109_v23  ;;  %v5090_v58 = vld [vmem:[%s9062_s4 + $0x64] sm:$0xf]  ;;  %v4578_v60 = vld [vmem:[%s9062_s4 + $0x240] sm:$0xf] }
 0x196   : > { %v6157_v52 = vpack.c.b16 %v1256_v61, %v1254_v43  ;;  %v6159_v22 = vpack.c.b16 %v1257_v62, %v1255_v54  ;;  %v859_v35 = vand.u32 2147483648, %v6109_v23  ;;  %v6167_v26 = vperm.slane %v625_v20, 1  ;;  %vm6174_vm4 = vmor %vm838_vm0, %vm839_vm3  ;;  %v4412_v20 = vld [vmem:[%s9062_s4 + $0xf8] sm:$0xf0]  ;;  %v5169_v54 = vld [vmem:[%s9062_s4 + $0x2d4] sm:$0xf0] }
 0x197   : > { %v6163_v37 = vpop.eup %5306  ;;  %v1214_v13 = vunpack.c.l.b16 %v1182_v3  ;;  %v1216_v24 = vunpack.c.l.b16 %v1183_v4  ;;  %v1215_v15 = vunpack.c.h.b16 %v1182_v3  ;;  %v1217_v18 = vunpack.c.h.b16 %v1183_v4  ;;  %v4642_v4 = vld [vmem:[%s9062_s4 + $0x2c0] sm:$0xf] }
 0x198   : > { %1973 = vmatmul.bf16.vlgmr.msra.gmra.mxu0 %v6157_v52  ;;  %2002 = vmatmul.bf16.vlgmr.msra.gmra.mxu1 %v6159_v22  ;;  %v837_v19 = vadd.f32 %v6117_v32, %v836_v17  ;;  %v845_v48 = vor.u32 1.1754944e-38, %v844_v6  ;;  %v849_v51 = vmul.f32 %v6163_v37, %v6109_v23  ;;  %5308 = vrcp.f32 %v6125_v36  ;;  %v4586_v6 = vld [vmem:[%s9062_s4 + $0x250] sm:$0xf]  ;;  %v5167_v17 = vld [vmem:[%s9062_s4 + $0x2c4] sm:$0xf0] }
 0x199   : > { %v6186_v33 = vpack.c.b16 %v1216_v24, %v1214_v13  ;;  %v6188_v46 = vpack.c.b16 %v1217_v18, %v1215_v15  ;;  %v672_v1 = vmul.f32 %v5967_v30, %v5680_v53  ;;  %vm843_vm6 = vcmp.eq.f32.partialorder %v842_v40, 8.507059e+37  ;;  %v4340_v40 = vld [vmem:[%s9062_s4 + $0x68] sm:$0xf0] }
 0x19a   : > { %v841_v50 = vsel %vm6174_vm4, %v6117_v32, %v837_v19  ;;  %v850_v43 = vsub.f32 1.0, %v849_v51  ;;  %5310 = vpow2.f32 %v6084_v9  ;;  %vm6216_vm10 = vcmp.eq.f32.partialorder %v857_v10, 8.507059e+37  ;;  %v5106_v9 = vld [vmem:[%s9062_s4 + $0xe4] sm:$0xf] }
 0x19b   : > { %1915 = vmatmul.bf16.vlgmr.msra.gmra.mxu2 %v6186_v33  ;;  %1944 = vmatmul.bf16.vlgmr.msra.gmra.mxu3 %v6188_v46  ;;  %v846_v53 = vsel %vm843_vm6, %v845_v48, %v841_v50  ;;  %v860_v63 = vor.u32 1.1754944e-38, %v859_v35  ;;  %5312 = vrcp.f32 %v6138_v34  ;;  %vm853_vm12 = vweird.f32 %v6109_v23  ;;  %v4332_v35 = vld [vmem:[%s9062_s4 + $0x58] sm:$0xf0] }
 0x19c   : > { %v851_v32 = vmul.f32 %v6163_v37, %v850_v43  ;;  %vm854_vm13 = vweird.f32 %v6163_v37  ;;  %v6241_v61 = vadd.f32 %v682_v44, %v672_v1  ;;  %v872_v62 = vand.u32 2147483647, %v6125_v36 }
 0x19d   : > { %v6245_v21 = vmul.f32 %v846_v53, %v5944_v25  ;;  %v4415_v0 = vor.u32 %v5108_v57, %v4412_v20  ;;  %v4587_v3 = vor.u32 %v5153_v39, %v4586_v6  ;;  %vm868_vm14 = vweird.f32 %v6125_v36  ;;  %v5088_v25 = vld [vmem:[%s9062_s4 + $0x54] sm:$0xf]  ;;  %vm855_vm15 = vmor %vm853_vm12, %vm854_vm13 }
 0x19e   : > { %v852_v10 = vadd.f32 %v6163_v37, %v851_v32  ;;  %v4651_v44 = vor.u32 %v5169_v54, %v4650_v56  ;;  %v5309_v13 = vpop.eup %5308  ;;  %v4343_v15 = vor.u32 %v5090_v58, %v4340_v40  ;;  %v4407_v18 = vor.u32 %v5106_v9, %v4404_v59 }
 0x19f   : > { %2110 = vmatpush.bf16.msrb.mxu1 %v4415_v0  ;;  %v1051_v24 = vrot.slane %v6245_v21, 7  ;;  %2025 = vmatpush.bf16.msrb.mxu2 %v4587_v3  ;;  %v4579_v19 = vor.u32 %v5151_v41, %v4578_v60  ;;  %v864_v51 = vmul.f32 %v5309_v13, %v6125_v36  ;;  %vm883_vm7 = vweird.f32 %v6138_v34 }
 0x1a0   : > { %v5311_v42 = vpop.eup %5310  ;;  %v856_v48 = vsel %vm855_vm15, %v6163_v37, %v852_v10  ;;  %2054 = vmatpush.bf16.msrb.mxu3 %v4651_v44  ;;  %v4643_v57 = vor.u32 %v5167_v17, %v4642_v4  ;;  %v887_v6 = vand.u32 2147483647, %v6138_v34  ;;  %2082 = vmatpush.bf16.msrb.mxu0 %v4343_v15  ;;  %v4335_v39 = vor.u32 %v5088_v25, %v4332_v35 }
 0x1a1   : > { %v5313_v20 = vpop.eup %5312  ;;  %v861_v23 = vsel %vm6216_vm10, %v860_v63, %v856_v48  ;;  %5314 = vpow2.f32 %v6090_v11  ;;  %v865_v56 = vsub.f32 1.0, %v864_v51  ;;  %vm6274_vm8 = vcmp.eq.f32.partialorder %v872_v62, 8.507059e+37 }
 0x1a2   : > { %v879_v37 = vmul.f32 %v5313_v20, %v6138_v34  ;;  %v6280_v50 = vmul.f32 %v861_v23, %v5948_v27  ;;  %v1052_v43 = vsel %vm618_vm11, %v1047_v49, %v1051_v24  ;;  %5316 = vpow2.f32 %v6093_v12 }
 0x1a3   : > { %2111 = vmatpush.bf16.msrb.mxu1 %v4407_v18  ;;  %2026 = vmatpush.bf16.msrb.mxu2 %v4579_v19  ;;  %v4283_v11 = vmul.f32 -1.442695, %v6241_v61  ;;  %v6289_v54 = vadd.f32 1.0, %v5311_v42  ;;  %v866_v58 = vmul.f32 %v5309_v13, %v865_v56  ;;  %vm869_vm9 = vweird.f32 %v5309_v13 }
 0x1a4   : > { %v880_v53 = vsub.f32 1.0, %v879_v37  ;;  %v1053_v27 = vrot.slane %v6280_v50, 7  ;;  %2055 = vmatpush.bf16.msrb.mxu3 %v4643_v57  ;;  %v875_v30 = vor.u32 1.1754944e-38, %v874_v29  ;;  %vm6292_vm1 = vcmp.eq.f32.partialorder %v887_v6, 8.507059e+37  ;;  %2083 = vmatpush.bf16.msrb.mxu0 %v4335_v39  ;;  %vm870_vm0 = vmor %vm868_vm14, %vm869_vm9  ;;  %v5411_v57 = vld [vmem:[%s5553_s24 + $0x68] sm:$0xff] }
 0x1a5   : > { %v889_v49 = vand.u32 2147483648, %v6138_v34  ;;  %5318 = vpow2.f32 %v4283_v11  ;;  %v867_v12 = vadd.f32 %v5309_v13, %v866_v58  ;;  %vm884_vm5 = vweird.f32 %v5313_v20 }
 0x1a6   : > { %v881_v40 = vmul.f32 %v5313_v20, %v880_v53  ;;  %v1150_v9 = vsel %vm9078_vm2, %v1052_v43, 0.0  ;;  %v1192_v59 = vpack.c.bf16 %v6280_v50, %v6245_v21  ;;  %v1054_v60 = vsel %vm618_vm11, %v1049_v55, %v1053_v27  ;;  %vm885_vm3 = vmor %vm883_vm7, %vm884_vm5 }
 0x1a7   : > { %v5315_v32 = vpop.eup %5314  ;;  %5320 = vrcp.f32 %v6289_v54  ;;  %v904_v41 = vand.u32 2147483648, %v6289_v54  ;;  %v871_v62 = vsel %vm870_vm0, %v5309_v13, %v867_v12  ;;  %v1151_v3 = vsel %vm9078_vm2, %v1054_v60, 0.0 }
 0x1a8   : > { %v882_v0 = vadd.f32 %v5313_v20, %v881_v40  ;;  %v6310_v4 = vadd.f32 1.0, %v5315_v32  ;;  %v5317_v36 = vpop.eup %5316  ;;  %v876_v17 = vsel %vm6274_vm8, %v875_v30, %v871_v62  ;;  %v890_v55 = vor.u32 1.1754944e-38, %v889_v49 }
 0x1a9   : > { %v6316_v10 = vpack.c.bf16 %v1151_v3, %v1150_v9  ;;  %v902_v29 = vand.u32 2147483647, %v6289_v54  ;;  %v6320_v25 = vmul.f32 %v876_v17, %v5950_v28  ;;  %v6322_v35 = vadd.f32 1.0, %v5317_v36  ;;  %v5410_v28 = vld [vmem:[%s5553_s24 + $0x60] sm:$0xff] }
 0x1aa   : > { %v886_v44 = vsel %vm885_vm3, %v5313_v20, %v882_v0  ;;  %5322 = vrcp.f32 %v6310_v4  ;;  %v1258_v15 = vunpack.c.l.b16 %v1192_v59  ;;  %v1259_v18 = vunpack.c.h.b16 %v1192_v59 }
 0x1ab   : > { %v5319_v13 = vpop.eup %5318  ;;  %v891_v34 = vsel %vm6292_vm1, %v890_v55, %v886_v44  ;;  %v6327_v19 = vor.u32 1.1754944e-38, %v904_v41  ;;  %v1055_v48 = vrot.slane %v6320_v25, 7  ;;  %vm898_vm4 = vweird.f32 %v6289_v54 }
 0x1ac   : > { %v6330_v42 = vmul.f32 %v891_v34, %v5963_v5  ;;  %v6336_v51 = vmul.f32 %v5410_v28, %v5971_v31  ;;  %v6340_v20 = vmul.f32 %v5411_v57, %v6167_v26  ;;  %v1218_v6 = vunpack.c.l.b16 %v6316_v10 }
 0x1ad   : > { %v5321_v23 = vpop.eup %5320  ;;  %v1219_v39 = vunpack.c.h.b16 %v6316_v10  ;;  %v6344_v56 = vadd.f32 1.0, %v5319_v13  ;;  %5324 = vrcp.f32 %v6322_v35  ;;  %v1056_v1 = vsel %vm618_vm11, %v1051_v24, %v1055_v48  ;;  %v4396_v10 = vld [vmem:[%s9062_s4 + $0xd8] sm:$0xf0] }
 0x1ae   : > { %v1193_v5 = vpack.c.bf16 %v6330_v42, %v6320_v25  ;;  %v1057_v37 = vrot.slane %v6330_v42, 7  ;;  %v894_v43 = vmul.f32 %v5321_v23, %v6289_v54  ;;  %vm6356_vm6 = vcmp.eq.f32.partialorder %v902_v29, 8.507059e+37  ;;  %v4570_v29 = vld [vmem:[%s9062_s4 + $0x230] sm:$0xf]  ;;  %v4324_v54 = vld [vmem:[%s9062_s4 + $0x48] sm:$0xf0] }
 0x1af   : > { %vm913_vm10 = vweird.f32 %v6310_v4  ;;  %v917_v58 = vand.u32 2147483647, %v6310_v4  ;;  %v919_v53 = vand.u32 2147483648, %v6310_v4  ;;  %v932_v30 = vand.u32 2147483647, %v6322_v35 }
 0x1b0   : > { %v6364_v63 = vpop.eup %5322  ;;  %v1260_v49 = vunpack.c.l.b16 %v1193_v5  ;;  %v1261_v24 = vunpack.c.h.b16 %v1193_v5  ;;  %v1058_v12 = vsel %vm618_vm11, %v1053_v27, %v1057_v37  ;;  %v895_v40 = vsub.f32 1.0, %v894_v43  ;;  %v5104_v27 = vld [vmem:[%s9062_s4 + $0xd4] sm:$0xf]  ;;  %v5165_v43 = vld [vmem:[%s9062_s4 + $0x2b4] sm:$0xf0] }
 0x1b1   : > { %v1185_v9 = vpack.c.bf16 %v1058_v12, %v1056_v1  ;;  %vm899_vm12 = vweird.f32 %v5321_v23  ;;  %v909_v32 = vmul.f32 %v6364_v63, %v6310_v4  ;;  %v934_v59 = vand.u32 2147483648, %v6322_v35 }
 0x1b2   : > { %v6372_v60 = vpack.c.b16 %v1260_v49, %v1258_v15  ;;  %v6374_v41 = vpack.c.b16 %v1261_v24, %v1259_v18  ;;  %v896_v62 = vmul.f32 %v5321_v23, %v895_v40  ;;  %vm928_vm13 = vweird.f32 %v6322_v35  ;;  %v5149_v15 = vld [vmem:[%s9062_s4 + $0x234] sm:$0xf0]  ;;  %v4634_v18 = vld [vmem:[%s9062_s4 + $0x2b0] sm:$0xf]  ;;  %vm900_vm7 = vmor %vm898_vm4, %vm899_vm12 }
 0x1b3   : > { %5326 = vrcp.f32 %v6344_v56  ;;  %v6381_v0 = vpop.eup %5324  ;;  %v1220_v3 = vunpack.c.l.b16 %v1185_v9  ;;  %v1221_v36 = vunpack.c.h.b16 %v1185_v9  ;;  %v910_v17 = vsub.f32 1.0, %v909_v32  ;;  %v4388_v9 = vld [vmem:[%s9062_s4 + $0xc8] sm:$0xf0] }
 0x1b4   : > { %vm6383_vm14 = vcmp.eq.f32.partialorder %v917_v58, 8.507059e+37  ;;  %1978 = vmatmul.bf16.gmra.mxu0 %v6372_v60  ;;  %2007 = vmatmul.bf16.gmra.mxu1 %v6374_v41  ;;  %v897_v44 = vadd.f32 %v5321_v23, %v896_v62  ;;  %vm914_vm15 = vweird.f32 %v6364_v63  ;;  %v920_v13 = vor.u32 1.1754944e-38, %v919_v53  ;;  %v5147_v62 = vld [vmem:[%s9062_s4 + $0x224] sm:$0xf0] }
 0x1b5   : > { %v924_v34 = vmul.f32 %v6381_v0, %v6322_v35  ;;  %v6404_v28 = vpack.c.b16 %v1220_v3, %v1218_v6  ;;  %v6406_v57 = vpack.c.b16 %v1221_v36, %v1219_v39  ;;  %v911_v5 = vmul.f32 %v6364_v63, %v910_v17  ;;  %v5086_v6 = vld [vmem:[%s9062_s4 + $0x44] sm:$0xf]  ;;  %vm6438_vm9 = vmor %vm913_vm10, %vm914_vm15  ;;  %v5163_v3 = vld [vmem:[%s9062_s4 + $0x2a4] sm:$0xf0] }
 0x1b6   : > { %vm6412_vm8 = vcmp.eq.f32.partialorder %v932_v30, 8.507059e+37  ;;  %v901_v39 = vsel %vm900_vm7, %v5321_v23, %v897_v44  ;;  %v935_v53 = vor.u32 1.1754944e-38, %v934_v59  ;;  %v4399_v49 = vor.u32 %v5104_v27, %v4396_v10  ;;  %v5102_v30 = vld [vmem:[%s9062_s4 + $0xc4] sm:$0xf]  ;;  %v4626_v27 = vld [vmem:[%s9062_s4 + $0x2a0] sm:$0xf] }
 0x1b7   : > { %v925_v58 = vsub.f32 1.0, %v924_v34  ;;  %1920 = vmatmul.bf16.gmra.mxu2 %v6404_v28  ;;  %1949 = vmatmul.bf16.gmra.mxu3 %v6406_v57  ;;  %v906_v24 = vsel %vm6356_vm6, %v6327_v19, %v901_v39  ;;  %v912_v23 = vadd.f32 %v6364_v63, %v911_v5  ;;  %vm929_vm1 = vweird.f32 %v6381_v0  ;;  %v4562_v19 = vld [vmem:[%s9062_s4 + $0x220] sm:$0xf]  ;;  %v4316_v44 = vld [vmem:[%s9062_s4 + $0x38] sm:$0xf0] }
 0x1b8   : > { %v4571_v40 = vor.u32 %v5149_v15, %v4570_v29  ;;  %vm943_vm5 = vweird.f32 %v6344_v56  ;;  %v6452_v4 = vmul.f32 %v906_v24, %v6030_v7  ;;  %2112 = vmatpush.bf16.msrb.mxu1 %v4399_v49  ;;  %v4635_v59 = vor.u32 %v5165_v43, %v4634_v18  ;;  %v5084_v29 = vld [vmem:[%s9062_s4 + $0x34] sm:$0xf]  ;;  %vm930_vm0 = vmor %vm928_vm13, %vm929_vm1 }
 0x1b9   : > { %v5327_v11 = vpop.eup %5326  ;;  %v926_v32 = vmul.f32 %v6381_v0, %v925_v58  ;;  %v916_v36 = vsel %vm6438_vm9, %v6364_v63, %v912_v23  ;;  %v949_v17 = vand.u32 2147483648, %v6344_v56  ;;  %v4327_v10 = vor.u32 %v5086_v6, %v4324_v54  ;;  %v5412_v23 = vld [vmem:[%s5553_s24 + $0x70] sm:$0xff] }
 0x1ba   : > { %v939_v7 = vmul.f32 %v5327_v11, %v6344_v56  ;;  %2027 = vmatpush.bf16.msrb.mxu2 %v4571_v40  ;;  %v921_v34 = vsel %vm6383_vm14, %v920_v13, %v916_v36  ;;  %v1059_v63 = vrot.slane %v6452_v4, 7  ;;  %2056 = vmatpush.bf16.msrb.mxu3 %v4635_v59  ;;  %v4391_v18 = vor.u32 %v5102_v30, %v4388_v9  ;;  %v644_v13 = vld [vmem:[#allocation1 + $0x7] ss:$9 sm:$0xff] }
 0x1bb   : > { %v927_v15 = vadd.f32 %v6381_v0, %v926_v32  ;;  %v6483_v43 = vmul.f32 %v921_v34, %v6034_v8  ;;  %2084 = vmatpush.bf16.msrb.mxu0 %v4327_v10  ;;  %v4563_v6 = vor.u32 %v5147_v62, %v4562_v19  ;;  %v4627_v55 = vor.u32 %v5163_v3, %v4626_v27 }
 0x1bc   : > { %v940_v5 = vsub.f32 1.0, %v939_v7  ;;  %v947_v58 = vand.u32 2147483647, %v6344_v56  ;;  %v1060_v49 = vsel %vm618_vm11, %v1055_v48, %v1059_v63  ;;  %2113 = vmatpush.bf16.msrb.mxu1 %v4391_v18  ;;  %v4319_v35 = vor.u32 %v5084_v29, %v4316_v44 }
 0x1bd   : > { %v931_v39 = vsel %vm930_vm0, %v6381_v0, %v927_v15  ;;  %vm944_vm3 = vweird.f32 %v5327_v11  ;;  %v1061_v30 = vrot.slane %v6483_v43, 7  ;;  %v950_v24 = vor.u32 1.1754944e-38, %v949_v17 }
 0x1be   : > { %v936_v54 = vsel %vm6412_vm8, %v935_v53, %v931_v39  ;;  %v941_v8 = vmul.f32 %v5327_v11, %v940_v5  ;;  %2028 = vmatpush.bf16.msrb.mxu2 %v4563_v6  ;;  %2057 = vmatpush.bf16.msrb.mxu3 %v4627_v55  ;;  %v675_v12 = vmul.f32 %v5412_v23, %v5971_v31  ;;  %v683_v48 = vperm.slane %v644_v13, 0  ;;  %vm945_vm4 = vmor %vm943_vm5, %vm944_vm3  ;;  %v5413_v31 = vld [vmem:[%s5553_s24 + $0x78] sm:$0xff]  ;;  %v5100_v23 = vld [vmem:[%s9062_s4 + $0xb4] sm:$0xf] }
 0x1bf   : > { %v6494_v0 = vmul.f32 %v936_v54, %v6044_v14  ;;  %v1194_v1 = vpack.c.bf16 %v6483_v43, %v6452_v4  ;;  %v1062_v53 = vsel %vm618_vm11, %v1057_v37, %v1061_v30  ;;  %v1154_v9 = vsel %vm9078_vm2, %v1060_v49, 0.0  ;;  %2085 = vmatpush.bf16.msrb.mxu0 %v4319_v35 }
 0x1c0   : > { %v942_v40 = vadd.f32 %v5327_v11, %v941_v8  ;;  %v1155_v14 = vsel %vm9078_vm2, %v1062_v53, 0.0  ;;  %v676_v19 = vmul.f32 %v5413_v31, %v6167_v26  ;;  %v684_v32 = vperm.slane %v644_v13, 1 }
 0x1c1   : > { %v6512_v59 = vadd.f32 %v683_v48, %v6336_v51  ;;  %vm948_vm6 = vcmp.eq.f32.partialorder %v947_v58, 8.507059e+37  ;;  %v9075_v37 = vrot.slane %v6494_v0, 7  ;;  %v6515_v27 = vadd.f32 %v683_v48, %v675_v12  ;;  %v4380_v12 = vld [vmem:[%s9062_s4 + $0xb8] sm:$0xf0] }
 0x1c2   : > { %v946_v62 = vsel %vm945_vm4, %v5327_v11, %v942_v40  ;;  %v1186_v36 = vpack.c.bf16 %v1155_v14, %v1154_v9  ;;  %v6518_v56 = vadd.f32 %v684_v32, %v6340_v20  ;;  %v6520_v7 = vadd.f32 %v684_v32, %v676_v19 }
 0x1c3   : > { %v951_v3 = vsel %vm948_vm6, %v950_v24, %v946_v62  ;;  %v1262_v26 = vunpack.c.l.b16 %v1194_v1  ;;  %v4284_v51 = vmul.f32 -1.442695, %v6512_v59  ;;  %v1263_v10 = vunpack.c.h.b16 %v1194_v1 }
 0x1c4   : > { %v6523_v17 = vmul.f32 %v951_v3, %v6241_v61  ;;  %v4285_v11 = vmul.f32 -1.442695, %v6518_v56  ;;  %v4286_v29 = vmul.f32 -1.442695, %v6515_v27  ;;  %v4287_v44 = vmul.f32 -1.442695, %v6520_v7 }
 0x1c5   : > { %v1064_v20 = vsel %vm618_vm11, %v1059_v63, %v9075_v37  ;;  %5328 = vpow2.f32 %v4284_v51  ;;  %v1222_v15 = vunpack.c.l.b16 %v1186_v36  ;;  %v1094_v18 = vrot.slane %v6107_v47, 1 }
 0x1c6   : > { %v1195_v34 = vpack.c.bf16 %v6523_v17, %v6494_v0  ;;  %v9074_v61 = vrot.slane %v6523_v17, 7  ;;  %5330 = vpow2.f32 %v4285_v11  ;;  %v1095_v5 = vrot.slane %v6122_v45, 1  ;;  %v4554_v11 = vld [vmem:[%s9062_s4 + $0x210] sm:$0xf] }
 0x1c7   : > { %5332 = vpow2.f32 %v4286_v29  ;;  %v1223_v58 = vunpack.c.h.b16 %v1186_v36  ;;  %vm1093_vm10 = vcmask 1046528   ;;  %v1097_v47 = vrot.slane %v6114_v16, 1 }
 0x1c8   : > { %v1264_v6 = vunpack.c.l.b16 %v1195_v34  ;;  %v1265_v55 = vunpack.c.h.b16 %v1195_v34  ;;  %v1066_v13 = vsel %vm618_vm11, %v1061_v30, %v9074_v61  ;;  %5334 = vpow2.f32 %v4287_v44  ;;  %v5145_v44 = vld [vmem:[%s9062_s4 + $0x214] sm:$0xf0]  ;;  %v5082_v34 = vld [vmem:[%s9062_s4 + $0x24] sm:$0xf] }
 0x1c9   : > { %v1187_v39 = vpack.c.bf16 %v1066_v13, %v1064_v20  ;;  %v1096_v35 = vsel %vm1093_vm10, %v1094_v18, %v1095_v5  ;;  %v1098_v8 = vrot.slane %v6129_v38, 1  ;;  %v9076_v24 = vrot.slane %v6245_v21, 1  ;;  %v5098_v18 = vld [vmem:[%s9062_s4 + $0xa4] sm:$0xf]  ;;  %v4372_v13 = vld [vmem:[%s9062_s4 + $0xa8] sm:$0xf0] }
 0x1ca   : > { %v6540_v63 = vpack.c.b16 %v1264_v6, %v1262_v26  ;;  %v6542_v49 = vpack.c.b16 %v1265_v55, %v1263_v10  ;;  %v6557_v16 = vadd.s32 8, %v6018_v2  ;;  %v9073_v38 = vrot.slane %v6280_v50, 1 }
 0x1cb   : > { %v1224_v45 = vunpack.c.l.b16 %v1187_v39  ;;  %v1225_v54 = vunpack.c.h.b16 %v1187_v39  ;;  %v5329_v30 = vpop.eup %5328  ;;  %v4383_v9 = vor.u32 %v5100_v23, %v4380_v12  ;;  %v1099_v19 = vsel %vm1093_vm10, %v1097_v47, %v1098_v8  ;;  %v5161_v12 = vld [vmem:[%s9062_s4 + $0x294] sm:$0xf0] }
 0x1cc   : > { %9109 = vst [vmem:[#allocation2_spill] sm:$0xff] %v6542_v49  ;;  %1983 = vmatmul.bf16.gmra.mxu0 %v6540_v63  ;;  %2012 = vmatmul.bf16.gmra.mxu1 %v6542_v49  ;;  %v5331_v48 = vpop.eup %5330  ;;  %v6564_v53 = vadd.f32 1.0, %v5329_v30  ;;  %v6572_v32 = vsel %vm1093_vm10, %v1095_v5, %v9076_v24  ;;  %v6577_v62 = vsel %vm1093_vm10, %v1098_v8, %v9073_v38  ;;  %vm9081_vm12 = vcmp.ne.s32.totalorder %v6557_v16, 15  ;;  %v5143_v38 = vld [vmem:[%s9062_s4 + $0x204] sm:$0xf0] }
 0x1cd   : > { %v6560_v40 = vpack.c.b16 %v1224_v45, %v1222_v15  ;;  %v6562_v1 = vpack.c.b16 %v1225_v54, %v1223_v58  ;;  %v5333_v14 = vpop.eup %5332  ;;  %v6566_v31 = vadd.f32 1.0, %v5331_v48  ;;  %2114 = vmatpush.bf16.msrb.mxu1 %v4383_v9  ;;  %v4308_v15 = vld [vmem:[%s9062_s4 + $0x28] sm:$0xf0]  ;;  %v4618_v45 = vld [vmem:[%s9062_s4 + $0x290] sm:$0xf]  ;;  %v4555_v8 = vor.u32 %v5145_v44, %v4554_v11 }
 0x1ce   : > { %v5335_v3 = vpop.eup %5334  ;;  %v6581_v36 = vadd.f32 1.0, %v5333_v14  ;;  %5336 = vrcp.f32 %v6564_v53  ;;  %v962_v51 = vand.u32 2147483647, %v6564_v53  ;;  %v964_v10 = vand.u32 2147483648, %v6564_v53  ;;  %v5080_v48 = vld [vmem:[%s9062_s4 + $0x14] sm:$0xf] }
 0x1cf   : > { %1925 = vmatmul.bf16.gmra.mxu2 %v6560_v40  ;;  %1954 = vmatmul.bf16.gmra.mxu3 %v6562_v1  ;;  %v6584_v26 = vadd.f32 1.0, %v5335_v3  ;;  %5338 = vrcp.f32 %v6566_v31  ;;  %v979_v29 = vand.u32 2147483648, %v6566_v31  ;;  %v977_v6 = vand.u32 2147483647, %v6566_v31  ;;  %v4300_v9 = vld [vmem:[%s9062_s4 + $0x18] sm:$0xf0] }
 0x1d0   : > { %5340 = vrcp.f32 %v6581_v36  ;;  %v994_v20 = vand.u32 2147483648, %v6581_v36  ;;  %v992_v55 = vand.u32 2147483647, %v6581_v36  ;;  %vm958_vm13 = vweird.f32 %v6564_v53  ;;  %2029 = vmatpush.bf16.msrb.mxu2 %v4555_v8  ;;  %v5078_v8 = vld [vmem:[%s9062_s4 + $0x4] sm:$0xf] }
 0x1d1   : > { %5342 = vrcp.f32 %v6584_v26  ;;  %v6616_v39 = vor.u32 1.1754944e-38, %v964_v10  ;;  %v6618_v58 = vor.u32 1.1754944e-38, %v979_v29  ;;  %v1007_v47 = vand.u32 2147483647, %v6584_v26 }
 0x1d2   : > { %vm973_vm14 = vweird.f32 %v6566_v31  ;;  %v4311_v30 = vor.u32 %v5082_v34, %v4308_v15  ;;  %v4375_v23 = vor.u32 %v5098_v18, %v4372_v13  ;;  %v6636_v14 = vpack.c.bf16 %v1099_v19, %v1096_v35  ;;  %v5096_v35 = vld [vmem:[%s9062_s4 + $0x94] sm:$0xf]  ;;  %v4364_v19 = vld [vmem:[%s9062_s4 + $0x98] sm:$0xf0]  ;;  %v4546_v13 = vld [vmem:[%s9062_s4 + $0x200] sm:$0xf] }
 0x1d3   : > { %vm6643_vm7 = vcmp.eq.f32.partialorder %v962_v51, 8.507059e+37  ;;  %vm988_vm8 = vweird.f32 %v6581_v36  ;;  %v6648_v29 = vor.u32 1.1754944e-38, %v994_v20  ;;  %v1009_v44 = vand.u32 2147483648, %v6584_v26 }
 0x1d4   : > { %v6624_v54 = vpop.eup %5336  ;;  %vm6662_vm1 = vcmp.eq.f32.partialorder %v977_v6, 8.507059e+37  ;;  %2086 = vmatpush.bf16.msrb.mxu0 %v4311_v30  ;;  %v4619_v15 = vor.u32 %v5161_v12, %v4618_v45  ;;  %v4303_v18 = vor.u32 %v5080_v48, %v4300_v9  ;;  %vm6675_vm0 = vcmp.eq.f32.partialorder %v992_v55, 8.507059e+37  ;;  %2115 = vmatpush.bf16.msrb.mxu1 %v4375_v23  ;;  %v4292_v30 = vld [vmem:[%s9062_s4 + $0x8] sm:$0xf0] }
 0x1d5   : > { %v6638_v3 = vpop.eup %5338  ;;  %v954_v10 = vmul.f32 %v6624_v54, %v6564_v53  ;;  %vm959_vm15 = vweird.f32 %v6624_v54  ;;  %vm1003_vm3 = vweird.f32 %v6584_v26  ;;  %v4367_v45 = vor.u32 %v5096_v35, %v4364_v19  ;;  %v4356_v23 = vld [vmem:[%s9062_s4 + $0x88] sm:$0xf0] }
 0x1d6   : > { %v6657_v34 = vpop.eup %5340  ;;  %v969_v51 = vmul.f32 %v6638_v3, %v6566_v31  ;;  %vm974_vm9 = vweird.f32 %v6638_v3  ;;  %2058 = vmatpush.bf16.msrb.mxu3 %v4619_v15  ;;  %v4547_v55 = vor.u32 %v5143_v38, %v4546_v13  ;;  %v4295_v9 = vor.u32 %v5078_v8, %v4292_v30  ;;  %v4610_v15 = vld [vmem:[%s9062_s4 + $0x280] sm:$0xf]  ;;  %vm960_vm2 = vmor %vm958_vm13, %vm959_vm15 }
 0x1d7   : > { %v955_v61 = vsub.f32 1.0, %v954_v10  ;;  %v984_v37 = vmul.f32 %v6657_v34, %v6581_v36  ;;  %vm989_vm5 = vweird.f32 %v6657_v34  ;;  %v6686_v12 = vpop.eup %5342  ;;  %v5094_v10 = vld [vmem:[%s9062_s4 + $0x84] sm:$0xf]  ;;  %v1168_v35 = vsel %vm9081_vm12, %v6572_v32, 0.0  ;;  %v5159_v32 = vld [vmem:[%s9062_s4 + $0x284] sm:$0xf0]  ;;  %vm975_vm13 = vmor %vm973_vm14, %vm974_vm9 }
 0x1d8   : > { %v970_v48 = vsub.f32 1.0, %v969_v51  ;;  %v999_v51 = vmul.f32 %v6686_v12, %v6584_v26  ;;  %vm1004_vm4 = vweird.f32 %v6686_v12  ;;  %vm6701_vm6 = vcmp.eq.f32.partialorder %v1007_v47, 8.507059e+37  ;;  %2087 = vmatpush.bf16.msrb.mxu0 %v4303_v18  ;;  %2030 = vmatpush.bf16.msrb.mxu2 %v4547_v55 }
 0x1d9   : > { %v956_v19 = vmul.f32 %v6624_v54, %v955_v61  ;;  %v985_v24 = vsub.f32 1.0, %v984_v37  ;;  %v4359_v37 = vor.u32 %v5094_v10, %v4356_v23  ;;  %v4611_v13 = vor.u32 %v5159_v32, %v4610_v15  ;;  %2116 = vmatpush.bf16.msrb.mxu1 %v4367_v45  ;;  %vm1005_vm14 = vmor %vm1003_vm3, %vm1004_vm4 }
 0x1da   : > { %v971_v61 = vmul.f32 %v6638_v3, %v970_v48  ;;  %v1169_v47 = vsel %vm9081_vm12, %v6577_v62, 0.0  ;;  %v1000_v5 = vsub.f32 1.0, %v999_v51  ;;  %v1294_v48 = vunpack.c.l.b16 %v6636_v14 }
 0x1db   : > { %v957_v8 = vadd.f32 %v6624_v54, %v956_v19  ;;  %v986_v30 = vmul.f32 %v6657_v34, %v985_v24  ;;  %v1199_v49 = vpack.c.bf16 %v1169_v47, %v1168_v35  ;;  %2059 = vmatpush.bf16.msrb.mxu3 %v4611_v13  ;;  %v1295_v55 = vunpack.c.h.b16 %v6636_v14  ;;  %v5124_v19 = vld [vmem:[%s9062_s4 + $0x174] sm:$0xf]  ;;  %v5138_v13 = vld [vmem:[%s9062_s4 + $0x1e4] sm:$0xf] }
 0x1dc   : > { %v972_v18 = vadd.f32 %v6638_v3, %v971_v61  ;;  %v9118_v62 = vrot.slane %v6320_v25, 1  ;;  %v9119_v10 = vrot.slane %v6245_v21, 1  ;;  %v1001_v23 = vmul.f32 %v6686_v12, %v1000_v5  ;;  %2088 = vmatpush.bf16.msrb.mxu0 %v4295_v9  ;;  %v4476_v5 = vld [vmem:[%s9062_s4 + $0x178] sm:$0xf0]  ;;  %v5122_v9 = vld [vmem:[%s9062_s4 + $0x164] sm:$0xf] }
 0x1dd   : > { %v961_v45 = vsel %vm960_vm2, %v6624_v54, %v957_v8  ;;  %v987_v53 = vadd.f32 %v6657_v34, %v986_v30  ;;  %v1296_v35 = vunpack.c.l.b16 %v1199_v49  ;;  %vm990_vm2 = vmor %vm988_vm8, %vm989_vm5  ;;  %v1010_v54 = vor.u32 1.1754944e-38, %v1009_v44  ;;  %2117 = vmatpush.bf16.msrb.mxu1 %v4359_v37  ;;  %v4540_v44 = vld [vmem:[%s9062_s4 + $0x1f8] sm:$0xf0] }
 0x1de   : > { %v6729_v24 = vsel %vm1093_vm10, %v9119_v10, %v9118_v62  ;;  %v966_v14 = vsel %vm6643_vm7, %v6616_v39, %v961_v45  ;;  %v976_v21 = vsel %vm975_vm13, %v6638_v3, %v972_v18  ;;  %v1297_v31 = vunpack.c.h.b16 %v1199_v49  ;;  %v5140_v49 = vld [vmem:[%s9062_s4 + $0x1f4] sm:$0xf] }
 0x1df   : > { %v981_v39 = vsel %vm6662_vm1, %v6618_v58, %v976_v21  ;;  %v991_v3 = vsel %vm990_vm2, %v6657_v34, %v987_v53  ;;  %v1002_v36 = vadd.f32 %v6686_v12, %v1001_v23  ;;  %v6758_v11 = vmul.f32 %v966_v14, %v6512_v59  ;;  %v5156_v18 = vld [vmem:[%s9062_s4 + $0x274] sm:$0xf] }
 0x1e0   : > { %v996_v58 = vsel %vm6675_vm0, %v6648_v29, %v991_v3  ;;  %v6774_v59 = vmul.f32 %v981_v39, %v6518_v56  ;;  %v6776_v34 = vpack.c.b16 %v1296_v35, %v1294_v48  ;;  %v6778_v20 = vpack.c.b16 %v1297_v31, %v1295_v55  ;;  %v4468_v29 = vld [vmem:[%s9062_s4 + $0x168] sm:$0xf0]  ;;  %v4604_v48 = vld [vmem:[%s9062_s4 + $0x278] sm:$0xf0] }
 0x1e1   : > { %v1006_v6 = vsel %vm1005_vm14, %v6686_v12, %v1002_v36  ;;  %v6788_v26 = vmul.f32 %v996_v58, %v6515_v27  ;;  %v1067_v56 = vrot.slane %v6758_v11, 7  ;;  %v4479_v51 = vor.u32 %v5124_v19, %v4476_v5  ;;  %v4532_v27 = vld [vmem:[%s9062_s4 + $0x1e8] sm:$0xf0] }
 0x1e2   : > { %v1011_v15 = vsel %vm6701_vm6, %v1010_v54, %v1006_v6  ;;  %v1196_v32 = vpack.c.bf16 %v6774_v59, %v6758_v11  ;;  %v1069_v61 = vrot.slane %v6774_v59, 7  ;;  %v4543_v37 = vor.u32 %v5140_v49, %v4540_v44 }
 0x1e3   : > { %v6803_v12 = vmul.f32 %v1011_v15, %v6520_v7  ;;  %v9120_v38 = vrot.slane %v6494_v0, 7  ;;  %v1071_v8 = vrot.slane %v6788_v26, 7  ;;  %2139 = vmatpush.bf16.msra.mxu2 %v4479_v51  ;;  %v4471_v30 = vor.u32 %v5122_v9, %v4468_v29 }
 0x1e4   : > { %v1266_v55 = vunpack.c.l.b16 %v1196_v32  ;;  %v1267_v62 = vunpack.c.h.b16 %v1196_v32  ;;  %v9121_v7 = vrot.slane %v6523_v17, 7  ;;  %vm9122_vm15 = vcmp.ne.s32.totalorder %v6018_v2, 0  ;;  %2168 = vmatpush.bf16.msra.mxu3 %v4543_v37 }
 0x1e5   : > { %v1068_v47 = vsel %vm618_vm11, %v9120_v38, %v1067_v56  ;;  %v1197_v53 = vpack.c.bf16 %v6803_v12, %v6788_v26  ;;  %v1072_v23 = vsel %vm618_vm11, %v1067_v56, %v1071_v8  ;;  %v1073_v35 = vrot.slane %v6803_v12, 7  ;;  %vm9123_vm7 = vmmov %vm9122_vm15 }
 0x1e6   : > { %v1070_v10 = vsel %vm618_vm11, %v9121_v7, %v1069_v61  ;;  %v1158_v45 = vsel %vm9122_vm15, %v1068_v47, 0.0  ;;  %v4535_v54 = vor.u32 %v5138_v13, %v4532_v27  ;;  %v4607_v31 = vor.u32 %v5156_v18, %v4604_v48 }
 0x1e7   : > { %v1159_v14 = vsel %vm9123_vm7, %v1070_v10, 0.0  ;;  %v1106_v19 = vrot.slane %v6330_v42, 1  ;;  %v1268_v5 = vunpack.c.l.b16 %v1197_v53  ;;  %v1269_v39 = vunpack.c.h.b16 %v1197_v53  ;;  %2140 = vmatpush.bf16.msra.mxu2 %v4471_v30 }
 0x1e8   : > { %v1188_v21 = vpack.c.bf16 %v1159_v14, %v1158_v45  ;;  %v1074_v3 = vsel %vm618_vm11, %v1069_v61, %v1073_v35  ;;  %v1108_v36 = vrot.slane %v6452_v4, 1  ;;  %2169 = vmatpush.bf16.msra.mxu3 %v4535_v54  ;;  %2197 = vmatpush.bf16.msra.mxu0 %v4607_v31  ;;  %v9124_v9 = vrot.slane %v6280_v50, 1  ;;  %v5172_v50 = vld [vmem:[%s9062_s4 + $0x2f4] sm:$0xf]  ;;  %v5154_v35 = vld [vmem:[%s9062_s4 + $0x264] sm:$0xf] }
 0x1e9   : > { %v1189_v49 = vpack.c.bf16 %v1074_v3, %v1072_v23  ;;  %v6832_v6 = vpack.c.b16 %v1268_v5, %v1266_v55  ;;  %v6834_v56 = vpack.c.b16 %v1269_v39, %v1267_v62  ;;  %v9125_v42 = vrot.slane %v6320_v25, 1  ;;  %v4668_v25 = vld [vmem:[%s9062_s4 + $0x2f8] sm:$0xf0]  ;;  %v5136_v62 = vld [vmem:[%s9062_s4 + $0x1d4] sm:$0xf] }
 0x1ea   : > { %v1226_v44 = vunpack.c.l.b16 %v1188_v21  ;;  %v1227_v58 = vunpack.c.h.b16 %v1188_v21  ;;  %v1107_v29 = vsel %vm1093_vm10, %v9124_v9, %v1106_v19  ;;  %v1110_v15 = vrot.slane %v6483_v43, 1  ;;  %v4524_v23 = vld [vmem:[%s9062_s4 + $0x1d8] sm:$0xf0]  ;;  %v4596_v14 = vld [vmem:[%s9062_s4 + $0x268] sm:$0xf0] }
 0x1eb   : > { %v1109_v51 = vsel %vm1093_vm10, %v9125_v42, %v1108_v36  ;;  %v1228_v4 = vunpack.c.l.b16 %v1189_v49  ;;  %v1229_v32 = vunpack.c.h.b16 %v1189_v49  ;;  %v1200_v37 = vpack.c.bf16 %v1107_v29, %v6729_v24  ;;  %1988 = vmatmul.bf16.gmra.mxu0 %v6832_v6  ;;  %2017 = vmatmul.bf16.gmra.mxu1 %v6834_v56  ;;  %v4660_v5 = vld [vmem:[%s9062_s4 + $0x2e8] sm:$0xf0]  ;;  %v5118_v39 = vld [vmem:[%s9062_s4 + $0x144] sm:$0xf] }
 0x1ec   : > { %v1172_v61 = vsel %vm9081_vm12, %v1109_v51, 0.0  ;;  %v1111_v43 = vsel %vm1093_vm10, %v1106_v19, %v1110_v15  ;;  %v1112_v13 = vrot.slane %v6494_v0, 1  ;;  %v1114_v27 = vrot.slane %v6523_v17, 1  ;;  %v5120_v0 = vld [vmem:[%s9062_s4 + $0x154] sm:$0xf] }
 0x1ed   : > { %v6854_v38 = vpack.c.b16 %v1228_v4, %v1226_v44  ;;  %v6856_v24 = vpack.c.b16 %v1229_v32, %v1227_v58  ;;  %v4671_v47 = vor.u32 %v5172_v50, %v4668_v25  ;;  %v1173_v8 = vsel %vm9081_vm12, %v1111_v43, 0.0  ;;  %v4460_v17 = vld [vmem:[%s9062_s4 + $0x158] sm:$0xf0]  ;;  %v5170_v19 = vld [vmem:[%s9062_s4 + $0x2e4] sm:$0xf] }
 0x1ee   : > { %v1201_v30 = vpack.c.bf16 %v1173_v8, %v1172_v61  ;;  %v1298_v18 = vunpack.c.l.b16 %v1200_v37  ;;  %v1299_v48 = vunpack.c.h.b16 %v1200_v37  ;;  %v1113_v55 = vsel %vm1093_vm10, %v1108_v36, %v1112_v13  ;;  %v4452_v44 = vld [vmem:[%s9062_s4 + $0x148] sm:$0xf0]  ;;  %v5134_v58 = vld [vmem:[%s9062_s4 + $0x1c4] sm:$0xf]  ;;  %v5152_v51 = vld [vmem:[%s9062_s4 + $0x254] sm:$0xf] }
 0x1ef   : > { %1930 = vmatmul.bf16.gmra.mxu2 %v6854_v38  ;;  %1959 = vmatmul.bf16.gmra.mxu3 %v6856_v24  ;;  %v1115_v7 = vsel %vm1093_vm10, %v1110_v15, %v1114_v27  ;;  %v4463_v53 = vor.u32 %v5120_v0, %v4460_v17  ;;  %v4527_v54 = vor.u32 %v5136_v62, %v4524_v23  ;;  %v4516_v9 = vld [vmem:[%s9062_s4 + $0x1c8] sm:$0xf0]  ;;  %v4588_v15 = vld [vmem:[%s9062_s4 + $0x258] sm:$0xf0]  ;;  %v1116_v4 = vrot.slane %v6758_v11, 1 }
 0x1f0   : > { %2226 = vmatpush.bf16.msra.mxu1 %v4671_v47  ;;  %v1300_v10 = vunpack.c.l.b16 %v1201_v30  ;;  %v1301_v45 = vunpack.c.h.b16 %v1201_v30  ;;  %v1202_v21 = vpack.c.bf16 %v1115_v7, %v1113_v55  ;;  %v4599_v31 = vor.u32 %v5154_v35, %v4596_v14  ;;  %v5168_v14 = vld [vmem:[%s9062_s4 + $0x2d4] sm:$0xf] }
 0x1f1   : > { %2141 = vmatpush.bf16.msra.mxu2 %v4463_v53  ;;  %v4663_v49 = vor.u32 %v5170_v19, %v4660_v5  ;;  %2170 = vmatpush.bf16.msra.mxu3 %v4527_v54  ;;  %v4455_v29 = vor.u32 %v5118_v39, %v4452_v44  ;;  %v4519_v42 = vor.u32 %v5134_v58, %v4516_v9  ;;  %v1118_v32 = vrot.slane %v6774_v59, 1  ;;  %v5132_v5 = vld [vmem:[%s9062_s4 + $0x1b4] sm:$0xf]  ;;  %v5150_v44 = vld [vmem:[%s9062_s4 + $0x244] sm:$0xf] }
 0x1f2   : > { %v6891_v3 = vpack.c.b16 %v1300_v10, %v1298_v18  ;;  %v6893_v36 = vpack.c.b16 %v1301_v45, %v1299_v48  ;;  %2198 = vmatpush.bf16.msra.mxu0 %v4599_v31  ;;  %v4591_v61 = vor.u32 %v5152_v51, %v4588_v15  ;;  %v1120_v37 = vrot.slane %v6788_v26, 1  ;;  %v4580_v58 = vld [vmem:[%s9062_s4 + $0x248] sm:$0xf0]  ;;  %v5114_v15 = vld [vmem:[%s9062_s4 + $0x124] sm:$0xf] }
 0x1f3   : > { %v1122_v50 = vrot.slane %v6803_v12, 1  ;;  %v1117_v25 = vsel %vm1093_vm10, %v1112_v13, %v1116_v4  ;;  %v1119_v43 = vsel %vm1093_vm10, %v1114_v27, %v1118_v32  ;;  %v1302_v47 = vunpack.c.l.b16 %v1202_v21  ;;  %v4644_v51 = vld [vmem:[%s9062_s4 + $0x2c8] sm:$0xf0] }
 0x1f4   : > { %2227 = vmatpush.bf16.msra.mxu1 %v4663_v49  ;;  %v1303_v8 = vunpack.c.h.b16 %v1202_v21  ;;  %v1176_v30 = vsel %vm9081_vm12, %v1117_v25, 0.0  ;;  %v1177_v11 = vsel %vm9081_vm12, %v1119_v43, 0.0  ;;  %v1121_v59 = vsel %vm1093_vm10, %v1116_v4, %v1120_v37  ;;  %v4652_v21 = vld [vmem:[%s9062_s4 + $0x2d8] sm:$0xf0]  ;;  %v5148_v43 = vld [vmem:[%s9062_s4 + $0x234] sm:$0xf] }
 0x1f5   : > { %2142 = vmatpush.bf16.msra.mxu2 %v4455_v29  ;;  %v1123_v18 = vsel %vm1093_vm10, %v1118_v32, %v1122_v50  ;;  %2171 = vmatpush.bf16.msra.mxu3 %v4519_v42  ;;  %v1203_v26 = vpack.c.bf16 %v1177_v11, %v1176_v30  ;;  %v1140_v12 = vsel %vm1093_vm10, %v1120_v37, 0.0  ;;  %v1141_v13 = vsel %vm1093_vm10, %v1122_v50, 0.0  ;;  %v4508_v49 = vld [vmem:[%s9062_s4 + $0x1b8] sm:$0xf0]  ;;  %v5166_v42 = vld [vmem:[%s9062_s4 + $0x2c4] sm:$0xf] }
 0x1f6   : > { %2199 = vmatpush.bf16.msra.mxu0 %v4591_v61  ;;  %v1204_v27 = vpack.c.bf16 %v1123_v18, %v1121_v59  ;;  %v1180_v48 = vsel %vm9081_vm12, %v1140_v12, 0.0  ;;  %v1181_v55 = vsel %vm9081_vm12, %v1141_v13, 0.0  ;;  %v4655_v54 = vor.u32 %v5168_v14, %v4652_v21  ;;  %v4436_v32 = vld [vmem:[%s9062_s4 + $0x128] sm:$0xf0]  ;;  %v5130_v61 = vld [vmem:[%s9062_s4 + $0x1a4] sm:$0xf] }
 0x1f7   : > { %v1304_v0 = vunpack.c.l.b16 %v1203_v26  ;;  %v1305_v17 = vunpack.c.h.b16 %v1203_v26  ;;  %v1205_v62 = vpack.c.bf16 %v1181_v55, %v1180_v48  ;;  %v4511_v9 = vor.u32 %v5132_v5, %v4508_v49  ;;  %v4500_v37 = vld [vmem:[%s9062_s4 + $0x1a8] sm:$0xf0]  ;;  %v5164_v30 = vld [vmem:[%s9062_s4 + $0x2b4] sm:$0xf]  ;;  %v4636_v11 = vld [vmem:[%s9062_s4 + $0x2b8] sm:$0xf0] }
 0x1f8   : > { %v1306_v7 = vunpack.c.l.b16 %v1204_v27  ;;  %v1307_v10 = vunpack.c.h.b16 %v1204_v27  ;;  %2228 = vmatpush.bf16.msra.mxu1 %v4655_v54  ;;  %v4583_v29 = vor.u32 %v5150_v44, %v4580_v58  ;;  %v4647_v4 = vor.u32 %v5166_v42, %v4644_v51  ;;  %v5112_v18 = vld [vmem:[%s9062_s4 + $0x114] sm:$0xf]  ;;  %v4564_v12 = vld [vmem:[%s9062_s4 + $0x228] sm:$0xf0]  ;;  %v5162_v13 = vld [vmem:[%s9062_s4 + $0x2a4] sm:$0xf] }
 0x1f9   : > { %v6928_v45 = vpack.c.b16 %v1304_v0, %v1302_v47  ;;  %v6930_v53 = vpack.c.b16 %v1305_v17, %v1303_v8  ;;  %v1308_v23 = vunpack.c.l.b16 %v1205_v62  ;;  %v1309_v35 = vunpack.c.h.b16 %v1205_v62  ;;  %2172 = vmatpush.bf16.msra.mxu3 %v4511_v9  ;;  %v4572_v47 = vld [vmem:[%s9062_s4 + $0x238] sm:$0xf0]  ;;  %v4628_v27 = vld [vmem:[%s9062_s4 + $0x2a8] sm:$0xf0]  ;;  %v5128_v0 = vld [vmem:[%s9062_s4 + $0x194] sm:$0xf] }
 0x1fa   : > { %2200 = vmatpush.bf16.msra.mxu0 %v4583_v29  ;;  %v4439_v50 = vor.u32 %v5114_v15, %v4436_v32  ;;  %v4503_v25 = vor.u32 %v5130_v61, %v4500_v37  ;;  %v4575_v8 = vor.u32 %v5148_v43, %v4572_v47  ;;  %v4639_v59 = vor.u32 %v5164_v30, %v4636_v11  ;;  %v4492_v17 = vld [vmem:[%s9062_s4 + $0x198] sm:$0xf0]  ;;  %v5144_v62 = vld [vmem:[%s9062_s4 + $0x214] sm:$0xf]  ;;  %v5110_v21 = vld [vmem:[%s9062_s4 + $0x104] sm:$0xf] }
 0x1fb   : > { %2089 = vmatmul.bf16.vlgmr.msrb.gmra.mxu0 %v6186_v33  ;;  %2118 = vmatmul.bf16.vlgmr.msrb.gmra.mxu1 %v6188_v46  ;;  %v6940_v31 = vpack.c.b16 %v1308_v23, %v1306_v7  ;;  %v6942_v19 = vpack.c.b16 %v1309_v35, %v1307_v10  ;;  %v5116_v33 = vld [vmem:[%s9062_s4 + $0x134] sm:$0xf]  ;;  %v4444_v46 = vld [vmem:[%s9062_s4 + $0x138] sm:$0xf0]  ;;  %v4631_v55 = vor.u32 %v5162_v13, %v4628_v27  ;;  %v4420_v54 = vld [vmem:[%s9062_s4 + $0x108] sm:$0xf0] }
 0x1fc   : > { %v4447_v39 = vor.u32 %v5116_v33, %v4444_v46  ;;  %2229 = vmatpush.bf16.msra.mxu1 %v4647_v4  ;;  %v4495_v7 = vor.u32 %v5128_v0, %v4492_v17  ;;  %v4556_v10 = vld [vmem:[%s9062_s4 + $0x218] sm:$0xf0]  ;;  %v5160_v23 = vld [vmem:[%s9062_s4 + $0x294] sm:$0xf]  ;;  %v4423_v46 = vor.u32 %v5110_v21, %v4420_v54  ;;  %v5142_v5 = vld [vmem:[%s9062_s4 + $0x204] sm:$0xf] }
 0x1fd   : > { %2173 = vmatpush.bf16.msra.mxu3 %v4503_v25  ;;  %v4620_v35 = vld [vmem:[%s9062_s4 + $0x298] sm:$0xf0]  ;;  %v4559_v14 = vor.u32 %v5144_v62, %v4556_v10  ;;  %v5126_v49 = vld [vmem:[%s9062_s4 + $0x184] sm:$0xf]  ;;  %v4484_v44 = vld [vmem:[%s9062_s4 + $0x188] sm:$0xf0] }
 0x1fe   : > { %2143 = vmatpush.bf16.msra.mxu2 %v4447_v39  ;;  %2201 = vmatpush.bf16.msra.mxu0 %v4575_v8  ;;  %v4623_v33 = vor.u32 %v5160_v23, %v4620_v35  ;;  %v4548_v39 = vld [vmem:[%s9062_s4 + $0x208] sm:$0xf0]  ;;  %v5158_v58 = vld [vmem:[%s9062_s4 + $0x284] sm:$0xf]  ;;  %v4487_v29 = vor.u32 %v5126_v49, %v4484_v44  ;;  %v5414_v51 = vld [vmem:[%s9060_s2 + $0x78] sm:$0xff]  ;;  %vm9127_vm8 = vcmask 1041409  }
 0x1ff   : > { %2031 = vmatmul.bf16.vlgmr.msrb.gmra.mxu2 %v6776_v34  ;;  %2060 = vmatmul.bf16.vlgmr.msrb.gmra.mxu3 %v6778_v20  ;;  %v4612_v9 = vld [vmem:[%s9062_s4 + $0x288] sm:$0xf0]  ;;  %v4551_v42 = vor.u32 %v5142_v5, %v4548_v39  ;;  %v5415_v4 = vld [vmem:[%s9060_s2 + $0x70] sm:$0xff]  ;;  %v5416_v32 = vld [vmem:[%s9060_s2 + $0xf8] sm:$0xff]  ;;  %vm9128_vm9 = vcmask 1045509   ;;  %vm9129_vm1 = vcmask 1042434  }
 0x200   : > { %2230 = vmatpush.bf16.msra.mxu1 %v4639_v59  ;;  %v4615_v15 = vor.u32 %v5158_v58, %v4612_v9  ;;  %v5417_v61 = vld [vmem:[%s9060_s2 + $0x68] sm:$0xff]  ;;  %v5418_v37 = vld [vmem:[%s9060_s2 + $0x60] sm:$0xff]  ;;  %v5422_v25 = vld [vmem:[%s9060_s2 + $0x50] sm:$0xff]  ;;  %vm9130_vm5 = vcmask 1046534   ;;  %vm9131_vm0 = vcmask 1043459   ;;  %vm9132_vm3 = vcmask 1047559  }
 0x201   : > { %2174 = vmatpush.bf16.msra.mxu3 %v4495_v7  ;;  %v5423_v43 = vld [vmem:[%s9060_s2 + $0xe0] sm:$0xff]  ;;  %v5424_v47 = vld [vmem:[%s9060_s2 + $0x48] sm:$0xff]  ;;  %v5425_v8 = vld [vmem:[%s9060_s2 + $0xd8] sm:$0xff]  ;;  %vm9133_vm4 = vcmask 1043456  }
 0x202   : > { %2144 = vmatpush.bf16.msra.mxu2 %v4439_v50  ;;  %v5419_v50 = vld [vmem:[%s9060_s2 + $0xf0] sm:$0xff]  ;;  %v5426_v30 = vld [vmem:[%s9060_s2 + $0x40] sm:$0xff]  ;;  %v5436_v17 = vld [vmem:[%s9060_s2 + $0x18] sm:$0xff] }
 0x203   : > { %v5427_v11 = vld [vmem:[%s9060_s2 + $0xd0] sm:$0xff]  ;;  %v5437_v62 = vld [vmem:[%s9060_s2 + $0xa8] sm:$0xff]  ;;  %v5439_v23 = vld [vmem:[%s9060_s2 + $0xa0] sm:$0xff] }
 0x204   : > { %2231 = vmatpush.bf16.msra.mxu1 %v4631_v55  ;;  %v5433_v55 = vld [vmem:[%s9060_s2 + $0xb8] sm:$0xff]  ;;  %v5438_v10 = vld [vmem:[%s9060_s2 + $0x10] sm:$0xff]  ;;  %v5444_v49 = vld [vmem:[%s9060_s2 + $0x88] sm:$0xff] }
 0x205   : > { %2175 = vmatpush.bf16.msra.mxu3 %v4487_v29  ;;  %v5441_v21 = vld [vmem:[%s9060_s2 + $0x98] sm:$0xff]  ;;  %v5443_v5 = vld [vmem:[%s9060_s2 + $0x90] sm:$0xff]  ;;  %v5445_v29 = vld [vmem:[%s9060_s2 + $0x80] sm:$0xff] }
 0x206   : > { %vm9134_vm6 = vmmov %vm9127_vm8 }
 0x207   : > { %vm9135_vm13 = vmmov %vm9128_vm9 }
 0x208   : > { %2232 = vmatpush.bf16.msra.mxu1 %v4623_v33  ;;  %v4268_v33 = vld [vmem:[%s9059_s1 + $0x4] ss:$8 sm:$0x3]  ;;  %vm9136_vm2 = vmmov %vm9129_vm1 }
 0x209   : > { %2437 = vmatpush.msrb.mxu3 %v5416_v32  ;;  %v7175_v39 = vperm.slane %v4268_v33, 0  ;;  %vm9137_vm14 = vmmov %vm9130_vm5 }
 0x20a   : > { %vm9138_vm15 = vmmov %vm9131_vm0 }
 0x20b   : > { %2094 = vmatmul.bf16.gmra.mxu0 %v6404_v28  ;;  %2123 = vmatmul.bf16.gmra.mxu1 %v6406_v57  ;;  %v4428_v28 = vld [vmem:[%s9062_s4 + $0x118] sm:$0xf0]  ;;  %v5146_v57 = vld [vmem:[%s9062_s4 + $0x224] sm:$0xf]  ;;  %vm9139_vm7 = vmmov %vm9132_vm3 }
 0x20c   : > { %v4431_v26 = vor.u32 %v5112_v18, %v4428_v28  ;;  %v4567_v48 = vor.u32 %v5146_v57, %v4564_v12  ;;  %2233 = vmatpush.bf16.msra.mxu1 %v4615_v15  ;;  %2438 = vmatpush.msrb.mxu3 %v5419_v50  ;;  %v5428_v18 = vld [vmem:[%s9060_s2 + $0x38] sm:$0xff]  ;;  %v5429_v28 = vld [vmem:[%s9060_s2 + $0xc8] sm:$0xff]  ;;  %v5431_v12 = vld [vmem:[%s9060_s2 + $0xc0] sm:$0xff] }
 0x20e   : > { %2145 = vmatpush.bf16.msra.mxu2 %v4431_v26  ;;  %2202 = vmatpush.bf16.msra.mxu0 %v4567_v48  ;;  %v5430_v26 = vld [vmem:[%s9060_s2 + $0x30] sm:$0xff]  ;;  %v5432_v48 = vld [vmem:[%s9060_s2 + $0x28] sm:$0xff] }
 0x20f   : > { %2036 = vmatmul.bf16.gmra.mxu2 %v6891_v3  ;;  %2065 = vmatmul.bf16.gmra.mxu3 %v6893_v36 }
 0x212   : > { %2146 = vmatpush.bf16.msra.mxu2 %v4423_v46  ;;  %2203 = vmatpush.bf16.msra.mxu0 %v4559_v14  ;;  %v5440_v14 = vld [vmem:[%s9060_s2 + $0x8] sm:$0xff]  ;;  %v5442_v46 = vld [vmem:[%s9060_s2] sm:$0xff] }
 0x215   : > { %v7120_v13 = vpop.f32.mrf.mxu0  ;;  %v7124_v27 = vpop.f32.mrf.mxu1 }
 0x216   : > { %2417 = vmatpush.msrb.mxu2 %v5414_v51  ;;  %2204 = vmatpush.bf16.msra.mxu0 %v4551_v42 }
 0x218   : > { %2418 = vmatpush.msrb.mxu2 %v5415_v4 }
 0x21a   : > { %2419 = vmatpush.msrb.mxu2 %v5417_v61 }
 0x21b   : > { %2099 = vmatmul.bf16.gmra.mxu0 %v6560_v40  ;;  %2128 = vmatmul.bf16.gmra.mxu1 %v6562_v1  ;;  %v5420_v40 = vld [vmem:[%s9060_s2 + $0x58] sm:$0xff]  ;;  %v5421_v1 = vld [vmem:[%s9060_s2 + $0xe8] sm:$0xff] }
 0x21c   : > { %2420 = vmatpush.msrb.mxu2 %v5418_v37  ;;  %2439 = vmatpush.msrb.mxu3 %v5421_v1 }
 0x21d   : > { %v7156_v35 = vpop.f32.mrf.mxu0  ;;  %v7164_v54 = vpop.f32.mrf.mxu1 }
 0x21e   : > { %2421 = vmatpush.msrb.mxu2 %v5420_v40  ;;  %2440 = vmatpush.msrb.mxu3 %v5423_v43  ;;  %v7104_v59 = vpop.f32.mrf.mxu2  ;;  %v7112_v57 = vpop.f32.mrf.mxu3 }
 0x21f   : > { %2041 = vmatmul.bf16.gmra.mxu2 %v6928_v45  ;;  %2070 = vmatmul.bf16.gmra.mxu3 %v6930_v53 }
 0x220   : > { %2422 = vmatpush.msrb.mxu2 %v5422_v25  ;;  %2441 = vmatpush.msrb.mxu3 %v5425_v8 }
 0x222   : > { %2423 = vmatpush.msrb.mxu2 %v5424_v47  ;;  %2442 = vmatpush.msrb.mxu3 %v5427_v11 }
 0x224   : > { %2424 = vmatpush.msrb.mxu2 %v5426_v30  ;;  %2443 = vmatpush.msrb.mxu3 %v5429_v28 }
 0x226   : > { %2425 = vmatpush.msrb.mxu2 %v5428_v18  ;;  %2444 = vmatpush.msrb.mxu3 %v5431_v12  ;;  %v7140_v0 = vpop.f32.mrf.mxu2  ;;  %v7148_v7 = vpop.f32.mrf.mxu3  ;;  %v7222_v12 = vperm.slane %v4268_v33, 1 }
 0x228   : > { %2426 = vmatpush.msrb.mxu2 %v5430_v26  ;;  %2445 = vmatpush.msrb.mxu3 %v5433_v55 }
 0x22a   : > { %2427 = vmatpush.msrb.mxu2 %v5432_v48 }
 0x22b   : > { %2104 = vmatmul.bf16.gmra.mxu0 %v6854_v38  ;;  %2133 = vmatmul.bf16.gmra.mxu1 %v6856_v24  ;;  %v5434_v38 = vld [vmem:[%s9060_s2 + $0x20] sm:$0xff]  ;;  %v5435_v24 = vld [vmem:[%s9060_s2 + $0xb0] sm:$0xff] }
 0x22c   : > { %2428 = vmatpush.msrb.mxu2 %v5434_v38  ;;  %2446 = vmatpush.msrb.mxu3 %v5435_v24 }
 0x22e   : > { %2429 = vmatpush.msrb.mxu2 %v5436_v17  ;;  %2447 = vmatpush.msrb.mxu3 %v5437_v62 }
 0x22f   : > { %2046 = vmatmul.bf16.gmra.mxu2 %v6940_v31  ;;  %2075 = vmatmul.bf16.gmra.mxu3 %v6942_v19 }
 0x230   : > { %2430 = vmatpush.msrb.mxu2 %v5438_v10  ;;  %2448 = vmatpush.msrb.mxu3 %v5439_v23 }
 0x231   : > { %v1979_v51 = vpop.f32.mrf.mxu0  ;;  %v2008_v4 = vpop.f32.mrf.mxu1 }
 0x232   : > { %2431 = vmatpush.msrb.mxu2 %v5440_v14  ;;  %2449 = vmatpush.msrb.mxu3 %v5441_v21 }
 0x234   : > { %2432 = vmatpush.msrb.mxu2 %v5442_v46  ;;  %2450 = vmatpush.msrb.mxu3 %v5443_v5 }
 0x236   : > { %2451 = vmatpush.msrb.mxu3 %v5444_v49 }
 0x238   : > { %2452 = vmatpush.msrb.mxu3 %v5445_v29 }
 0x239   : > { %v7196_v37 = vpop.f32.mrf.mxu0 }
 0x23a   : > { %v1921_v44 = vpop.f32.mrf.mxu2  ;;  %v1950_v9 = vpop.f32.mrf.mxu3 }
 0x23b   : > { %2205 = vmatmul.bf16.vlgmr.msra.gmra.mxu0 %v6776_v34  ;;  %2234 = vmatmul.bf16.vlgmr.msra.gmra.mxu1 %v6778_v20  ;;  %v1922_v58 = vadd.f32 %v1921_v44, %v7175_v39  ;;  %v5446_v34 = vld [vmem:[%s9061_s3] sm:$0xff]  ;;  %v5447_v20 = vld [vmem:[%s9061_s3 + $0x8] sm:$0xff] }
 0x23d   : > { %v1951_v42 = vadd.f32 %v1950_v9, %v1922_v58 }
 0x23f   : > { %2147 = vmatmul.bf16.vlgmr.msra.gmra.mxu2 %v6157_v52  ;;  %2176 = vmatmul.bf16.vlgmr.msra.gmra.mxu3 %v6159_v22  ;;  %v1980_v15 = vadd.f32 %v1979_v51, %v1951_v42  ;;  %v7198_v52 = vpop.f32.mrf.mxu1 }
 0x240   : > { %2502 = vmatpush.msra.mxu2 %v5446_v34  ;;  %2522 = vmatpush.msra.mxu3 %v5447_v20 }
 0x241   : > { %v2009_v38 = vadd.f32 %v2008_v4, %v1980_v15  ;;  %v1919_v15 = vadd.f32 %v7140_v0, %v7175_v39 }
 0x242   : > { %v1923_v32 = vpop.f32.mrf.mxu2  ;;  %v7194_v61 = vpop.f32.mrf.mxu3 }
 0x243   : > { %v1924_v51 = vadd.f32 %v1923_v32, %v7175_v39  ;;  %v1948_v32 = vadd.f32 %v7148_v7, %v1919_v15 }
 0x249   : > { %v1984_v1 = vpop.f32.mrf.mxu0  ;;  %v2013_v25 = vpop.f32.mrf.mxu1 }
 0x24b   : > { %2210 = vmatmul.bf16.gmra.mxu0 %v6891_v3  ;;  %2239 = vmatmul.bf16.gmra.mxu1 %v6893_v36  ;;  %v9126_v3 = vld [vmem:[#allocation2_spill] sm:$0xff] }
 0x24f   : > { %2152 = vmatmul.bf16.gmra.mxu2 %v6372_v60  ;;  %2181 = vmatmul.bf16.gmra.mxu3 %v6374_v41 }
 0x251   : > { %v7209_v36 = vpop.f32.mrf.mxu0  ;;  %v7211_v60 = vpop.f32.mrf.mxu1 }
 0x252   : > { %v1926_v22 = vpop.f32.mrf.mxu2  ;;  %v1955_v40 = vpop.f32.mrf.mxu3 }
 0x253   : > { %v1927_v50 = vadd.f32 %v1926_v22, %v7175_v39 }
 0x255   : > { %v1956_v43 = vadd.f32 %v1955_v40, %v1927_v50 }
 0x257   : > { %v1985_v47 = vadd.f32 %v1984_v1, %v1956_v43  ;;  %v1917_v1 = vadd.f32 %v7104_v59, %v7175_v39 }
 0x259   : > { %v2014_v33 = vadd.f32 %v2013_v25, %v1985_v47  ;;  %v1953_v25 = vadd.f32 %v7194_v61, %v1924_v51  ;;  %v1946_v0 = vadd.f32 %v7112_v57, %v1917_v1 }
 0x25a   : > { %v1928_v41 = vpop.f32.mrf.mxu2  ;;  %v1957_v8 = vpop.f32.mrf.mxu3 }
 0x25b   : > { %2215 = vmatmul.bf16.gmra.mxu0 %v6928_v45  ;;  %2244 = vmatmul.bf16.gmra.mxu1 %v6930_v53  ;;  %v1929_v47 = vadd.f32 %v1928_v41, %v7175_v39  ;;  %v1975_v61 = vadd.f32 %v7120_v13, %v1946_v0 }
 0x25f   : > { %2157 = vmatmul.bf16.gmra.mxu2 %v6540_v63  ;;  %2186 = vmatmul.bf16.gmra.mxu3 %v9126_v3  ;;  %v1982_v3 = vadd.f32 %v7196_v37, %v1953_v25  ;;  %v2004_v37 = vadd.f32 %v7124_v27, %v1975_v61 }
 0x268   : > { %v1989_v30 = vpop.f32.mrf.mxu0  ;;  %v2018_v11 = vpop.f32.mrf.mxu1 }
 0x26b   : > { %2220 = vmatmul.bf16.gmra.mxu0 %v6940_v31  ;;  %2249 = vmatmul.bf16.gmra.mxu1 %v6942_v19 }
 0x26f   : > { %2162 = vmatmul.bf16.gmra.mxu2 %v6832_v6  ;;  %2191 = vmatmul.bf16.gmra.mxu3 %v6834_v56 }
 0x270   : > { %v7217_v45 = vpop.f32.mrf.mxu0  ;;  %v7219_v63 = vpop.f32.mrf.mxu1 }
 0x272   : > { %v1931_v53 = vpop.f32.mrf.mxu2  ;;  %v1960_v18 = vpop.f32.mrf.mxu3 }
 0x273   : > { %v1932_v28 = vadd.f32 %v1931_v53, %v7175_v39 }
 0x275   : > { %v1961_v26 = vadd.f32 %v1960_v18, %v1932_v28 }
 0x277   : > { %v1990_v48 = vadd.f32 %v1989_v30, %v1961_v26  ;;  %v1977_v30 = vadd.f32 %v7156_v35, %v1948_v32  ;;  %v2011_v26 = vadd.f32 %v7198_v52, %v1982_v3 }
 0x278   : > { %v2090_v55 = vpop.f32.mrf.mxu0  ;;  %v2119_v31 = vpop.f32.mrf.mxu1 }
 0x279   : > { %v2091_v19 = vadd.f32 %v2090_v55, %v7222_v12  ;;  %v7243_v4 = vadd.f32 %v2018_v11, %v1990_v48  ;;  %v1958_v11 = vadd.f32 %v1957_v8, %v1929_v47  ;;  %v2006_v41 = vadd.f32 %v7164_v54, %v1977_v30 }
 0x27a   : > { %v1933_v6 = vpop.f32.mrf.mxu2  ;;  %v7225_v24 = vpop.f32.mrf.mxu3 }
 0x27b   : > { %v7227_v56 = vadd.f32 %v2119_v31, %v2091_v19  ;;  %v1987_v7 = vadd.f32 %v7209_v36, %v1958_v11 }
 0x280   : > { %v7229_v17 = vpop.f32.mrf.mxu0  ;;  %v7231_v62 = vpop.f32.mrf.mxu1 }
 0x282   : > { %v2032_v10 = vpop.f32.mrf.mxu2  ;;  %v2061_v23 = vpop.f32.mrf.mxu3 }
 0x283   : > { %v2033_v55 = vadd.f32 %v2032_v10, %v2004_v37  ;;  %v1934_v10 = vadd.f32 %v1933_v6, %v7175_v39 }
 0x285   : > { %v1963_v39 = vadd.f32 %v7225_v24, %v1934_v10 }
 0x287   : > { %v1992_v47 = vadd.f32 %v7217_v45, %v1963_v39 }
 0x288   : > { %v2095_v14 = vpop.f32.mrf.mxu0  ;;  %v2124_v21 = vpop.f32.mrf.mxu1 }
 0x289   : > { %v2096_v46 = vadd.f32 %v2095_v14, %v7222_v12  ;;  %v2021_v37 = vadd.f32 %v7219_v63, %v1992_v47 }
 0x28a   : > { %v2034_v5 = vpop.f32.mrf.mxu2  ;;  %v2063_v49 = vpop.f32.mrf.mxu3 }
 0x28b   : > { %v7234_v44 = vadd.f32 %v2124_v21, %v2096_v46  ;;  %v2035_v48 = vadd.f32 %v2034_v5, %v2006_v41  ;;  %v2016_v21 = vadd.f32 %v7211_v60, %v1987_v7 }
 0x28d   : > { %v7269_v36 = vadd.f32 %v2063_v49, %v2035_v48 }
 0x28f   : > { %v2313_v49 = vmul.f32 %v7269_v36, %v7269_v36 }
 0x290   : > { %v7236_v58 = vpop.f32.mrf.mxu0  ;;  %v7238_v9 = vpop.f32.mrf.mxu1 }
 0x292   : > { %v2037_v29 = vpop.f32.mrf.mxu2  ;;  %v2066_v42 = vpop.f32.mrf.mxu3 }
 0x293   : > { %v2038_v35 = vadd.f32 %v2037_v29, %v2009_v38 }
 0x295   : > { %v7271_v54 = vadd.f32 %v2066_v42, %v2038_v35 }
 0x297   : > { %v2315_v29 = vmul.f32 %v7271_v54, %v7271_v54 }
 0x298   : > { %v2100_v34 = vpop.f32.mrf.mxu0  ;;  %v2129_v20 = vpop.f32.mrf.mxu1 }
 0x299   : > { %v2101_v22 = vadd.f32 %v2100_v34, %v7222_v12 }
 0x29a   : > { %v2039_v50 = vpop.f32.mrf.mxu2  ;;  %v2068_v40 = vpop.f32.mrf.mxu3 }
 0x29b   : > { %v7249_v43 = vadd.f32 %v2129_v20, %v2101_v22  ;;  %v2040_v57 = vadd.f32 %v2039_v50, %v2011_v26 }
 0x29d   : > { %v7265_v31 = vadd.f32 %v2068_v40, %v2040_v57 }
 0x29f   : > { %v2317_v60 = vmul.f32 %v7265_v31, %v7265_v31 }
 0x2a0   : > { %v7256_v53 = vpop.f32.mrf.mxu0  ;;  %v7258_v18 = vpop.f32.mrf.mxu1 }
 0x2a1   : > { %v2341_v34 = vadd.f32 %v2317_v60, %v2315_v29 }
 0x2a2   : > { %v2042_v59 = vpop.f32.mrf.mxu2  ;;  %v2071_v28 = vpop.f32.mrf.mxu3 }
 0x2a3   : > { %v2043_v8 = vadd.f32 %v2042_v59, %v2014_v33  ;;  %v7278_v33 = vadd.f32 %v2061_v23, %v2033_v55  ;;  %v2269_v23 = vadd.f32 %v7265_v31, %v7271_v54  ;;  %v2342_v3 = vrot.slane %v2341_v34, 4 }
 0x2a5   : > { %v7273_v27 = vadd.f32 %v2071_v28, %v2043_v8  ;;  %v2311_v6 = vmul.f32 %v7278_v33, %v7278_v33  ;;  %v2255_v50 = vadd.f32 %v7269_v36, %v7278_v33  ;;  %v2270_v0 = vrot.slane %v2269_v23, 4 }
 0x2a6   : > { %v2343_v7 = vadd.f32 %v2342_v3, %v2341_v34 }
 0x2a7   : > { %v2319_v15 = vmul.f32 %v7273_v27, %v7273_v27  ;;  %v2327_v32 = vadd.f32 %v2313_v49, %v2311_v6  ;;  %v2256_v30 = vrot.slane %v2255_v50, 4  ;;  %v2271_v26 = vadd.f32 %v2270_v0, %v2269_v23 }
 0x2a8   : > { %v2105_v19 = vpop.f32.mrf.mxu0  ;;  %v2134_v14 = vpop.f32.mrf.mxu1 }
 0x2a9   : > { %v2106_v13 = vadd.f32 %v2105_v19, %v7222_v12  ;;  %v2328_v28 = vrot.slane %v2327_v32, 4  ;;  %v2257_v48 = vadd.f32 %v2256_v30, %v2255_v50 }
 0x2aa   : > { %v2044_v52 = vpop.f32.mrf.mxu2  ;;  %v2073_v46 = vpop.f32.mrf.mxu3 }
 0x2ab   : > { %v2045_v51 = vadd.f32 %v2044_v52, %v2016_v21  ;;  %v7275_v38 = vadd.f32 %v2134_v14, %v2106_v13  ;;  %v2329_v19 = vadd.f32 %v2328_v28, %v2327_v32  ;;  %v2272_v13 = vrot.slane %v2271_v26, 2 }
 0x2ac   : > { %v2344_v52 = vrot.slane %v2343_v7, 2 }
 0x2ad   : > { %v7282_v5 = vadd.f32 %v2073_v46, %v2045_v51  ;;  %v2258_v46 = vrot.slane %v2257_v48, 2  ;;  %v2330_v60 = vrot.slane %v2329_v19, 2 }
 0x2af   : > { %v2321_v42 = vmul.f32 %v7282_v5, %v7282_v5  ;;  %v2283_v40 = vadd.f32 %v7282_v5, %v7273_v27 }
 0x2b0   : > { %v7297_v20 = vpop.f32.mrf.mxu0  ;;  %v7299_v22 = vpop.f32.mrf.mxu1 }
 0x2b1   : > { %v2355_v1 = vadd.f32 %v2321_v42, %v2319_v15  ;;  %v2284_v11 = vrot.slane %v2283_v40, 4  ;;  %v2273_v42 = vadd.f32 %v2272_v13, %v2271_v26  ;;  %v2345_v15 = vadd.f32 %v2344_v52, %v2343_v7 }
 0x2b2   : > { %v2047_v25 = vpop.f32.mrf.mxu2  ;;  %v2076_v24 = vpop.f32.mrf.mxu3 }
 0x2b3   : > { %v2356_v59 = vrot.slane %v2355_v1, 4  ;;  %v2048_v61 = vadd.f32 %v2047_v25, %v7243_v4  ;;  %v2285_v35 = vadd.f32 %v2284_v11, %v2283_v40  ;;  %v2259_v25 = vadd.f32 %v2258_v46, %v2257_v48 }
 0x2b4   : > { %v2274_v3 = vrot.slane %v2273_v42, 1  ;;  %v2346_v30 = vrot.slane %v2345_v15, 1 }
 0x2b5   : > { %v2357_v8 = vadd.f32 %v2356_v59, %v2355_v1  ;;  %v7312_v14 = vadd.f32 %v2076_v24, %v2048_v61  ;;  %v2286_v51 = vrot.slane %v2285_v35, 2  ;;  %v2331_v24 = vadd.f32 %v2330_v60, %v2329_v19 }
 0x2b6   : > { %v2260_v26 = vrot.slane %v2259_v25, 1 }
 0x2b7   : > { %v2358_v10 = vrot.slane %v2357_v8, 2  ;;  %v2323_v63 = vmul.f32 %v7312_v14, %v7312_v14  ;;  %v2287_v34 = vadd.f32 %v2286_v51, %v2285_v35  ;;  %v2332_v7 = vrot.slane %v2331_v24, 1 }
 0x2b8   : > { %v7307_v41 = vpop.f32.mrf.mxu0  ;;  %v7309_v57 = vpop.f32.mrf.mxu1  ;;  %v2261_v46 = vadd.f32 %v2260_v26, %v2259_v25 }
 0x2b9   : > { %v2359_v50 = vadd.f32 %v2358_v10, %v2357_v8  ;;  %v2288_v28 = vrot.slane %v2287_v34, 1  ;;  %v2275_v8 = vadd.f32 %v2274_v3, %v2273_v42  ;;  %v2333_v51 = vadd.f32 %v2332_v7, %v2331_v24 }
 0x2ba   : > { %v2049_v45 = vpop.f32.mrf.mxu2  ;;  %v2078_v55 = vpop.f32.mrf.mxu3 }
 0x2bb   : > { %v2050_v21 = vadd.f32 %v2049_v45, %v2021_v37  ;;  %v2360_v61 = vrot.slane %v2359_v50, 1  ;;  %v2347_v45 = vadd.f32 %v2346_v30, %v2345_v15  ;;  %v2289_v48 = vadd.f32 %v2288_v28, %v2287_v34 }
 0x2bc   : > { %v2093_v28 = vadd.f32 %v7229_v17, %v7222_v12 }
 0x2bd   : > { %v7314_v4 = vadd.f32 %v2078_v55, %v2050_v21  ;;  %v2361_v19 = vadd.f32 %v2360_v61, %v2359_v50 }
 0x2be   : > { %v2122_v7 = vadd.f32 %v7231_v62, %v2093_v28 }
 0x2bf   : > { %v2297_v49 = vadd.f32 %v7314_v4, %v7312_v14  ;;  %v2325_v29 = vmul.f32 %v7314_v4, %v7314_v4 }
 0x2c0   : > { %v7322_v23 = vpop.f32.mrf.mxu0  ;;  %v7326_v0 = vpop.f32.mrf.mxu1 }
 0x2c1   : > { %v2298_v39 = vrot.slane %v2297_v49, 4  ;;  %v2369_v6 = vadd.f32 %v2325_v29, %v2323_v63 }
 0x2c2   : > { %v2148_v40 = vpop.f32.mrf.mxu2  ;;  %v7324_v1 = vpop.f32.mrf.mxu3 }
 0x2c3   : > { %v2299_v32 = vadd.f32 %v2298_v39, %v2297_v49  ;;  %v2370_v47 = vrot.slane %v2369_v6, 4  ;;  %v2391_v39 = vsel %vm9127_vm8, %v2275_v8, %v2261_v46  ;;  %vm9140_vm8 = vmmov %vm9133_vm4 }
 0x2c4   : > { %v2392_v42 = vsel %vm9129_vm1, %v2289_v48, %v2391_v39 }
 0x2c5   : > { %v2300_v11 = vrot.slane %v2299_v32, 2  ;;  %v2371_v59 = vadd.f32 %v2370_v47, %v2369_v6  ;;  %v2407_v6 = vsel %vm9128_vm9, %v2347_v45, %v2333_v51 }
 0x2c6   : > { %v2408_v15 = vsel %vm9130_vm5, %v2361_v19, %v2407_v6  ;;  %v2149_v19 = vadd.f32 %v2148_v40, %v7227_v56 }
 0x2c7   : > { %v2301_v37 = vadd.f32 %v2300_v11, %v2299_v32  ;;  %v2372_v35 = vrot.slane %v2371_v59, 2 }
 0x2c8   : > { %v2211_v63 = vpop.f32.mrf.mxu0  ;;  %v2240_v49 = vpop.f32.mrf.mxu1 }
 0x2c9   : > { %v2302_v55 = vrot.slane %v2301_v37, 1  ;;  %v2373_v21 = vadd.f32 %v2372_v35, %v2371_v59  ;;  %v2098_v59 = vadd.f32 %v7236_v58, %v7222_v12  ;;  %v2103_v58 = vadd.f32 %v7256_v53, %v7222_v12 }
 0x2ca   : > { %v2150_v13 = vpop.f32.mrf.mxu2  ;;  %v2179_v52 = vpop.f32.mrf.mxu3 }
 0x2cb   : > { %v2303_v10 = vadd.f32 %v2302_v55, %v2301_v37  ;;  %v2374_v60 = vrot.slane %v2373_v21, 1  ;;  %v2127_v61 = vadd.f32 %v7238_v9, %v2098_v59  ;;  %v2151_v55 = vadd.f32 %v2150_v13, %v2122_v7 }
 0x2cc   : > { %v2132_v62 = vadd.f32 %v7258_v18, %v2103_v58 }
 0x2cd   : > { %v2375_v29 = vadd.f32 %v2374_v60, %v2373_v21  ;;  %v2393_v34 = vsel %vm9131_vm0, %v2303_v10, %v2392_v42  ;;  %v2180_v46 = vadd.f32 %v2179_v52, %v2151_v55  ;;  %v2178_v10 = vadd.f32 %v7324_v1, %v2149_v19  ;;  %vm9141_vm0 = vmmov %vm9133_vm4 }
 0x2cf   : > { %v2409_v50 = vsel %vm9132_vm3, %v2375_v29, %v2408_v15  ;;  %v2207_v56 = vadd.f32 %v7307_v41, %v2178_v10  ;;  %vm9142_vm3 = vcmask 64512  }
 0x2d0   : > { %v2415_v25 = vsel %vm9133_vm4, %v2393_v34, %v2409_v50  ;;  %v2213_v47 = vpop.f32.mrf.mxu0  ;;  %v2242_v3 = vpop.f32.mrf.mxu1  ;;  %vm9143_vm4 = vmmov %vm9142_vm3 }
 0x2d1   : > { %2433 = vmatmul.f32.vlgmr.msrb.gmra.mxu2 %v2415_v25  ;;  %v7360_v50 = vadd.f32 %v7309_v57, %v2207_v56 }
 0x2d2   : > { %v2153_v24 = vpop.f32.mrf.mxu2  ;;  %v2182_v32 = vpop.f32.mrf.mxu3 }
 0x2d3   : > { %v2154_v21 = vadd.f32 %v2153_v24, %v7234_v44  ;;  %v2209_v44 = vadd.f32 %v7322_v23, %v2180_v46 }
 0x2d5   : > { %v2183_v9 = vadd.f32 %v2182_v32, %v2154_v21  ;;  %v7353_v15 = vadd.f32 %v7326_v0, %v2209_v44 }
 0x2d7   : > { %v2314_v24 = vmul.f32 %v7353_v15, %v7353_v15  ;;  %v2262_v28 = vadd.f32 %v7353_v15, %v7360_v50 }
 0x2d8   : > { %v2216_v26 = vpop.f32.mrf.mxu0  ;;  %v2245_v37 = vpop.f32.mrf.mxu1 }
 0x2da   : > { %v2155_v30 = vpop.f32.mrf.mxu2  ;;  %v2184_v11 = vpop.f32.mrf.mxu3 }
 0x2db   : > { %v2156_v35 = vadd.f32 %v2155_v30, %v2127_v61  ;;  %v2312_v30 = vmul.f32 %v7360_v50, %v7360_v50 }
 0x2dd   : > { %v2185_v17 = vadd.f32 %v2184_v11, %v2156_v35  ;;  %v2334_v7 = vadd.f32 %v2314_v24, %v2312_v30 }
 0x2df   : > { %v2214_v60 = vadd.f32 %v2213_v47, %v2185_v17 }
 0x2e0   : > { %v2218_v29 = vpop.f32.mrf.mxu0  ;;  %v2247_v42 = vpop.f32.mrf.mxu1 }
 0x2e1   : > { %v7350_v40 = vadd.f32 %v2242_v3, %v2214_v60  ;;  %v2108_v3 = vadd.f32 %v7297_v20, %v7222_v12 }
 0x2e2   : > { %v2158_v8 = vpop.f32.mrf.mxu2  ;;  %v2187_v45 = vpop.f32.mrf.mxu3 }
 0x2e3   : > { %v2159_v48 = vadd.f32 %v2158_v8, %v7249_v43  ;;  %v2212_v43 = vadd.f32 %v2211_v63, %v2183_v9  ;;  %v2318_v23 = vmul.f32 %v7350_v40, %v7350_v40  ;;  %v2137_v35 = vadd.f32 %v7299_v22, %v2108_v3 }
 0x2e4   : > { %v2263_v8 = vrot.slane %v2262_v28, 4 }
 0x2e5   : > { %v2188_v51 = vadd.f32 %v2187_v45, %v2159_v48  ;;  %v7355_v18 = vadd.f32 %v2240_v49, %v2212_v43  ;;  %v2335_v48 = vrot.slane %v2334_v7, 4 }
 0x2e7   : > { %v2217_v53 = vadd.f32 %v2216_v26, %v2188_v51  ;;  %v2316_v0 = vmul.f32 %v7355_v18, %v7355_v18  ;;  %v2276_v11 = vadd.f32 %v7350_v40, %v7355_v18 }
 0x2e8   : > { %v2221_v47 = vpop.f32.mrf.mxu0  ;;  %v2250_v61 = vpop.f32.mrf.mxu1 }
 0x2e9   : > { %v7357_v34 = vadd.f32 %v2245_v37, %v2217_v53  ;;  %v2348_v59 = vadd.f32 %v2318_v23, %v2316_v0  ;;  %v2277_v12 = vrot.slane %v2276_v11, 4 }
 0x2ea   : > { %v2160_v13 = vpop.f32.mrf.mxu2  ;;  %v2189_v39 = vpop.f32.mrf.mxu3 }
 0x2eb   : > { %v2161_v6 = vadd.f32 %v2160_v13, %v2132_v62  ;;  %v2320_v57 = vmul.f32 %v7357_v34, %v7357_v34  ;;  %v2349_v20 = vrot.slane %v2348_v59, 4  ;;  %v2278_v46 = vadd.f32 %v2277_v12, %v2276_v11 }
 0x2ec   : > { %v2264_v62 = vadd.f32 %v2263_v8, %v2262_v28  ;;  %v2336_v13 = vadd.f32 %v2335_v48, %v2334_v7 }
 0x2ed   : > { %v2190_v52 = vadd.f32 %v2189_v39, %v2161_v6  ;;  %v2350_v9 = vadd.f32 %v2349_v20, %v2348_v59  ;;  %v2279_v43 = vrot.slane %v2278_v46, 2 }
 0x2ee   : > { %v2265_v53 = vrot.slane %v2264_v62, 2 }
 0x2ef   : > { %v2219_v1 = vadd.f32 %v2218_v29, %v2190_v52  ;;  %v2351_v6 = vrot.slane %v2350_v9, 2  ;;  %v2280_v24 = vadd.f32 %v2279_v43, %v2278_v46 }
 0x2f0   : > { %v2223_v29 = vpop.f32.mrf.mxu0  ;;  %v2252_v44 = vpop.f32.mrf.mxu1  ;;  %v2266_v3 = vadd.f32 %v2265_v53, %v2264_v62 }
 0x2f1   : > { %v7364_v63 = vadd.f32 %v2247_v42, %v2219_v1  ;;  %v2337_v1 = vrot.slane %v2336_v13, 2  ;;  %v2352_v0 = vadd.f32 %v2351_v6, %v2350_v9  ;;  %v2281_v28 = vrot.slane %v2280_v24, 1 }
 0x2f2   : > { %v2163_v41 = vpop.f32.mrf.mxu2  ;;  %v2192_v25 = vpop.f32.mrf.mxu3 }
 0x2f3   : > { %v2322_v49 = vmul.f32 %v7364_v63, %v7364_v63  ;;  %v2164_v32 = vadd.f32 %v2163_v41, %v7275_v38  ;;  %v2290_v38 = vadd.f32 %v7364_v63, %v7357_v34  ;;  %v2338_v30 = vadd.f32 %v2337_v1, %v2336_v13 }
 0x2f5   : > { %v2362_v26 = vadd.f32 %v2322_v49, %v2320_v57  ;;  %v2193_v37 = vadd.f32 %v2192_v25, %v2164_v32  ;;  %v2291_v45 = vrot.slane %v2290_v38, 4  ;;  %v2339_v12 = vrot.slane %v2338_v30, 1 }
 0x2f7   : > { %v2363_v55 = vrot.slane %v2362_v26, 4  ;;  %v2222_v58 = vadd.f32 %v2221_v47, %v2193_v37  ;;  %v2292_v10 = vadd.f32 %v2291_v45, %v2290_v38  ;;  %v2282_v45 = vadd.f32 %v2281_v28, %v2280_v24  ;;  %v4812_v24 = vld [vmem:[%s9063_s5 + $0xf0] sm:$0xf] }
 0x2f8   : > { %v2340_v9 = vadd.f32 %v2339_v12, %v2338_v30 }
 0x2f9   : > { %v2364_v60 = vadd.f32 %v2363_v55, %v2362_v26  ;;  %v7386_v39 = vadd.f32 %v2250_v61, %v2222_v58  ;;  %v2293_v56 = vrot.slane %v2292_v10, 2  ;;  %v2353_v61 = vrot.slane %v2352_v0, 1 }
 0x2fa   : > { %v2165_v21 = vpop.f32.mrf.mxu2  ;;  %v2194_v17 = vpop.f32.mrf.mxu3 }
 0x2fb   : > { %v2166_v19 = vadd.f32 %v2165_v21, %v2137_v35  ;;  %v2365_v52 = vrot.slane %v2364_v60, 2  ;;  %v2324_v23 = vmul.f32 %v7386_v39, %v7386_v39  ;;  %v2294_v57 = vadd.f32 %v2293_v56, %v2292_v10 }
 0x2fc   : > { %v2267_v35 = vrot.slane %v2266_v3, 1  ;;  %v2354_v21 = vadd.f32 %v2353_v61, %v2352_v0 }
 0x2fd   : > { %v2195_v51 = vadd.f32 %v2194_v17, %v2166_v19  ;;  %v2366_v47 = vadd.f32 %v2365_v52, %v2364_v60  ;;  %v2295_v7 = vrot.slane %v2294_v57, 1 }
 0x2fe   : > { %v2268_v17 = vadd.f32 %v2267_v35, %v2266_v3  ;;  %v2410_v60 = vsel %vm9135_vm13, %v2354_v21, %v2340_v9  ;;  %vm9145_vm13 = vmmov %vm9138_vm15 }
 0x2ff   : > { %v2224_v22 = vadd.f32 %v2223_v29, %v2195_v51  ;;  %v2367_v37 = vrot.slane %v2366_v47, 1  ;;  %v2296_v58 = vadd.f32 %v2295_v7, %v2294_v57 }
 0x300   : > { %v2394_v10 = vsel %vm9134_vm6, %v2282_v45, %v2268_v17  ;;  %v4267_v45 = vld [vmem:[%s9059_s1 + $0x3] ss:$8 sm:$0x3]  ;;  %vm9144_vm6 = vmmov %vm9136_vm2 }
 0x301   : > { %v7388_v42 = vadd.f32 %v2252_v44, %v2224_v22  ;;  %v2368_v19 = vadd.f32 %v2367_v37, %v2366_v47  ;;  %v2395_v29 = vsel %vm9136_vm2, %v2296_v58, %v2394_v10  ;;  %v2546_v58 = vperm.slane %v4267_v45, 1 }
 0x302   : > { %vm9146_vm2 = vcmask 1041409  }
 0x303   : > { %v2304_v41 = vadd.f32 %v7388_v42, %v7386_v39  ;;  %v2326_v25 = vmul.f32 %v7388_v42, %v7388_v42  ;;  %v2411_v13 = vsel %vm9137_vm14, %v2368_v19, %v2410_v60 }
 0x305   : > { %v2305_v49 = vrot.slane %v2304_v41, 4  ;;  %v2376_v32 = vadd.f32 %v2326_v25, %v2324_v23  ;;  %v5189_v25 = vld [vmem:[%s9063_s5 + $0x74] sm:$0xf0] }
 0x307   : > { %v2306_v11 = vadd.f32 %v2305_v49, %v2304_v41  ;;  %v2377_v59 = vrot.slane %v2376_v32, 4  ;;  %v4748_v41 = vld [vmem:[%s9063_s5 + $0x70] sm:$0xf] }
 0x308   : > { %v4749_v49 = vor.u32 %v5189_v25, %v4748_v41 }
 0x309   : > { %v2307_v38 = vrot.slane %v2306_v11, 2  ;;  %v2378_v26 = vadd.f32 %v2377_v59, %v2376_v32  ;;  %v5205_v32 = vld [vmem:[%s9063_s5 + $0xf4] sm:$0xf0] }
 0x30a   : > { %v4813_v57 = vor.u32 %v5205_v32, %v4812_v24  ;;  %3816 = vmatpush.bf16.msrb.mxu0 %v4749_v49 }
 0x30b   : > { %v2308_v20 = vadd.f32 %v2307_v38, %v2306_v11  ;;  %v2379_v8 = vrot.slane %v2378_v26, 2 }
 0x30c   : > { %3845 = vmatpush.bf16.msrb.mxu1 %v4813_v57 }
 0x30d   : > { %v2309_v55 = vrot.slane %v2308_v20, 1  ;;  %v2380_v48 = vadd.f32 %v2379_v8, %v2378_v26  ;;  %v4266_v8 = vld [vmem:[%s9059_s1 + $0x2] ss:$8 sm:$0x3] }
 0x30e   : > { %v2529_v21 = vperm.slane %v4266_v8, 1 }
 0x30f   : > { %v2310_v46 = vadd.f32 %v2309_v55, %v2308_v20  ;;  %v2381_v51 = vrot.slane %v2380_v48, 1  ;;  %v2528_v55 = vperm.slane %v4266_v8, 0  ;;  %v4788_v8 = vld [vmem:[%s9063_s5 + $0xc0] sm:$0xf] }
 0x311   : > { %v2382_v62 = vadd.f32 %v2381_v51, %v2380_v48  ;;  %v2396_v22 = vsel %vm9138_vm15, %v2310_v46, %v2395_v29  ;;  %v2545_v48 = vperm.slane %v4267_v45, 0  ;;  %v4876_v45 = vld [vmem:[%s9063_s5 + $0x170] sm:$0xf] }
 0x313   : > { %v2412_v44 = vsel %vm9139_vm7, %v2382_v62, %v2411_v13 }
 0x314   : > { %v2416_v43 = vsel %vm9140_vm8, %v2396_v22, %v2412_v44 }
 0x315   : > { %2453 = vmatmul.f32.vlgmr.msrb.gmra.mxu3 %v2416_v43 }
 0x354   : > { %v2434_v6 = vpop.f32.mrf.mxu2 }
 0x398   : > { %v2454_v53 = vpop.f32.mrf.mxu3 }
 0x399   : > { %v2455_v56 = vadd.f32 %v2454_v53, %v2434_v6 }
 0x39b   : > { %v2457_v52 = vmul.f32 0.001953125, %v2455_v56 }
 0x39d   : > { %v2458_v1 = vmul.f32 %v2457_v52, %v2457_v52  ;;  %v2475_v7 = vsub.f32 0.0, %v2457_v52 }
 0x39f   : > { %v2460_v23 = vrot.slane %v2458_v1, 4 }
 0x3a1   : > { %v2462_v0 = vsub.f32 %v2457_v52, %v2460_v23 }
 0x3a3   : > { %v2463_v47 = vmax.f32 %v2462_v0, 0.0 }
 0x3a5   : > { %v2464_v3 = vadd.f32 1e-05, %v2463_v47  ;;  %v5187_v47 = vld [vmem:[%s9063_s5 + $0x64] sm:$0xf0] }
 0x3a7   : > { %5344 = vrsqrt.f32 %v2464_v3  ;;  %vm2471_vm1 = vweird.f32 %v2464_v3 }
 0x3ad   : > { %v5345_v30 = vpop.eup %5344 }
 0x3ae   : > { %v2466_v11 = vmul.f32 %v5345_v30, %v2464_v3  ;;  %vm2472_vm9 = vweird.f32 %v5345_v30 }
 0x3af   : > { %vm2473_vm5 = vmor %vm2471_vm1, %vm2472_vm9 }
 0x3b0   : > { %v2467_v59 = vmul.f32 %v5345_v30, %v2466_v11  ;;  %v5203_v11 = vld [vmem:[%s9063_s5 + $0xe4] sm:$0xf0] }
 0x3b2   : > { %v2468_v28 = vmul.f32 0.5, %v2467_v59  ;;  %v4732_v59 = vld [vmem:[%s9063_s5 + $0x50] sm:$0xf] }
 0x3b4   : > { %v2469_v61 = vsub.f32 1.5, %v2468_v28 }
 0x3b6   : > { %v2470_v38 = vmul.f32 %v5345_v30, %v2469_v61  ;;  %v5185_v61 = vld [vmem:[%s9063_s5 + $0x54] sm:$0xf0] }
 0x3b8   : > { %v2474_v26 = vsel %vm2473_vm5, %v5345_v30, %v2470_v38  ;;  %v4804_v30 = vld [vmem:[%s9063_s5 + $0xe0] sm:$0xf]  ;;  %v4796_v38 = vld [vmem:[%s9063_s5 + $0xd0] sm:$0xf] }
 0x3b9   : > { %v2477_v37 = vrot.slane %v2474_v26, 4  ;;  %v4805_v28 = vor.u32 %v5203_v11, %v4804_v30  ;;  %v5201_v26 = vld [vmem:[%s9063_s5 + $0xd4] sm:$0xf0] }
 0x3bb   : > { %v2479_v35 = vmul.f32 %v2477_v37, %v2475_v7  ;;  %3846 = vmatpush.bf16.msrb.mxu1 %v4805_v28 }
 0x3bd   : > { %v2481_v12 = vrot.slane %v2479_v35, 4  ;;  %v4724_v35 = vld [vmem:[%s9063_s5 + $0x40] sm:$0xf] }
 0x3bf   : > { %v2483_v20 = vsel %vm9141_vm0, %v2477_v37, %v2481_v12  ;;  %v4733_v37 = vor.u32 %v5185_v61, %v4732_v59  ;;  %v5183_v12 = vld [vmem:[%s9063_s5 + $0x44] sm:$0xf0]  ;;  %v4924_v61 = vld [vmem:[%s9063_s5 + $0x1d0] sm:$0xf] }
 0x3c0   : > { %4672 = vmatmul.msk.f32.vlgmr.msra.gmra.mxu2 %vm9142_vm3, %v2483_v20  ;;  %4673 = vmatmul.msk.f32.vlgmr.msra.gmra.mxu3 %vm9143_vm4, %v2483_v20  ;;  %v4797_v20 = vor.u32 %v5201_v26, %v4796_v38 }
 0x3c2   : > { %3847 = vmatpush.bf16.msrb.mxu1 %v4797_v20 }
 0x443   : > { %v2504_v19 = vpop.f32.mrf.mxu2  ;;  %v2524_v17 = vpop.f32.mrf.mxu3 }
 0x444   : > { %v2532_v46 = vmul.f32 %v2528_v55, %v2504_v19  ;;  %v2533_v9 = vmul.f32 %v2529_v21, %v2524_v17  ;;  %v5221_v55 = vld [vmem:[%s9063_s5 + $0x174] sm:$0xf0]  ;;  %v5199_v21 = vld [vmem:[%s9063_s5 + $0xc4] sm:$0xf0] }
 0x445   : > { %v5237_v19 = vld [vmem:[%s9063_s5 + $0x1f4] sm:$0xf0] }
 0x446   : > { %v2536_v51 = vrot.slane %v2533_v9, 7  ;;  %v2549_v62 = vadd.f32 %v2545_v48, %v2532_v46  ;;  %v2550_v10 = vadd.f32 %v2546_v58, %v2533_v9  ;;  %v4877_v48 = vor.u32 %v5221_v55, %v4876_v45  ;;  %v4940_v58 = vld [vmem:[%s9063_s5 + $0x1f0] sm:$0xf]  ;;  %v5179_v45 = vld [vmem:[%s9063_s5 + $0x24] sm:$0xf0] }
 0x447   : > { %v4941_v9 = vor.u32 %v5237_v19, %v4940_v58  ;;  %v4916_v58 = vld [vmem:[%s9063_s5 + $0x1c0] sm:$0xf]  ;;  %v5231_v19 = vld [vmem:[%s9063_s5 + $0x1c4] sm:$0xf0] }
 0x448   : > { %v7425_v60 = vsel %vm9144_vm6, %v2532_v46, %v2536_v51  ;;  %v7428_v29 = vsel %vm9145_vm13, %v2532_v46, %v2536_v51  ;;  %2553 = vst [vmem:[#allocation1] sm:$0xff] %v2549_v62  ;;  %v2537_v13 = vsel %vm618_vm11, %v2532_v46, %v2536_v51  ;;  %v2538_v43 = vsel %vm9146_vm2, %v2532_v46, %v2536_v51  ;;  %v4868_v51 = vld [vmem:[%s9063_s5 + $0x160] sm:$0xf]  ;;  %v5219_v62 = vld [vmem:[%s9063_s5 + $0x164] sm:$0xf0] }
 0x449   : > { %2554 = vst [vmem:[#allocation1 + $0x9] sm:$0xff] %v2550_v10  ;;  %v2563_v22 = vperm.slane %v2537_v13, 0  ;;  %v2564_v44 = vperm.slane %v2537_v13, 1  ;;  %v2539_v32 = vrot.slane %v2538_v43, 1  ;;  %v2541_v7 = vrot.slane %v7425_v60, 2  ;;  %3874 = vmatpush.bf16.msrb.mxu2 %v4877_v48  ;;  %3903 = vmatpush.bf16.msrb.mxu3 %v4941_v9 }
 0x44a   : > { %v2543_v60 = vrot.slane %v7428_v29, 3  ;;  %v4725_v13 = vor.u32 %v5183_v12, %v4724_v35  ;;  %v5235_v43 = vld [vmem:[%s9063_s5 + $0x1e4] sm:$0xf0]  ;;  %v4708_v35 = vld [vmem:[%s9063_s5 + $0x20] sm:$0xf] }
 0x44b   : > { %v2579_v53 = vmul.f32 %v2563_v22, %v7278_v33  ;;  %v2580_v56 = vmul.f32 %v2564_v44, %v7360_v50  ;;  %v2581_v52 = vmul.f32 %v2563_v22, %v7269_v36  ;;  %v2582_v1 = vmul.f32 %v2564_v44, %v7353_v15  ;;  %v4740_v15 = vld [vmem:[%s9063_s5 + $0x60] sm:$0xf] }
 0x44c   : > { %v4741_v3 = vor.u32 %v5187_v47, %v4740_v15  ;;  %v2565_v17 = vperm.slane %v2539_v32, 0  ;;  %v2566_v46 = vperm.slane %v2539_v32, 1  ;;  %v4869_v22 = vor.u32 %v5219_v62, %v4868_v51  ;;  %v4932_v44 = vld [vmem:[%s9063_s5 + $0x1e0] sm:$0xf] }
 0x44d   : > { %v4709_v62 = vor.u32 %v5179_v45, %v4708_v35  ;;  %v7660_v35 = vld [vmem:[%s9063_s5 + $0x120] sm:$0xf] }
 0x44e   : > { %3817 = vmatpush.bf16.msrb.mxu0 %v4741_v3  ;;  %v7531_v47 = vmul.f32 %v2565_v17, %v7271_v54  ;;  %v7534_v3 = vmul.f32 %v2566_v46, %v7355_v18  ;;  %3875 = vmatpush.bf16.msrb.mxu2 %v4869_v22  ;;  %v4860_v54 = vld [vmem:[%s9063_s5 + $0x150] sm:$0xf]  ;;  %v5217_v18 = vld [vmem:[%s9063_s5 + $0x154] sm:$0xf0]  ;;  %v7553_v38 = vmul.f32 %v2565_v17, %v7265_v31 }
 0x44f   : > { %v7564_v12 = vmul.f32 %v2566_v46, %v7350_v40  ;;  %v4861_v9 = vor.u32 %v5217_v18, %v4860_v54  ;;  %v5229_v54 = vld [vmem:[%s9063_s5 + $0x1b4] sm:$0xf0]  ;;  %v4700_v18 = vld [vmem:[%s9063_s5 + $0x10] sm:$0xf] }
 0x450   : > { %v2556_v6 = vld [vmem:[#allocation1 + $0x4] ss:$9 sm:$0xff] }
 0x451   : > { %v2595_v23 = vperm.slane %v2556_v6, 0  ;;  %v2596_v41 = vperm.slane %v2556_v6, 1 }
 0x452   : > { %3818 = vmatpush.bf16.msrb.mxu0 %v4733_v37  ;;  %v5233_v37 = vld [vmem:[%s9063_s5 + $0x1d4] sm:$0xf0]  ;;  %3876 = vmatpush.bf16.msrb.mxu2 %v4861_v9 }
 0x453   : > { %v7436_v25 = vadd.f32 %v2595_v23, %v2579_v53  ;;  %v7438_v24 = vadd.f32 %v2596_v41, %v2580_v56  ;;  %v7440_v0 = vadd.f32 %v2595_v23, %v2581_v52  ;;  %v7442_v49 = vadd.f32 %v2596_v41, %v2582_v1  ;;  %v4716_v1 = vld [vmem:[%s9063_s5 + $0x30] sm:$0xf]  ;;  %v5181_v23 = vld [vmem:[%s9063_s5 + $0x34] sm:$0xf0] }
 0x454   : > { %v7510_v53 = vperm.slane %v2541_v7, 0  ;;  %v4789_v52 = vor.u32 %v5199_v21, %v4788_v8  ;;  %v4933_v41 = vor.u32 %v5235_v43, %v4932_v44  ;;  %v4717_v28 = vor.u32 %v5181_v23, %v4716_v1  ;;  %v5215_v21 = vld [vmem:[%s9063_s5 + $0x144] sm:$0xf0]  ;;  %v7622_v23 = vld [vmem:[%s9063_s5 + $0x130] sm:$0xf] }
 0x455   : > { %v4674_v57 = vmul.f32 -1.442695, %v7436_v25  ;;  %v4675_v33 = vmul.f32 -1.442695, %v7438_v24  ;;  %v4676_v50 = vmul.f32 -1.442695, %v7440_v0  ;;  %v4925_v51 = vor.u32 %v5233_v37, %v4924_v61 }
 0x456   : > { %v4677_v36 = vmul.f32 -1.442695, %v7442_v49  ;;  %3819 = vmatpush.bf16.msrb.mxu0 %v4725_v13  ;;  %3848 = vmatpush.bf16.msrb.mxu1 %v4789_v52  ;;  %v7568_v31 = vmul.f32 %v7510_v53, %v7273_v27  ;;  %v4852_v27 = vld [vmem:[%s9063_s5 + $0x140] sm:$0xf]  ;;  %v5195_v13 = vld [vmem:[%s9063_s5 + $0xa4] sm:$0xf0] }
 0x457   : > { %5346 = vpow2.f32 %v4674_v57  ;;  %v7520_v57 = vperm.slane %v2541_v7, 1  ;;  %3904 = vmatpush.bf16.msrb.mxu3 %v4933_v41  ;;  %v4853_v1 = vor.u32 %v5215_v21, %v4852_v27  ;;  %v7627_v41 = vld [vmem:[%s9063_s5 + $0x134] sm:$0xf0]  ;;  %v7668_v27 = vld [vmem:[%s9063_s5 + $0x124] sm:$0xf0] }
 0x458   : > { %5348 = vpow2.f32 %v4675_v33  ;;  %v5177_v37 = vld [vmem:[%s9063_s5 + $0x14] sm:$0xf0]  ;;  %v7673_v21 = vld [vmem:[%s9063_s5 + $0x1a0] sm:$0xf] }
 0x459   : > { %5350 = vpow2.f32 %v4676_v50  ;;  %v4780_v50 = vld [vmem:[%s9063_s5 + $0xb0] sm:$0xf]  ;;  %v7577_v55 = vmul.f32 %v7520_v57, %v7357_v34  ;;  %3877 = vmatpush.bf16.msrb.mxu2 %v4853_v1 }
 0x45a   : > { %5352 = vpow2.f32 %v4677_v36  ;;  %v5197_v36 = vld [vmem:[%s9063_s5 + $0xb4] sm:$0xf0]  ;;  %3820 = vmatpush.bf16.msrb.mxu0 %v4717_v28  ;;  %v4908_v28 = vld [vmem:[%s9063_s5 + $0x1b0] sm:$0xf] }
 0x45b   : > { %v4781_v7 = vor.u32 %v5197_v36, %v4780_v50  ;;  %3905 = vmatpush.bf16.msrb.mxu3 %v4925_v51  ;;  %v7813_v36 = vld [vmem:[%s9063_s5 + $0x74] sm:$0xf] }
 0x45d   : > { %v5347_v10 = vpop.eup %5346  ;;  %3849 = vmatpush.bf16.msrb.mxu1 %v4781_v7  ;;  %v5004_v7 = vld [vmem:[%s9063_s5 + $0x270] sm:$0xf] }
 0x45e   : > { %v5349_v6 = vpop.eup %5348  ;;  %v7512_v56 = vadd.f32 1.0, %v5347_v10  ;;  %v4772_v10 = vld [vmem:[%s9063_s5 + $0xa0] sm:$0xf]  ;;  %3821 = vmatpush.bf16.msrb.mxu0 %v4709_v62  ;;  %v7693_v62 = vld [vmem:[%s9063_s5 + $0x1a4] sm:$0xf0] }
 0x45f   : > { %v5351_v32 = vpop.eup %5350  ;;  %v7522_v33 = vadd.f32 1.0, %v5349_v6 }
 0x460   : > { %v5353_v15 = vpop.eup %5352  ;;  %v7536_v30 = vadd.f32 1.0, %v5351_v32  ;;  %5354 = vrcp.f32 %v7512_v56  ;;  %v2702_v59 = vand.u32 2147483648, %v7512_v56  ;;  %v2700_v26 = vand.u32 2147483647, %v7512_v56 }
 0x461   : > { %v7539_v11 = vadd.f32 1.0, %v5353_v15  ;;  %5356 = vrcp.f32 %v7522_v33  ;;  %v2715_v20 = vand.u32 2147483647, %v7522_v33  ;;  %v2717_v8 = vand.u32 2147483648, %v7522_v33 }
 0x462   : > { %5358 = vrcp.f32 %v7536_v30  ;;  %vm2696_vm14 = vweird.f32 %v7512_v56  ;;  %v2730_v40 = vand.u32 2147483647, %v7536_v30  ;;  %v7588_v48 = vor.u32 1.1754944e-38, %v2702_v59 }
 0x463   : > { %5360 = vrcp.f32 %v7539_v11  ;;  %vm2711_vm15 = vweird.f32 %v7522_v33  ;;  %vm2726_vm7 = vweird.f32 %v7536_v30  ;;  %v2732_v34 = vand.u32 2147483648, %v7536_v30 }
 0x464   : > { %v2745_v46 = vand.u32 2147483647, %v7539_v11  ;;  %vm7612_vm8 = vcmp.eq.f32.partialorder %v2700_v26, 8.507059e+37  ;;  %v7616_v6 = vor.u32 1.1754944e-38, %v2717_v8  ;;  %v2747_v52 = vand.u32 2147483648, %v7539_v11 }
 0x465   : > { %vm7634_vm1 = vcmp.eq.f32.partialorder %v2715_v20, 8.507059e+37  ;;  %v4917_v15 = vor.u32 %v5231_v19, %v4916_v58  ;;  %v4773_v59 = vor.u32 %v5195_v13, %v4772_v10  ;;  %vm7650_vm0 = vcmp.eq.f32.partialorder %v2730_v40, 8.507059e+37 }
 0x466   : > { %v7599_v17 = vpop.eup %5354  ;;  %v2733_v45 = vor.u32 1.1754944e-38, %v2732_v34  ;;  %v4701_v40 = vor.u32 %v5177_v37, %v4700_v18  ;;  %vm7686_vm6 = vcmp.eq.f32.partialorder %v2745_v46, 8.507059e+37  ;;  %v2748_v13 = vor.u32 1.1754944e-38, %v2747_v52  ;;  %v7715_v18 = vld [vmem:[%s9063_s5 + $0x110] sm:$0xf] }
 0x467   : > { %v7608_v22 = vpop.eup %5356  ;;  %v2692_v44 = vmul.f32 %v7599_v17, %v7512_v56  ;;  %vm2697_vm9 = vweird.f32 %v7599_v17  ;;  %3850 = vmatpush.bf16.msrb.mxu1 %v4773_v59  ;;  %v4764_v56 = vld [vmem:[%s9063_s5 + $0x90] sm:$0xf]  ;;  %3906 = vmatpush.bf16.msrb.mxu3 %v4917_v15  ;;  %v5193_v59 = vld [vmem:[%s9063_s5 + $0x94] sm:$0xf0]  ;;  %v4692_v37 = vld [vmem:[%s9063_s5] sm:$0xf] }
 0x468   : > { %v7629_v32 = vpop.eup %5358  ;;  %v2707_v50 = vmul.f32 %v7608_v22, %v7522_v33  ;;  %vm2712_vm5 = vweird.f32 %v7608_v22  ;;  %vm7680_vm4 = vmor %vm2696_vm14, %vm2697_vm9  ;;  %3822 = vmatpush.bf16.msrb.mxu0 %v4701_v40  ;;  %v7735_v15 = vld [vmem:[%s9063_s5 + $0x190] sm:$0xf]  ;;  %v5204_v52 = vld [vmem:[%s9063_s5 + $0xf4] sm:$0xf] }
 0x469   : > { %v2693_v61 = vsub.f32 1.0, %v2692_v44  ;;  %v2722_v26 = vmul.f32 %v7629_v32, %v7536_v30  ;;  %v7662_v20 = vpop.eup %5360  ;;  %vm2727_vm3 = vweird.f32 %v7629_v32  ;;  %vm7703_vm13 = vmor %vm2711_vm15, %vm2712_vm5  ;;  %v4845_v44 = vor.u32 %v7627_v41, %v7622_v23  ;;  %v7730_v41 = vld [vmem:[%s9063_s5 + $0x114] sm:$0xf0] }
 0x46a   : > { %v2708_v8 = vsub.f32 1.0, %v2707_v50  ;;  %v2737_v9 = vmul.f32 %v7662_v20, %v7539_v11  ;;  %v4909_v50 = vor.u32 %v5229_v54, %v4908_v28  ;;  %vm7723_vm2 = vmor %vm2726_vm7, %vm2727_vm3  ;;  %v4765_v23 = vor.u32 %v5193_v59, %v4764_v56  ;;  %v7786_v56 = vld [vmem:[%s9063_s5 + $0x184] sm:$0xf0] }
 0x46b   : > { %v2694_v58 = vmul.f32 %v7599_v17, %v2693_v61  ;;  %v2723_v19 = vsub.f32 1.0, %v2722_v26  ;;  %vm2742_vm14 = vweird.f32 %v7662_v20  ;;  %v4837_v30 = vor.u32 %v7668_v27, %v7660_v35  ;;  %v7746_v26 = vld [vmem:[%s9063_s5 + $0x194] sm:$0xf0]  ;;  %3878 = vmatpush.bf16.msrb.mxu2 %v4845_v44 }
 0x46c   : > { %v2709_v10 = vmul.f32 %v7608_v22, %v2708_v8  ;;  %v2738_v1 = vsub.f32 1.0, %v2737_v9  ;;  %v4901_v54 = vor.u32 %v7693_v62, %v7673_v21  ;;  %v5175_v8 = vld [vmem:[%s9063_s5 + $0x4] sm:$0xf0]  ;;  %3851 = vmatpush.bf16.msrb.mxu1 %v4765_v23  ;;  %v4829_v21 = vor.u32 %v7730_v41, %v7715_v18  ;;  %3907 = vmatpush.bf16.msrb.mxu3 %v4909_v50 }
 0x46d   : > { %v2695_v33 = vadd.f32 %v7599_v17, %v2694_v58  ;;  %v2724_v61 = vmul.f32 %v7629_v32, %v2723_v19  ;;  %v7764_v58 = vld [vmem:[%s9063_s5 + $0x100] sm:$0xf]  ;;  %v7769_v19 = vld [vmem:[%s9063_s5 + $0x104] sm:$0xf0]  ;;  %vm2741_vm15 = vweird.f32 %v7539_v11  ;;  %v4693_v62 = vor.u32 %v5175_v8, %v4692_v37 }
 0x46e   : > { %v2710_v28 = vadd.f32 %v7608_v22, %v2709_v10  ;;  %v2739_v27 = vmul.f32 %v7662_v20, %v2738_v1  ;;  %v4756_v10 = vld [vmem:[%s9063_s5 + $0x80] sm:$0xf]  ;;  %vm7803_vm7 = vmor %vm2741_vm15, %vm2742_vm14  ;;  %v4893_v50 = vor.u32 %v7746_v26, %v7735_v15  ;;  %v4821_v59 = vor.u32 %v7769_v19, %v7764_v58  ;;  %v4814_v1 = vld [vmem:[%s9063_s5 + $0xf8] sm:$0xf0] }
 0x46f   : > { %v2699_v35 = vsel %vm7680_vm4, %v7599_v17, %v2695_v33  ;;  %v2725_v40 = vadd.f32 %v7629_v32, %v2724_v61  ;;  %v7774_v17 = vld [vmem:[%s9063_s5 + $0x180] sm:$0xf]  ;;  %3823 = vmatpush.bf16.msrb.mxu0 %v4693_v62  ;;  %3879 = vmatpush.bf16.msrb.mxu2 %v4837_v30  ;;  %v5068_v15 = vld [vmem:[%s9063_s5 + $0x2f0] sm:$0xf]  ;;  %v7870_v26 = vld [vmem:[%s9063_s5 + $0x64] sm:$0xf] }
 0x470   : > { %v2704_v34 = vsel %vm7612_vm8, %v7588_v48, %v2699_v35  ;;  %v2714_v9 = vsel %vm7703_vm13, %v7608_v22, %v2710_v28  ;;  %v5191_v48 = vld [vmem:[%s9063_s5 + $0x84] sm:$0xf0]  ;;  %v2740_v43 = vadd.f32 %v7662_v20, %v2739_v27  ;;  %v4885_v33 = vor.u32 %v7786_v56, %v7774_v17  ;;  %3908 = vmatpush.bf16.msrb.mxu3 %v4901_v54  ;;  %v5269_v28 = vld [vmem:[%s9063_s5 + $0x2f4] sm:$0xf0]  ;;  %v4996_v37 = vld [vmem:[%s9063_s5 + $0x260] sm:$0xf] }
 0x471   : > { %v2719_v11 = vsel %vm7634_vm1, %v7616_v6, %v2714_v9  ;;  %v2729_v22 = vsel %vm7723_vm2, %v7629_v32, %v2725_v40  ;;  %v7808_v44 = vmul.f32 %v2704_v34, %v7436_v25  ;;  %v7827_v25 = vld [vmem:[%s9063_s5 + $0x78] sm:$0xf0]  ;;  %v4757_v61 = vor.u32 %v5191_v48, %v4756_v10  ;;  %v7883_v58 = vld [vmem:[%s9063_s5 + $0x68] sm:$0xf0]  ;;  %v5060_v19 = vld [vmem:[%s9063_s5 + $0x2e0] sm:$0xf] }
 0x472   : > { %v2734_v6 = vsel %vm7650_vm0, %v2733_v45, %v2729_v22  ;;  %v7818_v32 = vmul.f32 %v2719_v11, %v7438_v24  ;;  %v5253_v24 = vld [vmem:[%s9063_s5 + $0x274] sm:$0xf0]  ;;  %v2744_v45 = vsel %vm7803_vm7, %v7662_v20, %v2740_v43  ;;  %vm9163_vm8 = vcmp.ne.s32.totalorder %v6018_v2, 0  ;;  %v5267_v56 = vld [vmem:[%s9063_s5 + $0x2e4] sm:$0xf0] }
 0x473   : > { %v7839_v18 = vmul.f32 %v2734_v6, %v7440_v0  ;;  %v2749_v23 = vsel %vm7686_vm6, %v2748_v13, %v2744_v45  ;;  %v2963_v20 = vrot.slane %v7808_v44, 7  ;;  %3852 = vmatpush.bf16.msrb.mxu1 %v4757_v61  ;;  %v4753_v13 = vor.u32 %v7813_v36, %v7827_v25  ;;  %v2558_v10 = vld [vmem:[#allocation1 + $0x5] ss:$9 sm:$0xff]  ;;  %3880 = vmatpush.bf16.msrb.mxu2 %v4829_v21  ;;  %vm9164_vm9 = vmmov %vm9163_vm8 }
 0x474   : > { %v3099_v0 = vpack.c.bf16 %v7818_v32, %v7808_v44  ;;  %v2964_v41 = vrot.slane %v7818_v32, 7  ;;  %v7862_v51 = vmul.f32 %v2749_v23, %v7442_v49  ;;  %v5005_v54 = vor.u32 %v5253_v24, %v5004_v7  ;;  %v5251_v49 = vld [vmem:[%s9063_s5 + $0x264] sm:$0xf0]  ;;  %3909 = vmatpush.bf16.msrb.mxu3 %v4893_v50  ;;  %v5202_v7 = vld [vmem:[%s9063_s5 + $0xe4] sm:$0xf] }
 0x475   : > { %v2965_v30 = vrot.slane %v7839_v18, 7  ;;  %v3009_v40 = vsel %vm618_vm11, 0.0, %v2963_v20  ;;  %v4817_v11 = vor.u32 %v5204_v52, %v4814_v1  ;;  %v5069_v22 = vor.u32 %v5269_v28, %v5068_v15  ;;  %v4806_v50 = vld [vmem:[%s9063_s5 + $0xe8] sm:$0xf0] }
 0x476   : > { %v3163_v8 = vunpack.c.l.b16 %v3099_v0  ;;  %v3164_v35 = vunpack.c.h.b16 %v3099_v0  ;;  %v3010_v27 = vsel %vm618_vm11, 0.0, %v2964_v41  ;;  %v3100_v17 = vpack.c.bf16 %v7862_v51, %v7839_v18  ;;  %3932 = vmatpush.bf16.msra.mxu0 %v5005_v54  ;;  %v2560_v52 = vld [vmem:[#allocation1 + $0x6] ss:$9 sm:$0xff] }
 0x477   : > { %v2966_v34 = vsel %vm618_vm11, %v2963_v20, %v2965_v30  ;;  %v9080_v9 = vrot.slane %v7862_v51, 7  ;;  %v3059_v62 = vsel %vm9163_vm8, %v3009_v40, 0.0  ;;  %v3060_v48 = vsel %vm9164_vm9, %v3010_v27, 0.0  ;;  %3961 = vmatpush.bf16.msra.mxu1 %v5069_v22  ;;  %3881 = vmatpush.bf16.msrb.mxu2 %v4821_v59 }
 0x478   : > { %v4997_v43 = vor.u32 %v5251_v49, %v4996_v37  ;;  %v3165_v46 = vunpack.c.l.b16 %v3100_v17  ;;  %v3166_v36 = vunpack.c.h.b16 %v3100_v17  ;;  %v3091_v25 = vpack.c.bf16 %v3060_v48, %v3059_v62  ;;  %3910 = vmatpush.bf16.msrb.mxu3 %v4885_v33 }
 0x479   : > { %v2968_v6 = vsel %vm618_vm11, %v2964_v41, %v9080_v9  ;;  %v4745_v21 = vor.u32 %v7870_v26, %v7883_v58  ;;  %v5061_v45 = vor.u32 %v5267_v56, %v5060_v19  ;;  %v2597_v61 = vperm.slane %v2558_v10, 0  ;;  %v7941_v58 = vld [vmem:[#allocation1 + $0x7] ss:$9 sm:$0xff] }
 0x47a   : > { %v3092_v24 = vpack.c.bf16 %v2968_v6, %v2966_v34  ;;  %v7912_v1 = vpack.c.b16 %v3165_v46, %v3163_v8  ;;  %v7914_v23 = vpack.c.b16 %v3166_v36, %v3164_v35  ;;  %v3123_v0 = vunpack.c.l.b16 %v3091_v25  ;;  %3933 = vmatpush.bf16.msra.mxu0 %v4997_v43 }
 0x47b   : > { %v3124_v20 = vunpack.c.h.b16 %v3091_v25  ;;  %v2598_v28 = vperm.slane %v2558_v10, 1  ;;  %v7917_v54 = vadd.f32 %v2597_v61, %v7531_v47  ;;  %3990 = vmatpush.bf16.msra.mxu2 %v4753_v13  ;;  %v4809_v26 = vor.u32 %v5202_v7, %v4806_v50  ;;  %3962 = vmatpush.bf16.msra.mxu1 %v5061_v45 }
 0x47c   : > { %v3125_v41 = vunpack.c.l.b16 %v3092_v24  ;;  %v3126_v15 = vunpack.c.h.b16 %v3092_v24  ;;  %4019 = vmatpush.bf16.msra.mxu3 %v4817_v11  ;;  %v7920_v37 = vadd.f32 %v2597_v61, %v7553_v38  ;;  %v2599_v49 = vperm.slane %v2560_v52, 0  ;;  %3882 = vmatmul.bf16.vlgmr.msrb.gmra.mxu2 %v7912_v1 }
 0x47d   : > { %v2600_v8 = vperm.slane %v2560_v52, 1  ;;  %v7927_v59 = vadd.f32 %v2598_v28, %v7534_v3  ;;  %v7930_v33 = vadd.f32 %v2598_v28, %v7564_v12  ;;  %v2589_v47 = vmul.f32 %v7510_v53, %v7282_v5  ;;  %3911 = vmatmul.bf16.vlgmr.msrb.gmra.mxu3 %v7914_v23 }
 0x47e   : > { %v7922_v35 = vpack.c.b16 %v3125_v41, %v3123_v0  ;;  %v7924_v40 = vpack.c.b16 %v3126_v15, %v3124_v20  ;;  %v4678_v38 = vmul.f32 -1.442695, %v7917_v54  ;;  %v4680_v13 = vmul.f32 -1.442695, %v7920_v37  ;;  %v4988_v0 = vld [vmem:[%s9063_s5 + $0x250] sm:$0xf] }
 0x47f   : > { %v7939_v27 = vadd.f32 %v2599_v49, %v7568_v31  ;;  %v2569_v3 = vperm.slane %v2543_v60, 0  ;;  %v4679_v5 = vmul.f32 -1.442695, %v7927_v59  ;;  %v4681_v53 = vmul.f32 -1.442695, %v7930_v33  ;;  %3991 = vmatpush.bf16.msra.mxu2 %v4745_v21 }
 0x480   : > { %3824 = vmatmul.bf16.vlgmr.msrb.gmra.mxu0 %v7922_v35  ;;  %3853 = vmatmul.bf16.vlgmr.msrb.gmra.mxu1 %v7924_v40  ;;  %v7950_v12 = vadd.f32 %v2600_v8, %v7577_v55  ;;  %v2570_v31 = vperm.slane %v2543_v60, 1  ;;  %5362 = vpow2.f32 %v4678_v38  ;;  %v7954_v19 = vadd.f32 %v2599_v49, %v2589_v47  ;;  %v5249_v20 = vld [vmem:[%s9063_s5 + $0x254] sm:$0xf0]  ;;  %v5200_v41 = vld [vmem:[%s9063_s5 + $0xd4] sm:$0xf] }
 0x481   : > { %4020 = vmatpush.bf16.msra.mxu3 %v4809_v26  ;;  %5364 = vpow2.f32 %v4679_v5  ;;  %v2601_v17 = vperm.slane %v7941_v58, 0  ;;  %v2590_v34 = vmul.f32 %v7520_v57, %v7364_v63  ;;  %v4682_v62 = vmul.f32 -1.442695, %v7939_v27  ;;  %v5184_v63 = vld [vmem:[%s9063_s5 + $0x54] sm:$0xf] }
 0x482   : > { %5366 = vpow2.f32 %v4680_v13  ;;  %v9079_v55 = vperm.slane %v7941_v58, 1  ;;  %v2591_v56 = vmul.f32 %v2569_v3, %v7312_v14  ;;  %v4683_v29 = vmul.f32 -1.442695, %v7950_v12  ;;  %v4734_v14 = vld [vmem:[%s9063_s5 + $0x58] sm:$0xf0] }
 0x483   : > { %5368 = vpow2.f32 %v4681_v53  ;;  %v2592_v60 = vmul.f32 %v2570_v31, %v7386_v39  ;;  %v7964_v10 = vadd.f32 %v2600_v8, %v2590_v34  ;;  %v4684_v48 = vmul.f32 -1.442695, %v7954_v19  ;;  %v4798_v49 = vld [vmem:[%s9063_s5 + $0xd8] sm:$0xf0]  ;;  %v5052_v8 = vld [vmem:[%s9063_s5 + $0x2d0] sm:$0xf] }
 0x484   : > { %v7967_v11 = vadd.f32 %v2601_v17, %v2591_v56  ;;  %5370 = vpow2.f32 %v4682_v62  ;;  %v2593_v43 = vmul.f32 %v2569_v3, %v7314_v4  ;;  %v4737_v36 = vor.u32 %v5184_v63, %v4734_v14  ;;  %v5265_v5 = vld [vmem:[%s9063_s5 + $0x2d4] sm:$0xf0] }
 0x485   : > { %v7977_v57 = vadd.f32 %v9079_v55, %v2592_v60  ;;  %5372 = vpow2.f32 %v4683_v29  ;;  %v4685_v7 = vmul.f32 -1.442695, %v7964_v10  ;;  %v8017_v38 = vmul.f32 %v2570_v31, %v7388_v42  ;;  %v5182_v42 = vld [vmem:[%s9063_s5 + $0x44] sm:$0xf]  ;;  %v4726_v60 = vld [vmem:[%s9063_s5 + $0x48] sm:$0xf0] }
 0x486   : > { %v5363_v22 = vpop.eup %5362  ;;  %5374 = vpow2.f32 %v4684_v48  ;;  %3992 = vmatpush.bf16.msra.mxu2 %v4737_v36  ;;  %v7988_v50 = vadd.f32 %v2601_v17, %v2593_v43  ;;  %v4686_v4 = vmul.f32 -1.442695, %v7967_v11  ;;  %v4989_v62 = vor.u32 %v5249_v20, %v4988_v0  ;;  %v4980_v48 = vld [vmem:[%s9063_s5 + $0x240] sm:$0xf] }
 0x487   : > { %v5365_v39 = vpop.eup %5364  ;;  %v7980_v46 = vadd.f32 1.0, %v5363_v22  ;;  %v7996_v52 = vmul.f32 -1.442695, %v7977_v57  ;;  %v4801_v56 = vor.u32 %v5200_v41, %v4798_v49  ;;  %v5053_v29 = vor.u32 %v5265_v5, %v5052_v8  ;;  %v5247_v22 = vld [vmem:[%s9063_s5 + $0x244] sm:$0xf0] }
 0x488   : > { %v5367_v6 = vpop.eup %5366  ;;  %v7982_v25 = vadd.f32 1.0, %v5365_v39  ;;  %v8033_v31 = vmul.f32 -1.442695, %v7988_v50  ;;  %3934 = vmatpush.bf16.msra.mxu0 %v4989_v62  ;;  %v4729_v20 = vor.u32 %v5182_v42, %v4726_v60  ;;  %v4981_v41 = vor.u32 %v5247_v22, %v4980_v48 }
 0x489   : > { %v5369_v24 = vpop.eup %5368  ;;  %v7985_v21 = vadd.f32 1.0, %v5367_v6  ;;  %5376 = vrcp.f32 %v7980_v46  ;;  %v2760_v61 = vand.u32 2147483647, %v7980_v46  ;;  %v2762_v28 = vand.u32 2147483648, %v7980_v46  ;;  %v5198_v6 = vld [vmem:[%s9063_s5 + $0xc4] sm:$0xf]  ;;  %4021 = vmatpush.bf16.msra.mxu3 %v4801_v56  ;;  %3963 = vmatpush.bf16.msra.mxu1 %v5053_v29 }
 0x48a   : > { %v7991_v45 = vadd.f32 1.0, %v5369_v24  ;;  %5378 = vrcp.f32 %v7982_v25  ;;  %v5371_v15 = vpop.eup %5370  ;;  %v2777_v26 = vand.u32 2147483648, %v7982_v25  ;;  %v2775_v13 = vand.u32 2147483647, %v7982_v25  ;;  %3993 = vmatpush.bf16.msra.mxu2 %v4729_v20 }
 0x48b   : > { %5380 = vrcp.f32 %v7985_v21  ;;  %v5373_v47 = vpop.eup %5372  ;;  %v2792_v3 = vand.u32 2147483648, %v7985_v21  ;;  %vm2756_vm1 = vweird.f32 %v7980_v46  ;;  %v2790_v17 = vand.u32 2147483647, %v7985_v21 }
 0x48c   : > { %5382 = vpow2.f32 %v4685_v7  ;;  %v8025_v53 = vpop.eup %5374  ;;  %vm2771_vm5 = vweird.f32 %v7982_v25  ;;  %vm8051_vm0 = vcmp.eq.f32.partialorder %v2760_v61, 8.507059e+37  ;;  %v2763_v43 = vor.u32 1.1754944e-38, %v2762_v28  ;;  %v4790_v7 = vld [vmem:[%s9063_s5 + $0xc8] sm:$0xf0]  ;;  %v5044_v28 = vld [vmem:[%s9063_s5 + $0x2c0] sm:$0xf]  ;;  %3935 = vmatpush.bf16.msra.mxu0 %v4981_v41 }
 0x48d   : > { %5384 = vrcp.f32 %v7991_v45  ;;  %v2778_v36 = vor.u32 1.1754944e-38, %v2777_v26  ;;  %vm2786_vm3 = vweird.f32 %v7985_v21  ;;  %vm8064_vm4 = vcmp.eq.f32.partialorder %v2775_v13, 8.507059e+37  ;;  %v5263_v26 = vld [vmem:[%s9063_s5 + $0x2c4] sm:$0xf0] }
 0x48e   : > { %5386 = vpow2.f32 %v4686_v4  ;;  %v2793_v0 = vor.u32 1.1754944e-38, %v2792_v3  ;;  %vm8075_vm6 = vcmp.eq.f32.partialorder %v2790_v17, 8.507059e+37  ;;  %vm2801_vm13 = vweird.f32 %v7991_v45 }
 0x48f   : > { %v8035_v34 = vpop.eup %5376  ;;  %v2805_v3 = vand.u32 2147483647, %v7991_v45  ;;  %v4793_v42 = vor.u32 %v5198_v6, %v4790_v7  ;;  %v5045_v60 = vor.u32 %v5263_v26, %v5044_v28  ;;  %v8082_v48 = vadd.f32 1.0, %v5371_v15 }
 0x490   : > { %v8047_v63 = vpop.eup %5378  ;;  %v2752_v14 = vmul.f32 %v8035_v34, %v7980_v46  ;;  %vm2757_vm2 = vweird.f32 %v8035_v34  ;;  %v8088_v9 = vadd.f32 1.0, %v5373_v47  ;;  %v2807_v6 = vand.u32 2147483648, %v7991_v45 }
 0x491   : > { %v5381_v24 = vpop.eup %5380  ;;  %v2767_v4 = vmul.f32 %v8047_v63, %v7982_v25  ;;  %vm2772_vm14 = vweird.f32 %v8047_v63  ;;  %4022 = vmatpush.bf16.msra.mxu3 %v4793_v42  ;;  %5388 = vrcp.f32 %v8082_v48  ;;  %3964 = vmatpush.bf16.msra.mxu1 %v5045_v60  ;;  %vm2758_vm7 = vmor %vm2756_vm1, %vm2757_vm2  ;;  %vm8100_vm9 = vcmp.eq.f32.partialorder %v2805_v3, 8.507059e+37 }
 0x492   : > { %v5383_v49 = vpop.eup %5382  ;;  %v2753_v8 = vsub.f32 1.0, %v2752_v14  ;;  %v2782_v13 = vmul.f32 %v5381_v24, %v7985_v21  ;;  %vm2787_vm15 = vweird.f32 %v5381_v24  ;;  %v2822_v41 = vand.u32 2147483648, %v8082_v48  ;;  %vm2773_vm12 = vmor %vm2771_vm5, %vm2772_vm14 }
 0x493   : > { %v5385_v62 = vpop.eup %5384  ;;  %v2768_v56 = vsub.f32 1.0, %v2767_v4  ;;  %5390 = vrcp.f32 %v8088_v9  ;;  %vm2788_vm1 = vmor %vm2786_vm3, %vm2787_vm15  ;;  %vm2816_vm5 = vweird.f32 %v8082_v48  ;;  %vm9174_vm3 = vcmp.ne.s32.totalorder %v6018_v2, 0 }
 0x494   : > { %v8084_v22 = vpop.eup %5386  ;;  %v2754_v17 = vmul.f32 %v8035_v34, %v2753_v8  ;;  %v2783_v14 = vsub.f32 1.0, %v2782_v13  ;;  %v2797_v55 = vmul.f32 %v5385_v62, %v7991_v45  ;;  %vm2802_vm8 = vweird.f32 %v5385_v62 }
 0x495   : > { %v2769_v29 = vmul.f32 %v8047_v63, %v2768_v56  ;;  %v2808_v13 = vor.u32 1.1754944e-38, %v2807_v6  ;;  %v2823_v61 = vor.u32 1.1754944e-38, %v2822_v41  ;;  %v9173_v6 = vrot.slane %v7862_v51, 7 }
 0x496   : > { %v2755_v15 = vadd.f32 %v8035_v34, %v2754_v17  ;;  %v2784_v7 = vmul.f32 %v5381_v24, %v2783_v14  ;;  %v2798_v4 = vsub.f32 1.0, %v2797_v55 }
 0x497   : > { %v2770_v47 = vadd.f32 %v8047_v63, %v2769_v29  ;;  %v8125_v39 = vpop.eup %5388 }
 0x498   : > { %v2759_v28 = vsel %vm2758_vm7, %v8035_v34, %v2755_v15  ;;  %v2785_v55 = vadd.f32 %v5381_v24, %v2784_v7  ;;  %v2799_v26 = vmul.f32 %v5385_v62, %v2798_v4  ;;  %v8118_v34 = vadd.f32 1.0, %v8025_v53  ;;  %v4710_v7 = vld [vmem:[%s9063_s5 + $0x28] sm:$0xf0] }
 0x499   : > { %v2764_v46 = vsel %vm8051_vm0, %v2763_v43, %v2759_v28  ;;  %v2774_v8 = vsel %vm2773_vm12, %v8047_v63, %v2770_v47  ;;  %vm2803_vm12 = vmor %vm2801_vm13, %vm2802_vm8  ;;  %v8135_v53 = vadd.f32 1.0, %v5383_v49  ;;  %v2820_v43 = vand.u32 2147483647, %v8082_v48  ;;  %v8149_v5 = vpop.eup %5390 }
 0x49a   : > { %v2779_v25 = vsel %vm8064_vm4, %v2778_v36, %v2774_v8  ;;  %v2789_v3 = vsel %vm2788_vm1, %v5381_v24, %v2785_v55  ;;  %v2800_v42 = vadd.f32 %v5385_v62, %v2799_v26  ;;  %v8123_v56 = vmul.f32 %v2764_v46, %v7917_v54  ;;  %vm9183_vm1 = vmmov %vm9174_vm3 }
 0x49b   : > { %v2794_v63 = vsel %vm8075_vm6, %v2793_v0, %v2789_v3  ;;  %v8133_v21 = vmul.f32 %v2779_v25, %v7927_v59  ;;  %v2835_v49 = vand.u32 2147483647, %v8088_v9  ;;  %v2812_v17 = vmul.f32 %v8125_v39, %v8082_v48  ;;  %vm9177_vm6 = vmmov %vm9174_vm3 }
 0x49c   : > { %v2804_v36 = vsel %vm2803_vm12, %v5385_v62, %v2800_v42  ;;  %v8139_v54 = vmul.f32 %v2794_v63, %v7920_v37  ;;  %v2969_v24 = vrot.slane %v8123_v56, 7  ;;  %vm2831_vm0 = vweird.f32 %v8088_v9  ;;  %vm9184_vm12 = vmmov %vm9183_vm1 }
 0x49d   : > { %v2809_v0 = vsel %vm8100_vm9, %v2808_v13, %v2804_v36  ;;  %v3101_v45 = vpack.c.bf16 %v8133_v21, %v8123_v56  ;;  %v2971_v59 = vrot.slane %v8133_v21, 7  ;;  %vm8166_vm4 = vcmp.eq.f32.partialorder %v2820_v43, 8.507059e+37 }
 0x49e   : > { %v8152_v37 = vmul.f32 %v2809_v0, %v7930_v33  ;;  %v2970_v62 = vsel %vm618_vm11, %v2965_v30, %v2969_v24  ;;  %v2973_v60 = vrot.slane %v8139_v54, 7  ;;  %v2813_v28 = vsub.f32 1.0, %v2812_v17  ;;  %v5180_v17 = vld [vmem:[%s9063_s5 + $0x34] sm:$0xf]  ;;  %v4694_v0 = vld [vmem:[%s9063_s5 + $0x8] sm:$0xf0] }
 0x49f   : > { %v3167_v14 = vunpack.c.l.b16 %v3101_v45  ;;  %v3168_v29 = vunpack.c.h.b16 %v3101_v45  ;;  %v2972_v15 = vsel %vm618_vm11, %v9173_v6, %v2971_v59  ;;  %v3063_v33 = vsel %vm9174_vm3, %v2970_v62, 0.0  ;;  %v4766_v6 = vld [vmem:[%s9063_s5 + $0x98] sm:$0xf0] }
 0x4a0   : > { %v3102_v30 = vpack.c.bf16 %v8152_v37, %v8139_v54  ;;  %v2974_v4 = vsel %vm618_vm11, %v2969_v24, %v2973_v60  ;;  %v2975_v47 = vrot.slane %v8152_v37, 7  ;;  %v3064_v20 = vsel %vm9177_vm6, %v2972_v15, 0.0  ;;  %v4718_v15 = vld [vmem:[%s9063_s5 + $0x38] sm:$0xf0] }
 0x4a1   : > { %v3093_v41 = vpack.c.bf16 %v3064_v20, %v3063_v33  ;;  %v2827_v55 = vmul.f32 %v8149_v5, %v8088_v9  ;;  %v2837_v26 = vand.u32 2147483648, %v8088_v9  ;;  %vm2817_vm13 = vweird.f32 %v8125_v39  ;;  %v4972_v33 = vld [vmem:[%s9063_s5 + $0x230] sm:$0xf]  ;;  %v4782_v9 = vld [vmem:[%s9063_s5 + $0xb8] sm:$0xf0] }
 0x4a2   : > { %v3169_v46 = vunpack.c.l.b16 %v3102_v30  ;;  %v3170_v8 = vunpack.c.h.b16 %v3102_v30  ;;  %v2976_v13 = vsel %vm618_vm11, %v2971_v59, %v2975_v47  ;;  %v2814_v63 = vmul.f32 %v8125_v39, %v2813_v28  ;;  %vm2818_vm14 = vmor %vm2816_vm5, %vm2817_vm13  ;;  %v5196_v28 = vld [vmem:[%s9063_s5 + $0xb4] sm:$0xf] }
 0x4a3   : > { %v3094_v25 = vpack.c.bf16 %v2976_v13, %v2974_v4  ;;  %v3127_v3 = vunpack.c.l.b16 %v3093_v41  ;;  %v3128_v42 = vunpack.c.h.b16 %v3093_v41  ;;  %v2828_v24 = vsub.f32 1.0, %v2827_v55  ;;  %v5245_v41 = vld [vmem:[%s9063_s5 + $0x234] sm:$0xf0] }
 0x4a4   : > { %v8186_v43 = vpack.c.b16 %v3169_v46, %v3167_v14  ;;  %v8188_v36 = vpack.c.b16 %v3170_v8, %v3168_v29  ;;  %vm2832_vm2 = vweird.f32 %v8149_v5  ;;  %v2815_v59 = vadd.f32 %v8125_v39, %v2814_v63  ;;  %v5261_v46 = vld [vmem:[%s9063_s5 + $0x2b4] sm:$0xf0]  ;;  %v4964_v8 = vld [vmem:[%s9063_s5 + $0x220] sm:$0xf] }
 0x4a5   : > { %v3129_v45 = vunpack.c.l.b16 %v3094_v25  ;;  %v3130_v62 = vunpack.c.h.b16 %v3094_v25  ;;  %v2829_v14 = vmul.f32 %v8149_v5, %v2828_v24  ;;  %vm8204_vm15 = vcmp.eq.f32.partialorder %v2835_v49, 8.507059e+37  ;;  %vm8224_vm7 = vmor %vm2831_vm0, %vm2832_vm2 }
 0x4a6   : > { %3887 = vmatmul.bf16.gmra.mxu2 %v8186_v43  ;;  %3916 = vmatmul.bf16.gmra.mxu3 %v8188_v36  ;;  %5392 = vrcp.f32 %v8118_v34  ;;  %v2819_v4 = vsel %vm2818_vm14, %v8125_v39, %v2815_v59  ;;  %v2838_v20 = vor.u32 1.1754944e-38, %v2837_v26  ;;  %v5036_v26 = vld [vmem:[%s9063_s5 + $0x2b0] sm:$0xf]  ;;  %v9182_v13 = vperm.slane %v7941_v58, 1  ;;  %v5194_v58 = vld [vmem:[%s9063_s5 + $0xa4] sm:$0xf] }
 0x4a7   : > { %v8215_v30 = vpack.c.b16 %v3129_v45, %v3127_v3  ;;  %v8217_v48 = vpack.c.b16 %v3130_v62, %v3128_v42  ;;  %v2824_v39 = vsel %vm8166_vm4, %v2823_v61, %v2819_v4  ;;  %v2830_v55 = vadd.f32 %v8149_v5, %v2829_v14  ;;  %v5178_v61 = vld [vmem:[%s9063_s5 + $0x24] sm:$0xf]  ;;  %v5243_v45 = vld [vmem:[%s9063_s5 + $0x224] sm:$0xf0]  ;;  %v5028_v62 = vld [vmem:[%s9063_s5 + $0x2a0] sm:$0xf] }
 0x4a8   : > { %5394 = vrcp.f32 %v8135_v53  ;;  %v8261_v25 = vadd.f32 %v9182_v13, %v8017_v38  ;;  %v8268_v42 = vmul.f32 %v2824_v39, %v7939_v27  ;;  %v4721_v63 = vor.u32 %v5180_v17, %v4718_v15  ;;  %v5259_v59 = vld [vmem:[%s9063_s5 + $0x2a4] sm:$0xf0] }
 0x4a9   : > { %3829 = vmatmul.bf16.gmra.mxu0 %v8215_v30  ;;  %3858 = vmatmul.bf16.gmra.mxu1 %v8217_v48  ;;  %5396 = vpow2.f32 %v7996_v52  ;;  %v2834_v3 = vsel %vm8224_vm7, %v8149_v5, %v2830_v55  ;;  %v4973_v24 = vor.u32 %v5245_v41, %v4972_v33  ;;  %v4774_v52 = vld [vmem:[%s9063_s5 + $0xa8] sm:$0xf0]  ;;  %vm2846_vm8 = vweird.f32 %v8118_v34 }
 0x4aa   : > { %v2839_v38 = vsel %vm8204_vm15, %v2838_v20, %v2834_v3  ;;  %v2850_v27 = vand.u32 2147483647, %v8118_v34  ;;  %v4785_v5 = vor.u32 %v5196_v28, %v4782_v9  ;;  %3994 = vmatpush.bf16.msra.mxu2 %v4721_v63  ;;  %v2977_v29 = vrot.slane %v8268_v42, 7 }
 0x4ab   : > { %v8290_v14 = vmul.f32 %v2839_v38, %v7950_v12  ;;  %3936 = vmatpush.bf16.msra.mxu0 %v4973_v24  ;;  %v5037_v15 = vor.u32 %v5261_v46, %v5036_v26  ;;  %v4713_v33 = vor.u32 %v5178_v61, %v4710_v7  ;;  %v2852_v49 = vand.u32 2147483648, %v8118_v34 }
 0x4ac   : > { %v5393_v17 = vpop.eup %5392  ;;  %4023 = vmatpush.bf16.msra.mxu3 %v4785_v5  ;;  %v4965_v20 = vor.u32 %v5243_v45, %v4964_v8  ;;  %v4777_v41 = vor.u32 %v5194_v58, %v4774_v52  ;;  %v2865_v39 = vand.u32 2147483647, %v8135_v53  ;;  %v2978_v12 = vsel %vm618_vm11, %v2973_v60, %v2977_v29 }
 0x4ad   : > { %v2842_v4 = vmul.f32 %v5393_v17, %v8118_v34  ;;  %v2979_v55 = vrot.slane %v8290_v14, 7  ;;  %3965 = vmatpush.bf16.msra.mxu1 %v5037_v15  ;;  %v5029_v9 = vor.u32 %v5259_v59, %v5028_v62  ;;  %vm2847_vm9 = vweird.f32 %v5393_v17 }
 0x4ae   : > { %v5395_v28 = vpop.eup %5394  ;;  %v2867_v7 = vand.u32 2147483648, %v8135_v53  ;;  %v8306_v8 = vpack.c.bf16 %v8290_v14, %v8268_v42  ;;  %v3067_v13 = vsel %vm9183_vm1, %v2978_v12, 0.0  ;;  %3995 = vmatpush.bf16.msra.mxu2 %v4713_v33  ;;  %5398 = vpow2.f32 %v8033_v31  ;;  %vm2848_vm3 = vmor %vm2846_vm8, %vm2847_vm9 }
 0x4af   : > { %v5397_v26 = vpop.eup %5396  ;;  %v2843_v46 = vsub.f32 1.0, %v2842_v4  ;;  %v2857_v61 = vmul.f32 %v5395_v28, %v8135_v53  ;;  %v2980_v60 = vsel %vm618_vm11, %v2975_v47, %v2979_v55  ;;  %3937 = vmatpush.bf16.msra.mxu0 %v4965_v20  ;;  %v4689_v45 = vmul.f32 -1.442695, %v8261_v25 }
 0x4b0   : > { %v3068_v24 = vsel %vm9184_vm12, %v2980_v60, 0.0  ;;  %4024 = vmatpush.bf16.msra.mxu3 %v4777_v41  ;;  %vm8319_vm5 = vcmp.eq.f32.partialorder %v2850_v27, 8.507059e+37  ;;  %v2853_v47 = vor.u32 1.1754944e-38, %v2852_v49  ;;  %v8324_v52 = vadd.f32 1.0, %v8084_v22 }
 0x4b1   : > { %v2844_v3 = vmul.f32 %v5393_v17, %v2843_v46  ;;  %v2858_v63 = vsub.f32 1.0, %v2857_v61  ;;  %3966 = vmatpush.bf16.msra.mxu1 %v5029_v9  ;;  %v8326_v38 = vadd.f32 1.0, %v5397_v26  ;;  %vm2862_vm0 = vweird.f32 %v5395_v28 }
 0x4b2   : > { %5400 = vpow2.f32 %v4689_v45  ;;  %vm2861_vm4 = vweird.f32 %v8135_v53  ;;  %vm8332_vm6 = vcmp.eq.f32.partialorder %v2865_v39, 8.507059e+37  ;;  %v8336_v62 = vpack.c.bf16 %v3068_v24, %v3067_v13 }
 0x4b3   : > { %v2845_v31 = vadd.f32 %v5393_v17, %v2844_v3  ;;  %v2859_v5 = vmul.f32 %v5395_v28, %v2858_v63  ;;  %5402 = vrcp.f32 %v8324_v52  ;;  %v2868_v15 = vor.u32 1.1754944e-38, %v2867_v7  ;;  %vm2863_vm13 = vmor %vm2861_vm4, %vm2862_vm0 }
 0x4b4   : > { %v3171_v33 = vunpack.c.l.b16 %v8306_v8  ;;  %v5399_v4 = vpop.eup %5398  ;;  %v3172_v53 = vunpack.c.h.b16 %v8306_v8  ;;  %v2882_v49 = vand.u32 2147483648, %v8324_v52  ;;  %5404 = vrcp.f32 %v8326_v38 }
 0x4b5   : > { %v2849_v22 = vsel %vm2848_vm3, %v5393_v17, %v2845_v31  ;;  %v2860_v59 = vadd.f32 %v5395_v28, %v2859_v5  ;;  %v8348_v17 = vadd.f32 1.0, %v5399_v4  ;;  %v2880_v39 = vand.u32 2147483647, %v8324_v52  ;;  %v5012_v4 = vld [vmem:[%s9063_s5 + $0x280] sm:$0xf] }
 0x4b6   : > { %v2854_v34 = vsel %vm8319_vm5, %v2853_v47, %v2849_v22  ;;  %v3131_v9 = vunpack.c.l.b16 %v8336_v62  ;;  %v3132_v26 = vunpack.c.h.b16 %v8336_v62  ;;  %v2897_v46 = vand.u32 2147483648, %v8326_v38 }
 0x4b7   : > { %v2864_v20 = vsel %vm2863_vm13, %v5395_v28, %v2860_v59  ;;  %v8346_v41 = vmul.f32 %v2854_v34, %v7954_v19  ;;  %vm2876_vm2 = vweird.f32 %v8324_v52  ;;  %5406 = vrcp.f32 %v8348_v17 }
 0x4b8   : > { %v2869_v12 = vsel %vm8332_vm6, %v2868_v15, %v2864_v20  ;;  %v5401_v61 = vpop.eup %5400  ;;  %v2883_v60 = vor.u32 1.1754944e-38, %v2882_v49  ;;  %v2895_v13 = vand.u32 2147483647, %v8326_v38  ;;  %v2912_v3 = vand.u32 2147483648, %v8348_v17 }
 0x4b9   : > { %v8357_v7 = vmul.f32 %v2869_v12, %v7964_v10  ;;  %v9083_v19 = vrot.slane %v8346_v41, 7  ;;  %v8362_v28 = vpop.eup %5402  ;;  %v8364_v8 = vadd.f32 1.0, %v5401_v61  ;;  %vm8378_vm14 = vcmp.eq.f32.partialorder %v2880_v39, 8.507059e+37 }
 0x4ba   : > { %v2872_v45 = vmul.f32 %v8362_v28, %v8324_v52  ;;  %v8382_v47 = vpop.eup %5404  ;;  %vm2877_vm15 = vweird.f32 %v8362_v28  ;;  %vm2891_vm7 = vweird.f32 %v8326_v38  ;;  %v8386_v31 = vor.u32 1.1754944e-38, %v2897_v46 }
 0x4bb   : > { %v3104_v63 = vpack.c.bf16 %v8357_v7, %v8346_v41  ;;  %v2982_v10 = vsel %vm618_vm11, %v2977_v29, %v9083_v19  ;;  %v9082_v24 = vrot.slane %v8357_v7, 7  ;;  %v2910_v5 = vand.u32 2147483647, %v8348_v17  ;;  %vm2878_vm3 = vmor %vm2876_vm2, %vm2877_vm15 }
 0x4bc   : > { %5408 = vrcp.f32 %v8364_v8  ;;  %v2873_v22 = vsub.f32 1.0, %v2872_v45  ;;  %v2887_v15 = vmul.f32 %v8382_v47, %v8326_v38  ;;  %vm2892_vm8 = vweird.f32 %v8382_v47 }
 0x4bd   : > { %v3173_v29 = vunpack.c.l.b16 %v3104_v63  ;;  %v3174_v27 = vunpack.c.h.b16 %v3104_v63  ;;  %v2984_v62 = vsel %vm618_vm11, %v2979_v55, %v9082_v24  ;;  %vm8398_vm9 = vcmp.eq.f32.partialorder %v2895_v13, 8.507059e+37  ;;  %v8405_v49 = vpop.eup %5406  ;;  %vm2893_vm13 = vmor %vm2891_vm7, %vm2892_vm8 }
 0x4be   : > { %v3096_v59 = vpack.c.bf16 %v2984_v62, %v2982_v10  ;;  %vm2906_vm1 = vweird.f32 %v8348_v17  ;;  %v8403_v34 = vor.u32 1.1754944e-38, %v2912_v3  ;;  %v2874_v39 = vmul.f32 %v8362_v28, %v2873_v22 }
 0x4bf   : > { %v8407_v20 = vpack.c.b16 %v3173_v29, %v3171_v33  ;;  %v8409_v55 = vpack.c.b16 %v3174_v27, %v3172_v53  ;;  %v2925_v12 = vand.u32 2147483647, %v8364_v8  ;;  %v2888_v13 = vsub.f32 1.0, %v2887_v15  ;;  %v5176_v33 = vld [vmem:[%s9063_s5 + $0x14] sm:$0xf] }
 0x4c0   : > { %v3133_v46 = vunpack.c.l.b16 %v3096_v59  ;;  %v3134_v61 = vunpack.c.h.b16 %v3096_v59  ;;  %v2902_v63 = vmul.f32 %v8405_v49, %v8348_v17  ;;  %vm8415_vm12 = vcmp.eq.f32.partialorder %v2910_v5, 8.507059e+37  ;;  %v4702_v53 = vld [vmem:[%s9063_s5 + $0x18] sm:$0xf0]  ;;  %v4956_v5 = vld [vmem:[%s9063_s5 + $0x210] sm:$0xf] }
 0x4c1   : > { %9193 = vst [vmem:[#allocation2_spill] sm:$0xff] %v8409_v55  ;;  %3892 = vmatmul.bf16.gmra.mxu2 %v8407_v20  ;;  %3921 = vmatmul.bf16.gmra.mxu3 %v8409_v55  ;;  %v2875_v3 = vadd.f32 %v8362_v28, %v2874_v39  ;;  %vm2907_vm5 = vweird.f32 %v8405_v49  ;;  %vm2921_vm0 = vweird.f32 %v8364_v8  ;;  %v2927_v45 = vand.u32 2147483648, %v8364_v8  ;;  %v5241_v29 = vld [vmem:[%s9063_s5 + $0x214] sm:$0xf0]  ;;  %v5192_v39 = vld [vmem:[%s9063_s5 + $0x94] sm:$0xf] }
 0x4c2   : > { %v8437_v27 = vpop.eup %5408  ;;  %v8439_v62 = vpack.c.b16 %v3133_v46, %v3131_v9  ;;  %v8441_v22 = vpack.c.b16 %v3134_v61, %v3132_v26  ;;  %v2889_v59 = vmul.f32 %v8382_v47, %v2888_v13  ;;  %v2903_v15 = vsub.f32 1.0, %v2902_v63  ;;  %v5020_v46 = vld [vmem:[%s9063_s5 + $0x290] sm:$0xf]  ;;  %v5257_v61 = vld [vmem:[%s9063_s5 + $0x294] sm:$0xf0]  ;;  %vm8508_vm2 = vmor %vm2906_vm1, %vm2907_vm5 }
 0x4c3   : > { %v2879_v9 = vsel %vm2878_vm3, %v8362_v28, %v2875_v3  ;;  %v2917_v26 = vmul.f32 %v8437_v27, %v8364_v8  ;;  %vm2922_vm4 = vweird.f32 %v8437_v27  ;;  %vm8458_vm6 = vcmp.eq.f32.partialorder %v2925_v12, 8.507059e+37  ;;  %v5174_v3 = vld [vmem:[%s9063_s5 + $0x4] sm:$0xf] }
 0x4c4   : > { %3834 = vmatmul.bf16.gmra.mxu0 %v8439_v62  ;;  %3863 = vmatmul.bf16.gmra.mxu1 %v8441_v22  ;;  %v2884_v28 = vsel %vm8378_vm14, %v2883_v60, %v2879_v9  ;;  %v2890_v12 = vadd.f32 %v8382_v47, %v2889_v59  ;;  %v2904_v13 = vmul.f32 %v8405_v49, %v2903_v15  ;;  %v2928_v63 = vor.u32 1.1754944e-38, %v2927_v45  ;;  %v4948_v45 = vld [vmem:[%s9063_s5 + $0x200] sm:$0xf]  ;;  %v5239_v9 = vld [vmem:[%s9063_s5 + $0x204] sm:$0xf0]  ;;  %vm2923_vm14 = vmor %vm2921_vm0, %vm2922_vm4 }
 0x4c5   : > { %v2918_v58 = vsub.f32 1.0, %v2917_v26  ;;  %v8485_v60 = vmul.f32 %v2884_v28, %v7967_v11  ;;  %v4705_v59 = vor.u32 %v5176_v33, %v4702_v53  ;;  %v4957_v15 = vor.u32 %v5241_v29, %v4956_v5  ;;  %v5190_v11 = vld [vmem:[%s9063_s5 + $0x84] sm:$0xf]  ;;  %v4758_v33 = vld [vmem:[%s9063_s5 + $0x88] sm:$0xf0] }
 0x4c6   : > { %v2894_v24 = vsel %vm2893_vm13, %v8382_v47, %v2890_v12  ;;  %v2905_v19 = vadd.f32 %v8405_v49, %v2904_v13  ;;  %v4769_v38 = vor.u32 %v5192_v39, %v4766_v6  ;;  %v5021_v55 = vor.u32 %v5257_v61, %v5020_v46  ;;  %v5006_v26 = vld [vmem:[%s9063_s5 + $0x278] sm:$0xf0] }
 0x4c7   : > { %v2899_v53 = vsel %vm8398_vm9, %v8386_v31, %v2894_v24  ;;  %v2919_v6 = vmul.f32 %v8437_v27, %v2918_v58  ;;  %3996 = vmatpush.bf16.msra.mxu2 %v4705_v59  ;;  %v2985_v5 = vrot.slane %v8485_v60, 7  ;;  %3938 = vmatpush.bf16.msra.mxu0 %v4957_v15  ;;  %v4697_v29 = vor.u32 %v5174_v3, %v4694_v0  ;;  %v5255_v24 = vld [vmem:[%s9063_s5 + $0x284] sm:$0xf0]  ;;  %v5252_v0 = vld [vmem:[%s9063_s5 + $0x274] sm:$0xf] }
 0x4c8   : > { %v2909_v17 = vsel %vm8508_vm2, %v8405_v49, %v2905_v19  ;;  %v8524_v31 = vmul.f32 %v2899_v53, %v7977_v57  ;;  %4025 = vmatpush.bf16.msra.mxu3 %v4769_v38  ;;  %3967 = vmatpush.bf16.msra.mxu1 %v5021_v55  ;;  %v4949_v39 = vor.u32 %v5239_v9, %v4948_v45  ;;  %v3011_v46 = vrot.slane %v7808_v44, 1  ;;  %v4878_v58 = vld [vmem:[%s9063_s5 + $0x178] sm:$0xf0] }
 0x4c9   : > { %v2914_v19 = vsel %vm8415_vm12, %v8403_v34, %v2909_v17  ;;  %v2920_v57 = vadd.f32 %v8437_v27, %v2919_v6  ;;  %v9200_v49 = vrot.slane %v8346_v41, 7  ;;  %v4761_v61 = vor.u32 %v5190_v11, %v4758_v33 }
 0x4ca   : > { %v8545_v28 = vmul.f32 %v2914_v19, %v7988_v50  ;;  %v3105_v44 = vpack.c.bf16 %v8524_v31, %v8485_v60  ;;  %v2987_v34 = vrot.slane %v8524_v31, 7  ;;  %v3012_v10 = vrot.slane %v7839_v18, 1  ;;  %v5220_v50 = vld [vmem:[%s9063_s5 + $0x174] sm:$0xf]  ;;  %v4942_v19 = vld [vmem:[%s9063_s5 + $0x1f8] sm:$0xf0] }
 0x4cb   : > { %v2986_v55 = vsel %vm618_vm11, %v9200_v49, %v2985_v5  ;;  %v2924_v12 = vsel %vm2923_vm14, %v8437_v27, %v2920_v57  ;;  %vm9201_vm15 = vcmp.ne.s32.totalorder %v6018_v2, 0  ;;  %3997 = vmatpush.bf16.msra.mxu2 %v4697_v29  ;;  %3939 = vmatpush.bf16.msra.mxu0 %v4949_v39  ;;  %v5013_v3 = vor.u32 %v5255_v24, %v5012_v4  ;;  %v5236_v24 = vld [vmem:[%s9063_s5 + $0x1f4] sm:$0xf]  ;;  %v5250_v57 = vld [vmem:[%s9063_s5 + $0x264] sm:$0xf] }
 0x4cc   : > { %v3071_v13 = vsel %vm9201_vm15, %v2986_v55, 0.0  ;;  %v5009_v8 = vor.u32 %v5252_v0, %v5006_v26  ;;  %v2929_v18 = vsel %vm8458_vm6, %v2928_v63, %v2924_v12  ;;  %v3175_v59 = vunpack.c.l.b16 %v3105_v44  ;;  %4026 = vmatpush.bf16.msra.mxu3 %v4761_v61  ;;  %vm9203_vm7 = vmmov %vm9201_vm15  ;;  %v4998_v49 = vld [vmem:[%s9063_s5 + $0x268] sm:$0xf0] }
 0x4cd   : > { %v9202_v27 = vrot.slane %v8357_v7, 7  ;;  %v3014_v45 = vrot.slane %v7818_v32, 1  ;;  %v8567_v9 = vmul.f32 %v2929_v18, %v8261_v25  ;;  %v3176_v38 = vunpack.c.h.b16 %v3105_v44  ;;  %3968 = vmatpush.bf16.msra.mxu1 %v5013_v3  ;;  %v5268_v32 = vld [vmem:[%s9063_s5 + $0x2f4] sm:$0xf] }
 0x4ce   : > { %v2989_v11 = vrot.slane %v8545_v28, 7  ;;  %v3015_v63 = vrot.slane %v7862_v51, 1  ;;  %v9204_v53 = vrot.slane %v8123_v56, 1  ;;  %v4881_v6 = vor.u32 %v5220_v50, %v4878_v58  ;;  %v5070_v51 = vld [vmem:[%s9063_s5 + $0x2f8] sm:$0xf0] }
 0x4cf   : > { %v2988_v15 = vsel %vm618_vm11, %v9202_v27, %v2987_v34  ;;  %4106 = vmatpush.bf16.msrb.mxu2 %v5009_v8  ;;  %v3106_v25 = vpack.c.bf16 %v8567_v9, %v8545_v28  ;;  %v2991_v29 = vrot.slane %v8567_v9, 7  ;;  %vm9205_vm8 = vcmp.ne.s32.totalorder %v6557_v16, 15  ;;  %v4870_v50 = vld [vmem:[%s9063_s5 + $0x168] sm:$0xf0]  ;;  %v4974_v16 = vld [vmem:[%s9063_s5 + $0x238] sm:$0xf0] }
 0x4d0   : > { %v3072_v33 = vsel %vm9203_vm7, %v2988_v15, 0.0  ;;  %v3018_v47 = vsel %vm1093_vm10, %v3012_v10, %v9204_v53  ;;  %v2990_v2 = vsel %vm618_vm11, %v2985_v5, %v2989_v11  ;;  %v3013_v39 = vsel %vm1093_vm10, %v3011_v46, %v3012_v10  ;;  %4048 = vmatpush.bf16.msrb.mxu0 %v4881_v6  ;;  %vm9207_vm9 = vmmov %vm9205_vm8  ;;  %v5218_v10 = vld [vmem:[%s9063_s5 + $0x164] sm:$0xf]  ;;  %v5062_v58 = vld [vmem:[%s9063_s5 + $0x2e8] sm:$0xf0] }
 0x4d1   : > { %v3097_v52 = vpack.c.bf16 %v3072_v33, %v3071_v13  ;;  %v3077_v4 = vsel %vm9205_vm8, %v3018_v47, 0.0  ;;  %v3016_v0 = vsel %vm1093_vm10, %v3014_v45, %v3015_v63  ;;  %v9206_v5 = vrot.slane %v8133_v21, 1  ;;  %v4934_v53 = vld [vmem:[%s9063_s5 + $0x1e8] sm:$0xf0]  ;;  %v5248_v47 = vld [vmem:[%s9063_s5 + $0x254] sm:$0xf]  ;;  %vm9211_vm1 = vmmov %vm9205_vm8 }
 0x4d2   : > { %v3177_v46 = vunpack.c.l.b16 %v3106_v25  ;;  %v3178_v55 = vunpack.c.h.b16 %v3106_v25  ;;  %v2992_v61 = vsel %vm618_vm11, %v2987_v34, %v2991_v29  ;;  %v5073_v8 = vor.u32 %v5268_v32, %v5070_v51  ;;  %v5266_v34 = vld [vmem:[%s9063_s5 + $0x2e4] sm:$0xf]  ;;  %v4990_v6 = vld [vmem:[%s9063_s5 + $0x258] sm:$0xf0]  ;;  %vm9210_vm11 = vmmov %vm9205_vm8 }
 0x4d3   : > { %v3135_v17 = vunpack.c.l.b16 %v3097_v52  ;;  %v3020_v26 = vsel %vm1093_vm10, %v3015_v63, %v9206_v5  ;;  %v3098_v12 = vpack.c.bf16 %v2992_v61, %v2990_v2  ;;  %v3136_v13 = vunpack.c.h.b16 %v3097_v52  ;;  %v5234_v63 = vld [vmem:[%s9063_s5 + $0x1e4] sm:$0xf]  ;;  %vm9212_vm12 = vmmov %vm9211_vm1 }
 0x4d4   : > { %v3078_v44 = vsel %vm9207_vm9, %v3020_v26, 0.0  ;;  %v8622_v18 = vpack.c.b16 %v3177_v46, %v3175_v59  ;;  %v8624_v27 = vpack.c.b16 %v3178_v55, %v3176_v38  ;;  %v4945_v15 = vor.u32 %v5236_v24, %v4942_v19  ;;  %4135 = vmatpush.bf16.msrb.mxu3 %v5073_v8  ;;  %v5232_v46 = vld [vmem:[%s9063_s5 + $0x1d4] sm:$0xf]  ;;  %vm9213_vm5 = vmmov %vm9211_vm1 }
 0x4d5   : > { %v8611_v3 = vpack.c.bf16 %v3078_v44, %v3077_v4  ;;  %v5001_v45 = vor.u32 %v5250_v57, %v4998_v49  ;;  %v3137_v11 = vunpack.c.l.b16 %v3098_v12  ;;  %v3138_v33 = vunpack.c.h.b16 %v3098_v12  ;;  %v5054_v49 = vld [vmem:[%s9063_s5 + $0x2d8] sm:$0xf0]  ;;  %v5246_v12 = vld [vmem:[%s9063_s5 + $0x244] sm:$0xf]  ;;  %vm9214_vm0 = vmmov %vm9211_vm1 }
 0x4d6   : > { %v8626_v52 = vpack.c.bf16 %v3016_v0, %v3013_v39  ;;  %3897 = vmatmul.bf16.gmra.mxu2 %v8622_v18  ;;  %3926 = vmatmul.bf16.gmra.mxu3 %v8624_v27  ;;  %v4873_v59 = vor.u32 %v5218_v10, %v4870_v50  ;;  %v5065_v38 = vor.u32 %v5266_v34, %v5062_v58  ;;  %v3021_v2 = vrot.slane %v8139_v54, 1  ;;  %v5216_v54 = vld [vmem:[%s9063_s5 + $0x154] sm:$0xf]  ;;  %v4926_v10 = vld [vmem:[%s9063_s5 + $0x1d8] sm:$0xf0]  ;;  %vm9215_vm3 = vmmov %vm9214_vm0 }
 0x4d7   : > { %v8642_v32 = vpack.c.b16 %v3137_v11, %v3135_v17  ;;  %v8644_v25 = vpack.c.b16 %v3138_v33, %v3136_v13  ;;  %4077 = vmatpush.bf16.msrb.mxu1 %v4945_v15  ;;  %4107 = vmatpush.bf16.msrb.mxu2 %v5001_v45  ;;  %v4937_v29 = vor.u32 %v5234_v63, %v4934_v53  ;;  %v3023_v51 = vrot.slane %v8152_v37, 1  ;;  %v4862_v37 = vld [vmem:[%s9063_s5 + $0x158] sm:$0xf0]  ;;  %v4982_v13 = vld [vmem:[%s9063_s5 + $0x248] sm:$0xf0] }
 0x4d8   : > { %4049 = vmatpush.bf16.msrb.mxu0 %v4873_v59  ;;  %v4993_v4 = vor.u32 %v5248_v47, %v4990_v6  ;;  %v3203_v24 = vunpack.c.l.b16 %v8626_v52  ;;  %v9208_v17 = vrot.slane %v8123_v56, 1  ;;  %v3025_v0 = vrot.slane %v8268_v42, 1  ;;  %4136 = vmatpush.bf16.msrb.mxu3 %v5065_v38  ;;  %v5214_v15 = vld [vmem:[%s9063_s5 + $0x144] sm:$0xf]  ;;  %v4854_v45 = vld [vmem:[%s9063_s5 + $0x148] sm:$0xf0] }
 0x4d9   : > { %3839 = vmatmul.bf16.gmra.mxu0 %v8642_v32  ;;  %3868 = vmatmul.bf16.gmra.mxu1 %v8644_v25  ;;  %v3027_v5 = vrot.slane %v8290_v14, 1  ;;  %v3205_v26 = vunpack.c.l.b16 %v8611_v3  ;;  %v3204_v19 = vunpack.c.h.b16 %v8626_v52  ;;  %v9209_v56 = vrot.slane %v8133_v21, 1  ;;  %v5264_v14 = vld [vmem:[%s9063_s5 + $0x2d4] sm:$0xf]  ;;  %v5262_v59 = vld [vmem:[%s9063_s5 + $0x2c4] sm:$0xf] }
 0x4da   : > { %v3022_v39 = vsel %vm1093_vm10, %v9208_v17, %v3021_v2  ;;  %v4865_v42 = vor.u32 %v5216_v54, %v4862_v37  ;;  %v3206_v55 = vunpack.c.h.b16 %v8611_v3  ;;  %v3026_v21 = vsel %vm1093_vm10, %v3021_v2, %v3025_v0  ;;  %v5046_v38 = vld [vmem:[%s9063_s5 + $0x2c8] sm:$0xf0]  ;;  %v5230_v47 = vld [vmem:[%s9063_s5 + $0x1c4] sm:$0xf]  ;;  %v5212_v52 = vld [vmem:[%s9063_s5 + $0x134] sm:$0xf] }
 0x4db   : > { %v3024_v57 = vsel %vm1093_vm10, %v9209_v56, %v3023_v51  ;;  %4078 = vmatpush.bf16.msrb.mxu1 %v4937_v29  ;;  %4108 = vmatpush.bf16.msrb.mxu2 %v4993_v4  ;;  %v3028_v61 = vsel %vm1093_vm10, %v3023_v51, %v3027_v5  ;;  %v3081_v8 = vsel %vm9210_vm11, %v3026_v21, 0.0  ;;  %v5057_v34 = vor.u32 %v5264_v14, %v5054_v49  ;;  %v4918_v29 = vld [vmem:[%s9063_s5 + $0x1c8] sm:$0xf0]  ;;  %v4846_v3 = vld [vmem:[%s9063_s5 + $0x138] sm:$0xf0] }
 0x4dc   : > { %v3109_v44 = vpack.c.bf16 %v3024_v57, %v3022_v39  ;;  %v3082_v50 = vsel %vm9211_vm1, %v3028_v61, 0.0  ;;  %4050 = vmatpush.bf16.msrb.mxu0 %v4865_v42  ;;  %v4929_v58 = vor.u32 %v5232_v46, %v4926_v10  ;;  %v4985_v53 = vor.u32 %v5246_v12, %v4982_v13 }
 0x4dd   : > { %v3110_v11 = vpack.c.bf16 %v3082_v50, %v3081_v8  ;;  %4137 = vmatpush.bf16.msrb.mxu3 %v5057_v34  ;;  %v4857_v6 = vor.u32 %v5214_v15, %v4854_v45  ;;  %v5049_v2 = vor.u32 %v5262_v59, %v5046_v38  ;;  %v3029_v4 = vrot.slane %v8346_v41, 1  ;;  %v5038_v38 = vld [vmem:[%s9063_s5 + $0x2b8] sm:$0xf0] }
 0x4de   : > { %v3207_v33 = vunpack.c.l.b16 %v3109_v44  ;;  %v3208_v63 = vunpack.c.h.b16 %v3109_v44  ;;  %v3031_v51 = vrot.slane %v8357_v7, 1  ;;  %v4921_v54 = vor.u32 %v5230_v47, %v4918_v29  ;;  %v5228_v47 = vld [vmem:[%s9063_s5 + $0x1b4] sm:$0xf] }
 0x4df   : > { %v3209_v17 = vunpack.c.l.b16 %v3110_v11  ;;  %v3210_v39 = vunpack.c.h.b16 %v3110_v11  ;;  %4079 = vmatpush.bf16.msrb.mxu1 %v4929_v58  ;;  %4109 = vmatpush.bf16.msrb.mxu2 %v4985_v53  ;;  %v3033_v37 = vrot.slane %v8485_v60, 1  ;;  %v3030_v56 = vsel %vm1093_vm10, %v3025_v0, %v3029_v4  ;;  %v5244_v58 = vld [vmem:[%s9063_s5 + $0x234] sm:$0xf] }
 0x4e0   : > { %4051 = vmatpush.bf16.msrb.mxu0 %v4857_v6  ;;  %v3032_v57 = vsel %vm1093_vm10, %v3027_v5, %v3031_v51  ;;  %v3035_v42 = vrot.slane %v8524_v31, 1  ;;  %v3037_v14 = vrot.slane %v8545_v28, 1  ;;  %v3039_v5 = vrot.slane %v8567_v9, 1  ;;  %v4910_v6 = vld [vmem:[%s9063_s5 + $0x1b8] sm:$0xf0] }
 0x4e1   : > { %v8717_v49 = vpack.c.b16 %v3209_v17, %v3207_v33  ;;  %v8719_v41 = vpack.c.b16 %v3210_v39, %v3208_v63  ;;  %v3034_v7 = vsel %vm1093_vm10, %v3029_v4, %v3033_v37  ;;  %v3111_v46 = vpack.c.bf16 %v3032_v57, %v3030_v56  ;;  %4138 = vmatpush.bf16.msrb.mxu3 %v5049_v2  ;;  %v5242_v17 = vld [vmem:[%s9063_s5 + $0x224] sm:$0xf]  ;;  %v4966_v39 = vld [vmem:[%s9063_s5 + $0x228] sm:$0xf0] }
 0x4e2   : > { %v3036_v21 = vsel %vm1093_vm10, %v3031_v51, %v3035_v42  ;;  %v3085_v60 = vsel %vm9212_vm12, %v3034_v7, 0.0  ;;  %v3038_v0 = vsel %vm1093_vm10, %v3033_v37, %v3037_v14  ;;  %v3057_v44 = vsel %vm1093_vm10, %v3037_v14, 0.0  ;;  %v4838_v56 = vld [vmem:[%s9063_s5 + $0x128] sm:$0xf0]  ;;  %v5258_v57 = vld [vmem:[%s9063_s5 + $0x2a4] sm:$0xf] }
 0x4e3   : > { %4080 = vmatpush.bf16.msrb.mxu1 %v4921_v54  ;;  %v3086_v31 = vsel %vm9213_vm5, %v3036_v21, 0.0  ;;  %v3211_v28 = vunpack.c.l.b16 %v3111_v46  ;;  %v3212_v61 = vunpack.c.h.b16 %v3111_v46  ;;  %v3040_v12 = vsel %vm1093_vm10, %v3035_v42, %v3039_v5  ;;  %v5210_v54 = vld [vmem:[%s9063_s5 + $0x124] sm:$0xf]  ;;  %v5030_v42 = vld [vmem:[%s9063_s5 + $0x2a8] sm:$0xf0] }
 0x4e4   : > { %v3112_v10 = vpack.c.bf16 %v3086_v31, %v3085_v60  ;;  %v3058_v13 = vsel %vm1093_vm10, %v3039_v5, 0.0  ;;  %v3089_v8 = vsel %vm9214_vm0, %v3057_v44, 0.0  ;;  %v3113_v9 = vpack.c.bf16 %v3040_v12, %v3038_v0  ;;  %v5226_v46 = vld [vmem:[%s9063_s5 + $0x1a4] sm:$0xf]  ;;  %v4902_v21 = vld [vmem:[%s9063_s5 + $0x1a8] sm:$0xf0] }
 0x4e5   : > { %v3090_v50 = vsel %vm9215_vm3, %v3058_v13, 0.0  ;;  %v8742_v34 = vpack.c.b16 %v3205_v26, %v3203_v24  ;;  %v4913_v51 = vor.u32 %v5228_v47, %v4910_v6  ;;  %v4969_v37 = vor.u32 %v5242_v17, %v4966_v39  ;;  %v5240_v0 = vld [vmem:[%s9063_s5 + $0x214] sm:$0xf]  ;;  %v4958_v5 = vld [vmem:[%s9063_s5 + $0x218] sm:$0xf0] }
 0x4e6   : > { %3998 = vmatmul.bf16.vlgmr.msra.gmra.mxu2 %v7922_v35  ;;  %4027 = vmatmul.bf16.vlgmr.msra.gmra.mxu3 %v7924_v40  ;;  %v3213_v15 = vunpack.c.l.b16 %v3112_v10  ;;  %v3214_v45 = vunpack.c.h.b16 %v3112_v10  ;;  %v3114_v11 = vpack.c.bf16 %v3090_v50, %v3089_v8  ;;  %v8754_v35 = vpack.c.b16 %v3206_v55, %v3204_v19  ;;  %v5260_v19 = vld [vmem:[%s9063_s5 + $0x2b4] sm:$0xf]  ;;  %v5022_v44 = vld [vmem:[%s9063_s5 + $0x298] sm:$0xf0]  ;;  %v5238_v50 = vld [vmem:[%s9063_s5 + $0x204] sm:$0xf] }
 0x4e7   : > { %v4977_v40 = vor.u32 %v5244_v58, %v4974_v16  ;;  %v3215_v24 = vunpack.c.l.b16 %v3113_v9  ;;  %v3216_v26 = vunpack.c.h.b16 %v3113_v9  ;;  %v4849_v55 = vor.u32 %v5212_v52, %v4846_v3  ;;  %4081 = vmatpush.bf16.msrb.mxu1 %v4913_v51  ;;  %v5224_v10 = vld [vmem:[%s9063_s5 + $0x194] sm:$0xf]  ;;  %v4894_v12 = vld [vmem:[%s9063_s5 + $0x198] sm:$0xf0]  ;;  %v4950_v9 = vld [vmem:[%s9063_s5 + $0x208] sm:$0xf0] }
 0x4e8   : > { %v8756_v33 = vpack.c.b16 %v3213_v15, %v3211_v28  ;;  %v8758_v63 = vpack.c.b16 %v3214_v45, %v3212_v61  ;;  %v3217_v53 = vunpack.c.l.b16 %v3114_v11  ;;  %v3218_v59 = vunpack.c.h.b16 %v3114_v11  ;;  %v5208_v28 = vld [vmem:[%s9063_s5 + $0x114] sm:$0xf]  ;;  %v5206_v58 = vld [vmem:[%s9063_s5 + $0x104] sm:$0xf]  ;;  %v4822_v15 = vld [vmem:[%s9063_s5 + $0x108] sm:$0xf0] }
 0x4e9   : > { %3940 = vmatmul.bf16.vlgmr.msra.gmra.mxu0 %v8742_v34  ;;  %3969 = vmatmul.bf16.vlgmr.msra.gmra.mxu1 %v8754_v35  ;;  %v5041_v4 = vor.u32 %v5260_v19, %v5038_v38  ;;  %v4841_v14 = vor.u32 %v5210_v54, %v4838_v56  ;;  %v5033_v7 = vor.u32 %v5258_v57, %v5030_v42  ;;  %v5254_v45 = vld [vmem:[%s9063_s5 + $0x284] sm:$0xf]  ;;  %v5014_v11 = vld [vmem:[%s9063_s5 + $0x288] sm:$0xf0] }
 0x4ea   : > { %4110 = vmatpush.bf16.msrb.mxu2 %v4977_v40  ;;  %v8780_v2 = vpack.c.b16 %v3217_v53, %v3215_v24  ;;  %v8782_v29 = vpack.c.b16 %v3218_v59, %v3216_v26  ;;  %4052 = vmatpush.bf16.msrb.mxu0 %v4849_v55  ;;  %v4905_v60 = vor.u32 %v5226_v46, %v4902_v21  ;;  %v5222_v26 = vld [vmem:[%s9063_s5 + $0x184] sm:$0xf]  ;;  %v4886_v53 = vld [vmem:[%s9063_s5 + $0x188] sm:$0xf0] }
 0x4eb   : > { %4139 = vmatpush.bf16.msrb.mxu3 %v5041_v4  ;;  %v4961_v31 = vor.u32 %v5240_v0, %v4958_v5  ;;  %v4897_v8 = vor.u32 %v5224_v10, %v4894_v12  ;;  %v4953_v16 = vor.u32 %v5238_v50, %v4950_v9  ;;  %v4825_v40 = vor.u32 %v5206_v58, %v4822_v15  ;;  %v8905_v56 = vld [vmem:[%s9059_s1 + $0x5] ss:$8 sm:$0x3] }
 0x4ec   : > { %4082 = vmatpush.bf16.msrb.mxu1 %v4905_v60  ;;  %v5017_v24 = vor.u32 %v5254_v45, %v5014_v11  ;;  %v4889_v59 = vor.u32 %v5222_v26, %v4886_v53  ;;  %v5448_v12 = vld [vmem:[%s5553_s24] sm:$0xff]  ;;  %v5449_v26 = vld [vmem:[%s5553_s24 + $0x10] sm:$0xff] }
 0x4ee   : > { %4111 = vmatpush.bf16.msrb.mxu2 %v4969_v37  ;;  %4053 = vmatpush.bf16.msrb.mxu0 %v4841_v14 }
 0x4ef   : > { %4140 = vmatpush.bf16.msrb.mxu3 %v5033_v7 }
 0x4f0   : > { %4083 = vmatpush.bf16.msrb.mxu1 %v4897_v8 }
 0x4f2   : > { %4112 = vmatpush.bf16.msrb.mxu2 %v4961_v31 }
 0x4f4   : > { %4084 = vmatpush.bf16.msrb.mxu1 %v4889_v59 }
 0x4f6   : > { %4003 = vmatmul.bf16.gmra.mxu2 %v8215_v30  ;;  %4032 = vmatmul.bf16.gmra.mxu3 %v8217_v48  ;;  %v4830_v30 = vld [vmem:[%s9063_s5 + $0x118] sm:$0xf0]  ;;  %v5256_v48 = vld [vmem:[%s9063_s5 + $0x294] sm:$0xf] }
 0x4f7   : > { %v4833_v61 = vor.u32 %v5208_v28, %v4830_v30  ;;  %v5025_v13 = vor.u32 %v5256_v48, %v5022_v44  ;;  %4113 = vmatpush.bf16.msrb.mxu2 %v4953_v16 }
 0x4f9   : > { %3945 = vmatmul.bf16.gmra.mxu0 %v8717_v49  ;;  %3974 = vmatmul.bf16.gmra.mxu1 %v8719_v41 }
 0x4fa   : > { %4054 = vmatpush.bf16.msrb.mxu0 %v4833_v61  ;;  %4141 = vmatpush.bf16.msrb.mxu3 %v5025_v13 }
 0x4fd   : > { %v3825_v52 = vpop.f32.mrf.mxu0  ;;  %v3854_v3 = vpop.f32.mrf.mxu1 }
 0x4fe   : > { %4055 = vmatpush.bf16.msrb.mxu0 %v4825_v40  ;;  %4142 = vmatpush.bf16.msrb.mxu3 %v5017_v24 }
 0x4ff   : > { %v3883_v19 = vpop.f32.mrf.mxu2 }
 0x500   : > { %v3912_v55 = vpop.f32.mrf.mxu3 }
 0x505   : > { %v3827_v38 = vpop.f32.mrf.mxu0 }
 0x506   : > { %4008 = vmatmul.bf16.gmra.mxu2 %v8439_v62  ;;  %4037 = vmatmul.bf16.gmra.mxu3 %v8441_v22  ;;  %v3856_v62 = vpop.f32.mrf.mxu1 }
 0x507   : > { %v3885_v22 = vpop.f32.mrf.mxu2 }
 0x508   : > { %v3914_v47 = vpop.f32.mrf.mxu3 }
 0x509   : > { %3950 = vmatmul.bf16.gmra.mxu0 %v8756_v33  ;;  %3979 = vmatmul.bf16.gmra.mxu1 %v8758_v63 }
 0x516   : > { %4013 = vmatmul.bf16.gmra.mxu2 %v8642_v32  ;;  %4042 = vmatmul.bf16.gmra.mxu3 %v8644_v25 }
 0x519   : > { %3955 = vmatmul.bf16.gmra.mxu0 %v8780_v2  ;;  %3984 = vmatmul.bf16.gmra.mxu1 %v8782_v29 }
 0x526   : > { %4114 = vmatmul.bf16.vlgmr.msrb.gmra.mxu2 %v8742_v34  ;;  %4143 = vmatmul.bf16.vlgmr.msrb.gmra.mxu3 %v8754_v35  ;;  %v3830_v32 = vpop.f32.mrf.mxu0  ;;  %v3859_v25 = vpop.f32.mrf.mxu1 }
 0x529   : > { %4056 = vmatmul.bf16.vlgmr.msrb.gmra.mxu0 %v7912_v1  ;;  %4085 = vmatmul.bf16.vlgmr.msrb.gmra.mxu1 %v7914_v23  ;;  %v3888_v6 = vpop.f32.mrf.mxu2  ;;  %v8872_v4 = vpop.f32.mrf.mxu3 }
 0x52e   : > { %v3832_v51 = vpop.f32.mrf.mxu0  ;;  %v3861_v17 = vpop.f32.mrf.mxu1 }
 0x531   : > { %v8878_v34 = vpop.f32.mrf.mxu2  ;;  %v8880_v1 = vpop.f32.mrf.mxu3 }
 0x536   : > { %4119 = vmatmul.bf16.gmra.mxu2 %v8717_v49  ;;  %4148 = vmatmul.bf16.gmra.mxu3 %v8719_v41 }
 0x539   : > { %4061 = vmatmul.bf16.gmra.mxu0 %v8186_v43  ;;  %4090 = vmatmul.bf16.gmra.mxu1 %v8188_v36  ;;  %v9216_v43 = vld [vmem:[#allocation2_spill] sm:$0xff] }
 0x541   : > { %v8882_v23 = vpop.f32.mrf.mxu0  ;;  %v8884_v35 = vpop.f32.mrf.mxu1 }
 0x544   : > { %v8886_v39 = vpop.f32.mrf.mxu2  ;;  %v8888_v54 = vpop.f32.mrf.mxu3 }
 0x546   : > { %4124 = vmatmul.bf16.gmra.mxu2 %v8756_v33  ;;  %4153 = vmatmul.bf16.gmra.mxu3 %v8758_v63  ;;  %v8908_v33 = vperm.slane %v8905_v56, 0 }
 0x548   : > { %v3826_v57 = vadd.f32 %v3825_v52, %v8908_v33  ;;  %v3828_v21 = vadd.f32 %v3827_v38, %v8908_v33  ;;  %v3831_v48 = vadd.f32 %v3830_v32, %v8908_v33  ;;  %v3833_v45 = vadd.f32 %v3832_v51, %v8908_v33 }
 0x549   : > { %4066 = vmatmul.bf16.gmra.mxu0 %v8407_v20  ;;  %4095 = vmatmul.bf16.gmra.mxu1 %v9216_v43  ;;  %v8894_v36 = vpop.f32.mrf.mxu0  ;;  %v8896_v49 = vpop.f32.mrf.mxu1 }
 0x54a   : > { %v3855_v7 = vadd.f32 %v3854_v3, %v3826_v57  ;;  %v3857_v31 = vadd.f32 %v3856_v62, %v3828_v21  ;;  %v3860_v50 = vadd.f32 %v3859_v25, %v3831_v48  ;;  %v3862_v52 = vadd.f32 %v3861_v17, %v3833_v45  ;;  %v5450_v25 = vld [vmem:[%s5553_s24 + $0x20] sm:$0xff]  ;;  %v5453_v45 = vld [vmem:[%s5553_s24 + $0x50] sm:$0xff] }
 0x54b   : > { %v3836_v62 = vadd.f32 %v8882_v23, %v8908_v33  ;;  %v3838_v23 = vadd.f32 %v8894_v36, %v8908_v33 }
 0x54c   : > { %v8898_v41 = vpop.f32.mrf.mxu2  ;;  %v8900_v37 = vpop.f32.mrf.mxu3  ;;  %v3889_v15 = vadd.f32 %v3888_v6, %v3860_v50  ;;  %v3891_v38 = vadd.f32 %v8878_v34, %v3862_v52 }
 0x54d   : > { %v3865_v51 = vadd.f32 %v8884_v35, %v3836_v62  ;;  %v3867_v35 = vadd.f32 %v8896_v49, %v3838_v23 }
 0x54e   : > { %v3918_v59 = vadd.f32 %v8872_v4, %v3889_v15  ;;  %v3920_v4 = vadd.f32 %v8880_v1, %v3891_v38 }
 0x54f   : > { %v3894_v57 = vadd.f32 %v8886_v39, %v3865_v51 }
 0x551   : > { %v3923_v1 = vadd.f32 %v8888_v54, %v3894_v57 }
 0x556   : > { %4129 = vmatmul.bf16.gmra.mxu2 %v8780_v2  ;;  %4158 = vmatmul.bf16.gmra.mxu3 %v8782_v29  ;;  %v8912_v20 = vpop.f32.mrf.mxu0  ;;  %v8914_v63 = vpop.f32.mrf.mxu1  ;;  %v3884_v29 = vadd.f32 %v3883_v19, %v3855_v7 }
 0x557   : > { %v3841_v36 = vadd.f32 %v8912_v20, %v8908_v33 }
 0x558   : > { %v3913_v5 = vadd.f32 %v3912_v55, %v3884_v29 }
 0x559   : > { %v8917_v42 = vpop.f32.mrf.mxu2  ;;  %v8919_v14 = vpop.f32.mrf.mxu3  ;;  %4071 = vmatmul.bf16.gmra.mxu0 %v8622_v18  ;;  %4100 = vmatmul.bf16.gmra.mxu1 %v8624_v27  ;;  %v3886_v27 = vadd.f32 %v3885_v22, %v3857_v31  ;;  %v3870_v49 = vadd.f32 %v8914_v63, %v3841_v36 }
 0x55b   : > { %v3915_v8 = vadd.f32 %v3914_v47, %v3886_v27 }
 0x55e   : > { %v8923_v46 = vpop.f32.mrf.mxu0  ;;  %v8925_v2 = vpop.f32.mrf.mxu1 }
 0x55f   : > { %v3843_v20 = vadd.f32 %v8923_v46, %v8908_v33 }
 0x561   : > { %v8928_v60 = vpop.f32.mrf.mxu2  ;;  %v8930_v0 = vpop.f32.mrf.mxu3 }
 0x566   : > { %v3941_v28 = vpop.f32.mrf.mxu0  ;;  %v3970_v18 = vpop.f32.mrf.mxu1 }
 0x567   : > { %v3942_v30 = vadd.f32 %v3941_v28, %v3913_v5  ;;  %v5451_v5 = vld [vmem:[%s5553_s24 + $0x30] sm:$0xff] }
 0x569   : > { %v3971_v61 = vadd.f32 %v3970_v18, %v3942_v30  ;;  %v8933_v44 = vpop.f32.mrf.mxu2  ;;  %v8935_v10 = vpop.f32.mrf.mxu3  ;;  %v3896_v30 = vadd.f32 %v8898_v41, %v3867_v35 }
 0x56b   : > { %v4164_v13 = vadd.f32 %v5448_v12, %v3971_v61  ;;  %v5452_v12 = vld [vmem:[%s5553_s24 + $0x40] sm:$0xff]  ;;  %v3925_v54 = vadd.f32 %v8900_v37, %v3896_v30 }
 0x56d   : > { %4180 = vst [vmem:[%s8942_s22] sm:$0xff] %v4164_v13 }
 0x56e   : > { %v3943_v9 = vpop.f32.mrf.mxu0  ;;  %v3972_v58 = vpop.f32.mrf.mxu1 }
 0x56f   : > { %v3944_v16 = vadd.f32 %v3943_v9, %v3915_v8  ;;  %v3899_v9 = vadd.f32 %v8917_v42, %v3870_v49  ;;  %v5457_v49 = vld [vmem:[%s5553_s24 + $0x18] sm:$0xff] }
 0x571   : > { %v3973_v11 = vadd.f32 %v3972_v58, %v3944_v16  ;;  %v8947_v40 = vpop.f32.mrf.mxu2  ;;  %v8949_v24 = vpop.f32.mrf.mxu3  ;;  %v3928_v63 = vadd.f32 %v8919_v14, %v3899_v9  ;;  %v9006_v14 = vperm.slane %v8905_v56, 1 }
 0x573   : > { %v4166_v53 = vadd.f32 %v5449_v26, %v3973_v11  ;;  %v3872_v11 = vadd.f32 %v8925_v2, %v3843_v20 }
 0x575   : > { %4182 = vst [vmem:[%s8942_s22 + $0x10] sm:$0xff] %v4166_v53 }
 0x576   : > { %v3946_v3 = vpop.f32.mrf.mxu0  ;;  %v3975_v19 = vpop.f32.mrf.mxu1 }
 0x577   : > { %v3947_v55 = vadd.f32 %v3946_v3, %v3918_v59  ;;  %v3901_v59 = vadd.f32 %v8928_v60, %v3872_v11  ;;  %v5454_v3 = vld [vmem:[%s5553_s24 + $0x60] sm:$0xff]  ;;  %v4000_v60 = vadd.f32 %v8933_v44, %v9006_v14  ;;  %v5458_v11 = vld [vmem:[%s5553_s24 + $0x28] sm:$0xff] }
 0x579   : > { %v3976_v22 = vadd.f32 %v3975_v19, %v3947_v55  ;;  %v8957_v47 = vpop.f32.mrf.mxu2  ;;  %v8959_v32 = vpop.f32.mrf.mxu3  ;;  %v3930_v55 = vadd.f32 %v8930_v0, %v3901_v59  ;;  %v4029_v0 = vadd.f32 %v8935_v10, %v4000_v60 }
 0x57b   : > { %v4168_v6 = vadd.f32 %v5450_v25, %v3976_v22 }
 0x57d   : > { %4184 = vst [vmem:[%s8942_s22 + $0x20] sm:$0xff] %v4168_v6 }
 0x57e   : > { %v3948_v17 = vpop.f32.mrf.mxu0  ;;  %v3977_v43 = vpop.f32.mrf.mxu1 }
 0x57f   : > { %v3949_v34 = vadd.f32 %v3948_v17, %v3920_v4  ;;  %v5455_v4 = vld [vmem:[%s5553_s24 + $0x70] sm:$0xff] }
 0x581   : > { %v3978_v7 = vadd.f32 %v3977_v43, %v3949_v34  ;;  %v8968_v29 = vpop.f32.mrf.mxu2  ;;  %v8970_v21 = vpop.f32.mrf.mxu3  ;;  %v4002_v34 = vadd.f32 %v8947_v40, %v9006_v14 }
 0x583   : > { %v4170_v31 = vadd.f32 %v5451_v5, %v3978_v7  ;;  %v4031_v5 = vadd.f32 %v8949_v24, %v4002_v34  ;;  %v5460_v34 = vld [vmem:[%s5553_s24 + $0x48] sm:$0xff] }
 0x585   : > { %4186 = vst [vmem:[%s8942_s22 + $0x30] sm:$0xff] %v4170_v31 }
 0x586   : > { %v3951_v28 = vpop.f32.mrf.mxu0  ;;  %v3980_v18 = vpop.f32.mrf.mxu1 }
 0x587   : > { %v3952_v39 = vadd.f32 %v3951_v28, %v3923_v1  ;;  %v5456_v28 = vld [vmem:[%s5553_s24 + $0x8] sm:$0xff] }
 0x589   : > { %v3981_v27 = vadd.f32 %v3980_v18, %v3952_v39  ;;  %v8979_v48 = vpop.f32.mrf.mxu2  ;;  %v8981_v61 = vpop.f32.mrf.mxu3  ;;  %v4005_v39 = vadd.f32 %v8957_v47, %v9006_v14 }
 0x58b   : > { %v4172_v13 = vadd.f32 %v5452_v12, %v3981_v27  ;;  %v4034_v12 = vadd.f32 %v8959_v32, %v4005_v39 }
 0x58d   : > { %4188 = vst [vmem:[%s8942_s22 + $0x40] sm:$0xff] %v4172_v13 }
 0x58e   : > { %v3953_v8 = vpop.f32.mrf.mxu0  ;;  %v3982_v50 = vpop.f32.mrf.mxu1 }
 0x58f   : > { %v3954_v41 = vadd.f32 %v3953_v8, %v3925_v54 }
 0x591   : > { %v3983_v58 = vadd.f32 %v3982_v50, %v3954_v41  ;;  %v8990_v16 = vpop.f32.mrf.mxu2  ;;  %v8992_v15 = vpop.f32.mrf.mxu3  ;;  %v4007_v41 = vadd.f32 %v8968_v29, %v9006_v14 }
 0x593   : > { %v4174_v37 = vadd.f32 %v5453_v45, %v3983_v58  ;;  %v4036_v45 = vadd.f32 %v8970_v21, %v4007_v41 }
 0x595   : > { %4190 = vst [vmem:[%s8942_s22 + $0x50] sm:$0xff] %v4174_v37 }
 0x596   : > { %v3956_v26 = vpop.f32.mrf.mxu0  ;;  %v3985_v53 = vpop.f32.mrf.mxu1 }
 0x597   : > { %v3957_v42 = vadd.f32 %v3956_v26, %v3928_v63 }
 0x599   : > { %v3986_v33 = vadd.f32 %v3985_v53, %v3957_v42  ;;  %v8999_v46 = vpop.f32.mrf.mxu2  ;;  %v9001_v52 = vpop.f32.mrf.mxu3  ;;  %v4010_v42 = vadd.f32 %v8979_v48, %v9006_v14 }
 0x59b   : > { %v4176_v19 = vadd.f32 %v5454_v3, %v3986_v33 }
 0x59d   : > { %4192 = vst [vmem:[%s8942_s22 + $0x60] sm:$0xff] %v4176_v19  ;;  %v4039_v19 = vadd.f32 %v8981_v61, %v4010_v42 }
 0x59e   : > { %v3958_v2 = vpop.f32.mrf.mxu0  ;;  %v3987_v38 = vpop.f32.mrf.mxu1 }
 0x59f   : > { %v3959_v62 = vadd.f32 %v3958_v2, %v3930_v55 }
 0x5a1   : > { %v3988_v22 = vadd.f32 %v3987_v38, %v3959_v62  ;;  %v9011_v25 = vpop.f32.mrf.mxu2  ;;  %v9013_v6 = vpop.f32.mrf.mxu3  ;;  %v5459_v38 = vld [vmem:[%s5553_s24 + $0x38] sm:$0xff] }
 0x5a3   : > { %v4178_v51 = vadd.f32 %v5455_v4, %v3988_v22  ;;  %v4012_v22 = vadd.f32 %v8990_v16, %v9006_v14 }
 0x5a5   : > { %4194 = vst [vmem:[%s8942_s22 + $0x70] sm:$0xff] %v4178_v51 }
 0x5a6   : > { %v4057_v56 = vpop.f32.mrf.mxu0  ;;  %v4086_v17 = vpop.f32.mrf.mxu1 }
 0x5a7   : > { %v4058_v43 = vadd.f32 %v4057_v56, %v4029_v0  ;;  %v4041_v56 = vadd.f32 %v8992_v15, %v4012_v22 }
 0x5a9   : > { %v4087_v57 = vadd.f32 %v4086_v17, %v4058_v43  ;;  %v4115_v44 = vpop.f32.mrf.mxu2  ;;  %v4144_v23 = vpop.f32.mrf.mxu3 }
 0x5ab   : > { %v4116_v7 = vadd.f32 %v4115_v44, %v4087_v57 }
 0x5ad   : > { %v4145_v31 = vadd.f32 %v4144_v23, %v4116_v7  ;;  %v4015_v23 = vadd.f32 %v8999_v46, %v9006_v14 }
 0x5ae   : > { %v4059_v1 = vpop.f32.mrf.mxu0  ;;  %v4088_v35 = vpop.f32.mrf.mxu1 }
 0x5af   : > { %v4165_v10 = vadd.f32 %v5456_v28, %v4145_v31  ;;  %v4060_v18 = vadd.f32 %v4059_v1, %v4031_v5  ;;  %v4044_v1 = vadd.f32 %v9001_v52, %v4015_v23 }
 0x5b1   : > { %4181 = vst [vmem:[%s8942_s22 + $0x8] sm:$0xff] %v4165_v10  ;;  %v4089_v30 = vadd.f32 %v4088_v35, %v4060_v18  ;;  %v4117_v40 = vpop.f32.mrf.mxu2  ;;  %v4146_v36 = vpop.f32.mrf.mxu3  ;;  %v5461_v10 = vld [vmem:[%s5553_s24 + $0x58] sm:$0xff] }
 0x5b3   : > { %v4118_v27 = vadd.f32 %v4117_v40, %v4089_v30  ;;  %v4017_v30 = vadd.f32 %v9011_v25, %v9006_v14 }
 0x5b5   : > { %v4147_v13 = vadd.f32 %v4146_v36, %v4118_v27  ;;  %v4046_v52 = vadd.f32 %v9013_v6, %v4017_v30 }
 0x5b6   : > { %v4062_v24 = vpop.f32.mrf.mxu0  ;;  %v4091_v54 = vpop.f32.mrf.mxu1 }
 0x5b7   : > { %v4167_v8 = vadd.f32 %v5457_v49, %v4147_v13  ;;  %v4063_v50 = vadd.f32 %v4062_v24, %v4034_v12  ;;  %v5462_v24 = vld [vmem:[%s5553_s24 + $0x68] sm:$0xff] }
 0x5b9   : > { %4183 = vst [vmem:[%s8942_s22 + $0x18] sm:$0xff] %v4167_v8  ;;  %v4092_v47 = vadd.f32 %v4091_v54, %v4063_v50  ;;  %v4120_v9 = vpop.f32.mrf.mxu2  ;;  %v4149_v20 = vpop.f32.mrf.mxu3 }
 0x5bb   : > { %v4121_v58 = vadd.f32 %v4120_v9, %v4092_v47  ;;  %v5463_v9 = vld [vmem:[%s5553_s24 + $0x78] sm:$0xff] }
 0x5bd   : > { %v4150_v37 = vadd.f32 %v4149_v20, %v4121_v58 }
 0x5be   : > { %v4064_v32 = vpop.f32.mrf.mxu0  ;;  %v4093_v63 = vpop.f32.mrf.mxu1 }
 0x5bf   : > { %v4169_v26 = vadd.f32 %v5458_v11, %v4150_v37  ;;  %v4065_v53 = vadd.f32 %v4064_v32, %v4036_v45 }
 0x5c1   : > { %4185 = vst [vmem:[%s8942_s22 + $0x28] sm:$0xff] %v4169_v26  ;;  %v4094_v29 = vadd.f32 %v4093_v63, %v4065_v53  ;;  %v4122_v59 = vpop.f32.mrf.mxu2  ;;  %v4151_v33 = vpop.f32.mrf.mxu3 }
 0x5c3   : > { %v4123_v3 = vadd.f32 %v4122_v59, %v4094_v29 }
 0x5c5   : > { %v4152_v55 = vadd.f32 %v4151_v33, %v4123_v3 }
 0x5c6   : > { %v4067_v21 = vpop.f32.mrf.mxu0  ;;  %v4096_v2 = vpop.f32.mrf.mxu1 }
 0x5c7   : > { %v4171_v62 = vadd.f32 %v5459_v38, %v4152_v55  ;;  %v4068_v60 = vadd.f32 %v4067_v21, %v4039_v19 }
 0x5c9   : > { %4187 = vst [vmem:[%s8942_s22 + $0x38] sm:$0xff] %v4171_v62  ;;  %v4097_v48 = vadd.f32 %v4096_v2, %v4068_v60  ;;  %v4125_v4 = vpop.f32.mrf.mxu2  ;;  %v4154_v51 = vpop.f32.mrf.mxu3 }
 0x5cb   : > { %v4126_v0 = vadd.f32 %v4125_v4, %v4097_v48 }
 0x5cd   : > { %v4155_v17 = vadd.f32 %v4154_v51, %v4126_v0 }
 0x5ce   : > { %v4069_v61 = vpop.f32.mrf.mxu0  ;;  %v4098_v43 = vpop.f32.mrf.mxu1 }
 0x5cf   : > { %v4173_v57 = vadd.f32 %v5460_v34, %v4155_v17  ;;  %v4070_v44 = vadd.f32 %v4069_v61, %v4041_v56 }
 0x5d1   : > { %4189 = vst [vmem:[%s8942_s22 + $0x48] sm:$0xff] %v4173_v57  ;;  %v4099_v16 = vadd.f32 %v4098_v43, %v4070_v44  ;;  %v4127_v7 = vpop.f32.mrf.mxu2  ;;  %v4156_v5 = vpop.f32.mrf.mxu3 }
 0x5d3   : > { %v4128_v31 = vadd.f32 %v4127_v7, %v4099_v16 }
 0x5d5   : > { %v4157_v15 = vadd.f32 %v4156_v5, %v4128_v31 }
 0x5d6   : > { %v4072_v35 = vpop.f32.mrf.mxu0  ;;  %v4101_v28 = vpop.f32.mrf.mxu1 }
 0x5d7   : > { %v4175_v18 = vadd.f32 %v5461_v10, %v4157_v15  ;;  %v4073_v39 = vadd.f32 %v4072_v35, %v4044_v1 }
 0x5d9   : > { %4191 = vst [vmem:[%s8942_s22 + $0x58] sm:$0xff] %v4175_v18  ;;  %v4102_v46 = vadd.f32 %v4101_v28, %v4073_v39  ;;  %v4130_v40 = vpop.f32.mrf.mxu2  ;;  %v4159_v36 = vpop.f32.mrf.mxu3 }
 0x5db   : > { %v4131_v27 = vadd.f32 %v4130_v40, %v4102_v46 }
 0x5dd   : > { %v4160_v12 = vadd.f32 %v4159_v36, %v4131_v27 }
 0x5de   : > { %v4074_v13 = vpop.f32.mrf.mxu0  ;;  %v4103_v8 = vpop.f32.mrf.mxu1 }
 0x5df   : > { %v4177_v54 = vadd.f32 %v5462_v24, %v4160_v12  ;;  %v4075_v49 = vadd.f32 %v4074_v13, %v4046_v52 }
 0x5e1   : > { %4193 = vst [vmem:[%s8942_s22 + $0x68] sm:$0xff] %v4177_v54  ;;  %v4104_v50 = vadd.f32 %v4103_v8, %v4075_v49  ;;  %v4132_v41 = vpop.f32.mrf.mxu2  ;;  %v4161_v14 = vpop.f32.mrf.mxu3 }
 0x5e3   : > { %v4133_v47 = vadd.f32 %v4132_v41, %v4104_v50 }
 0x5e5   : > { %v4162_v25 = vadd.f32 %v4161_v14, %v4133_v47 }
 0x5e7   : > { %v4179_v20 = vadd.f32 %v5463_v9, %v4162_v25 }
 0x5e9   : > { %4195 = vst [vmem:[%s8942_s22 + $0x78] sm:$0xff] %v4179_v20 }
 0x5ea PF: > { %s16_s21 = sadd.s32 1, %s5470_s21  }
 0x5eb   : > { %p13_p4 = scmp.ge.s32.totalorder %s16_s21, 4  }
 0x5ed   :  { %15 = sbr.rel (!%p13_p4) target bundleno = 1 (0x1), region = 87 }

</bundles_post_ra>
